<compile_context>
chip_gen: v5e
topology: v5e:2x2
jax: 0.10.0
libtpu: 0.0.40
codegen_flags: <defaults>
</compile_context>

<pallas_src>
import functools

import jax
import jax.numpy as jnp
from jax.experimental import pallas as pl
from jax.experimental.pallas import tpu as pltpu


def _round_up(x, m):
    return (x + m - 1) // m * m


def _chip_tuning():
    """Per-generation row-tile cap / scoped-VMEM budget / TC-split preference."""
    row_cap, vmem_limit, prefer_two = 1024, 48 * 1024 * 1024, True   # safe on v7x
    try:
        info = pltpu.get_tpu_info()
        vmem = getattr(info, "vmem_capacity_bytes", None)
        if vmem is not None and vmem >= 100 * 1024 * 1024:
            # v5e / v6e: 128 MiB VMEM, single TensorCore per chip.
            row_cap, vmem_limit, prefer_two = 2048, 80 * 1024 * 1024, False
    except Exception:
        pass
    return row_cap, vmem_limit, prefer_two


_ROW_CAP, _VMEM_LIMIT, _PREFER_TWO_BLOCKS = _chip_tuning()


def _row_tile(m):
    """Row tile for matmul-style kernels.  No wrapper-side padding: the grid
    uses pl.cdiv and Pallas masks the partial edge block.  Tiles are multiples
    of 16 (bf16 sublane packing) unless a single full-extent block is used."""
    if m <= _ROW_CAP:
        if _PREFER_TWO_BLOCKS and m >= 64:
            return min(_round_up((m + 1) // 2, 16), m)
        return m
    return _ROW_CAP


# --------------------------------------------------------------------------
# Fused multi-segment matmul:  out = g( sum_i f(a_i) @ w_i )
#   f = ReLU(a*scale+bias) per segment (pre-activation BN), optional
#   g = (+bias, ReLU) epilogue (BN scale already folded into w wrapper-side)
# bf16 MXU operands, f32 accumulation, bf16 HBM activations.
# --------------------------------------------------------------------------
def _mm_multi_kernel(*refs, nseg, pre_act, has_out_bias, out_relu):
    o_ref = refs[-1]
    a_refs = refs[0:nseg]
    w_refs = refs[nseg:2 * nseg]
    idx = 2 * nseg
    if pre_act:
        s_refs = refs[idx:idx + nseg]
        b_refs = refs[idx + nseg:idx + 2 * nseg]
        idx += 2 * nseg
    if has_out_bias:
        ob_ref = refs[idx]

    acc = None
    for i in range(nseg):
        a = a_refs[i][...]
        if pre_act:
            a = jnp.maximum(a.astype(jnp.float32) * s_refs[i][...] + b_refs[i][...], 0.0)
        d = jnp.dot(a.astype(jnp.bfloat16), w_refs[i][...],
                    preferred_element_type=jnp.float32)
        acc = d if acc is None else acc + d
    if has_out_bias:
        acc = acc + ob_ref[...]
    if out_relu:
        acc = jnp.maximum(acc, 0.0)
    o_ref[...] = acc.astype(o_ref.dtype)


def matmul_multi(a_list, w_list, in_scales=None, in_biases=None,
                 out_bias=None, out_relu=False, out_dtype=jnp.bfloat16):
    nseg = len(a_list)
    M = a_list[0].shape[0]
    Cout = w_list[0].shape[1]
    pre_act = in_scales is not None
    has_ob = out_bias is not None
    tm = _row_tile(M)

    args, specs = [], []
    for a in a_list:
        k = a.shape[1]
        args.append(a.astype(jnp.bfloat16))
        specs.append(pl.BlockSpec((tm, k), lambda i: (i, 0)))
    for w in w_list:
        args.append(w.astype(jnp.bfloat16))
        specs.append(pl.BlockSpec(w.shape, lambda i: (0, 0)))
    if pre_act:
        for s in in_scales:
            s2 = jnp.asarray(s, jnp.float32).reshape(1, -1)
            args.append(s2)
            specs.append(pl.BlockSpec(s2.shape, lambda i: (0, 0)))
        for b in in_biases:
            b2 = jnp.asarray(b, jnp.float32).reshape(1, -1)
            args.append(b2)
            specs.append(pl.BlockSpec(b2.shape, lambda i: (0, 0)))
    if has_ob:
        ob = jnp.asarray(out_bias, jnp.float32).reshape(1, Cout)
        args.append(ob)
        specs.append(pl.BlockSpec((1, Cout), lambda i: (0, 0)))

    return pl.pallas_call(
        functools.partial(_mm_multi_kernel, nseg=nseg, pre_act=pre_act,
                          has_out_bias=has_ob, out_relu=out_relu),
        out_shape=jax.ShapeDtypeStruct((M, Cout), out_dtype),
        grid=(pl.cdiv(M, tm),),
        in_specs=specs,
        out_specs=pl.BlockSpec((tm, Cout), lambda i: (i, 0)),
        compiler_params=pltpu.CompilerParams(
            dimension_semantics=("parallel",),
            vmem_limit_bytes=_VMEM_LIMIT),
    )(*args)


# --------------------------------------------------------------------------
# Convolutions
# --------------------------------------------------------------------------
def conv1x1_segments(segs, w_oihw, in_scale, in_bias,
                     out_scale=None, out_bias=None, out_relu=False):
    """Pointwise conv over a list of channel segments (the running DenseNet
    feature map is never concatenated in HBM).  Pre-activation BN+ReLU fused
    per segment; optional epilogue BN(+ReLU) with its scale folded into W."""
    N, H, W, _ = segs[0].shape
    Cout = w_oihw.shape[0]
    M = N * H * W
    w_full = w_oihw.reshape(Cout, -1).T.astype(jnp.float32)       # (Cin_total, Cout)
    if out_scale is not None:
        w_full = w_full * out_scale[None, :]
    a_list, w_list, s_list, b_list = [], [], [], []
    off = 0
    for seg in segs:
        c = seg.shape[-1]
        a_list.append(seg.reshape(M, c))
        w_list.append(w_full[off:off + c])
        s_list.append(in_scale[off:off + c])
        b_list.append(in_bias[off:off + c])
        off += c
    y = matmul_multi(a_list, w_list, s_list, b_list,
                     out_bias=out_bias, out_relu=out_relu)
    return y.reshape(N, H, W, Cout)


def conv7x7_stem(x_nhwc, w_oihw, stride, pad, out_scale, out_bias):
    """Stem 7x7/s2 conv via im2col (3 input channels, runs once).  The stem
    BN scale is folded into the weight; bias+ReLU are in-kernel; bf16 out."""
    N, H, W, Cin = x_nhwc.shape
    Cout, _, KH, KW = w_oihw.shape
    xp = jnp.pad(x_nhwc, ((0, 0), (pad, pad), (pad, pad), (0, 0))).astype(jnp.bfloat16)
    Ho = (H + 2 * pad - KH) // stride + 1
    Wo = (W + 2 * pad - KW) // stride + 1
    patches = [xp[:, kh:kh + Ho * stride:stride, kw:kw + Wo * stride:stride, :]
               for kh in range(KH) for kw in range(KW)]
    a = jnp.concatenate(patches, axis=-1).reshape(N * Ho * Wo, KH * KW * Cin)
    w_mat = jnp.transpose(w_oihw, (2, 3, 1, 0)).reshape(KH * KW * Cin, Cout)
    w_mat = w_mat.astype(jnp.float32) * out_scale[None, :]
    y = matmul_multi([a], [w_mat], out_bias=out_bias, out_relu=True)
    return y.reshape(N, Ho, Wo, Cout)


def _conv3x3_kernel(x_ref, w_ref, o_ref, *, H, Wc, K):
    # x_ref: (H+2, Wc, 3*Cin) bf16 zero-padded image, kw folded into channels
    # w_ref: (3, 3*Cin, Cout) bf16 ; o_ref: (H*Wc, Cout) bf16
    acc = None
    for kh in range(3):
        a = x_ref[kh:kh + H].reshape(H * Wc, K)     # leading-dim slice: no relayout
        d = jnp.dot(a, w_ref[kh], preferred_element_type=jnp.float32)
        acc = d if acc is None else acc + d
    o_ref[...] = acc.astype(o_ref.dtype)


def conv3x3_same(x_nhwc, w_oihw):
    """3x3 / stride 1 / pad 1 conv.  The kw taps are pre-folded into the
    channel (lane) axis wrapper-side (K = 3*Cin, bf16), so the kernel only
    slices the padded image along the leading H axis and accumulates three
    aligned MXU matmuls per image (one image per parallel grid step)."""
    N, H, W, Cin = x_nhwc.shape
    Cout = w_oihw.shape[0]
    Wc = _round_up(W, 16)          # bf16 sublane tile: keeps the in-kernel
                                   # (H,Wc,K)->(H*Wc,K) reshape layout-trivial
    x = x_nhwc.astype(jnp.bfloat16)
    xp = jnp.pad(x, ((0, 0), (1, 1), (1, 1 + Wc - W), (0, 0)))
    xw = jnp.concatenate([xp[:, :, kw:kw + Wc, :] for kw in range(3)], axis=-1)
    K = 3 * Cin
    w_t = jnp.transpose(w_oihw, (2, 3, 1, 0))                     # (3,3,Cin,Cout)
    w_k = jnp.stack([w_t[kh].reshape(K, Cout) for kh in range(3)],
                    axis=0).astype(jnp.bfloat16)                  # (3, K, Cout)
    out = pl.pallas_call(
        functools.partial(_conv3x3_kernel, H=H, Wc=Wc, K=K),
        out_shape=jax.ShapeDtypeStruct((N, H * Wc, Cout), jnp.bfloat16),
        grid=(N,),
        in_specs=[pl.BlockSpec((None, H + 2, Wc, K), lambda n: (n, 0, 0, 0)),
                  pl.BlockSpec((3, K, Cout), lambda n: (0, 0, 0))],
        out_specs=pl.BlockSpec((None, H * Wc, Cout), lambda n: (n, 0, 0)),
        compiler_params=pltpu.CompilerParams(
            dimension_semantics=("parallel",),
            vmem_limit_bytes=_VMEM_LIMIT),
    )(xw, w_k)
    out = out.reshape(N, H, Wc, Cout)
    return out if Wc == W else out[:, :, :W, :]


# --------------------------------------------------------------------------
# Pooling
# --------------------------------------------------------------------------
def _max_reduce_kernel(x_ref, o_ref):
    o_ref[...] = jnp.max(x_ref[...], axis=0)


def maxpool2d(x, k, s, pad):
    """Stem MaxPool via a stacked-window max-reduce kernel (runs once, bf16).
    TODO(synk): shifted-slice in-VMEM variant to drop the k*k window copy."""
    N, H, W, C = x.shape
    xp = jnp.pad(x, ((0, 0), (pad, pad), (pad, pad), (0, 0)),
                 constant_values=-jnp.inf)
    Ho = (H + 2 * pad - k) // s + 1
    Wo = (W + 2 * pad - k) // s + 1
    wins = jnp.stack(
        [xp[:, kh:kh + Ho * s:s, kw:kw + Wo * s:s, :].reshape(-1, C)
         for kh in range(k) for kw in range(k)], axis=0)          # (k*k, M, C)
    KK, M, _ = wins.shape
    tm = _row_tile(M)
    out = pl.pallas_call(
        _max_reduce_kernel,
        out_shape=jax.ShapeDtypeStruct((M, C), x.dtype),
        grid=(pl.cdiv(M, tm),),
        in_specs=[pl.BlockSpec((KK, tm, C), lambda i: (0, i, 0))],
        out_specs=pl.BlockSpec((tm, C), lambda i: (i, 0)),
        compiler_params=pltpu.CompilerParams(
            dimension_semantics=("parallel",),
            vmem_limit_bytes=_VMEM_LIMIT),
    )(wins)
    return out.reshape(N, Ho, Wo, C)


def _avgpool2x2_kernel(x_ref, o_ref, *, C):
    x = x_ref[...].astype(jnp.float32)            # (Ho, 2, Wo, 2*C)
    s = x[:, 0] + x[:, 1]                         # H-pair sum -> (Ho, Wo, 2*C)
    o_ref[...] = ((s[..., :C] + s[..., C:]) * 0.25).astype(o_ref.dtype)


def avgpool2x2(x):
    """2x2/s2 average pool.  The W-pair is merged into the lane (channel)
    axis with a free row-major reshape; the kernel sums the H-pair over a
    leading dim and the W-pair with a lane-slice add.  bf16 in / bf16 out.
    TODO(synk): fuse into the preceding transition 1x1-conv kernel."""
    N, H, W, C = x.shape
    Ho, Wo = H // 2, W // 2
    xv = x[:, :2 * Ho, :2 * Wo, :].reshape(N, Ho, 2, Wo, 2 * C)   # free reshape
    return pl.pallas_call(
        functools.partial(_avgpool2x2_kernel, C=C),
        out_shape=jax.ShapeDtypeStruct((N, Ho, Wo, C), x.dtype),
        grid=(N,),
        in_specs=[pl.BlockSpec((None, Ho, 2, Wo, 2 * C),
                               lambda n: (n, 0, 0, 0, 0))],
        out_specs=pl.BlockSpec((None, Ho, Wo, C), lambda n: (n, 0, 0, 0)),
        compiler_params=pltpu.CompilerParams(
            dimension_semantics=("parallel",),
            vmem_limit_bytes=_VMEM_LIMIT),
    )(xv)


# --------------------------------------------------------------------------
# Fused classifier tail: GAP + FC(+bias) + softmax over channel segments
# --------------------------------------------------------------------------
def _head_kernel(*refs, nseg, inv_hw):
    o_ref = refs[-1]
    a_refs = refs[0:nseg]
    w_refs = refs[nseg:2 * nseg]
    b_ref = refs[2 * nseg]
    logits = None
    for i in range(nseg):
        f = jnp.sum(a_refs[i][...].astype(jnp.float32), axis=1) * inv_hw  # GAP
        d = jnp.dot(f.astype(jnp.bfloat16), w_refs[i][...],
                    preferred_element_type=jnp.float32)
        logits = d if logits is None else logits + d
    logits = logits + b_ref[...]
    m = jnp.max(logits, axis=-1, keepdims=True)
    e = jnp.exp(logits - m)
    o_ref[...] = e * pl.reciprocal(jnp.sum(e, axis=-1, keepdims=True),
                                   approx=True)


def classifier_head(segs, fc_w, fc_b):
    N, H, W, _ = segs[0].shape
    ncls = fc_w.shape[0]
    args, specs = [], []
    for seg in segs:
        c = seg.shape[-1]
        args.append(seg.reshape(N, H * W, c))
        specs.append(pl.BlockSpec((N, H * W, c), lambda: (0, 0, 0)))
    off = 0
    for seg in segs:
        c = seg.shape[-1]
        args.append(fc_w[:, off:off + c].T.astype(jnp.bfloat16))  # (c, ncls)
        specs.append(pl.BlockSpec((c, ncls), lambda: (0, 0)))
        off += c
    args.append(fc_b.reshape(1, ncls).astype(jnp.float32))
    specs.append(pl.BlockSpec((1, ncls), lambda: (0, 0)))
    return pl.pallas_call(
        functools.partial(_head_kernel, nseg=len(segs), inv_hw=1.0 / (H * W)),
        out_shape=jax.ShapeDtypeStruct((N, ncls), jnp.float32),
        in_specs=specs,
        out_specs=pl.BlockSpec((N, ncls), lambda: (0, 0)),
        compiler_params=pltpu.CompilerParams(vmem_limit_bytes=_VMEM_LIMIT),
    )(*args)


# --------------------------------------------------------------------------
# Parameters (deterministic, kaiming-normal conv weights, eval-mode BN)
# --------------------------------------------------------------------------
def _bn_init(c):
    return {"gamma": jnp.ones((c,), jnp.float32),
            "beta": jnp.zeros((c,), jnp.float32),
            "mean": jnp.zeros((c,), jnp.float32),
            "var": jnp.ones((c,), jnp.float32)}


def _bn_affine(bn, eps=1e-5):
    scale = bn["gamma"] * jax.lax.rsqrt(bn["var"] + eps)
    bias = bn["beta"] - bn["mean"] * scale
    return scale, bias


def _kaiming(key, shape):
    fan_in = shape[1] * shape[2] * shape[3]
    std = (2.0 / fan_in) ** 0.5
    return std * jax.random.normal(key, shape, dtype=jnp.float32)


def init_densenet(key, feature_num, growth_rate, block_nums,
                  compress_ratio=0.5, scale_factor=4,
                  classifier=False, num_classes=1000):
    keys = list(jax.random.split(key, 4 + 8 * sum(block_nums)))
    kit = iter(keys)
    params = {"conv1": _kaiming(next(kit), (feature_num, 3, 7, 7)),
              "bn1": _bn_init(feature_num),
              "blocks": []}
    fn = feature_num
    for bi, n_layers in enumerate(block_nums):
        ch = fn
        layers = []
        for _ in range(n_layers):
            inter = scale_factor * growth_rate
            layers.append({
                "bn1": _bn_init(ch),
                "conv1": _kaiming(next(kit), (inter, ch, 1, 1)),
                "bn2": _bn_init(inter),
                "conv2": _kaiming(next(kit), (growth_rate, inter, 3, 3)),
            })
            ch += growth_rate
        block = {"layers": layers}
        if bi < len(block_nums) - 1:
            out_ch = int(fn * compress_ratio)
            block["trans"] = {"bn": _bn_init(ch),
                              "conv": _kaiming(next(kit), (out_ch, ch, 1, 1))}
            fn = out_ch
        else:
            fn = ch
        params["blocks"].append(block)
    if classifier:
        params["fc_w"] = 0.02 * jax.random.normal(
            next(kit), (num_classes, fn), dtype=jnp.float32)
        params["fc_b"] = jnp.zeros((num_classes,), jnp.float32)
    return params


# --------------------------------------------------------------------------
# Forward pass
# --------------------------------------------------------------------------
def densenet_forward(params, x_nchw, classifier=False, eps=1e-5):
    x = jnp.transpose(x_nchw, (0, 2, 3, 1)).astype(jnp.float32)   # NCHW -> NHWC

    # layer1: Conv7x7/s2 (BN scale folded into W, bias+ReLU in-kernel) -> MaxPool3x3/s2
    s, b = _bn_affine(params["bn1"], eps)
    x = conv7x7_stem(x, params["conv1"], stride=2, pad=3, out_scale=s, out_bias=b)
    x = maxpool2d(x, 3, 2, 1)

    # Dense blocks (+ transitions).  The running feature map is a list of
    # channel segments; it is never concatenated in HBM.
    segs = [x]
    for block in params["blocks"]:
        for lp in block["layers"]:
            s1, b1 = _bn_affine(lp["bn1"], eps)
            s2, b2 = _bn_affine(lp["bn2"], eps)
            h = conv1x1_segments(segs, lp["conv1"], s1, b1,
                                 out_scale=s2, out_bias=b2, out_relu=True)
            g = conv3x3_same(h, lp["conv2"])
            # dropout: eval-mode identity
            segs.append(g)
        if "trans" in block:
            t = block["trans"]
            s, b = _bn_affine(t["bn"], eps)
            y = conv1x1_segments(segs, t["conv"], s, b)
            segs = [avgpool2x2(y)]

    if classifier:
        return classifier_head(segs, params["fc_w"], params["fc_b"])
    feat = jnp.concatenate([s_.astype(jnp.float32) for s_ in segs], axis=-1)
    return jnp.transpose(feat, (0, 3, 1, 2))                      # NHWC -> NCHW


if __name__ == "__main__":
    key = jax.random.PRNGKey(0)
    k_param, k_data = jax.random.split(key)

    feature_num, growth_rate, block_nums = 16, 8, [2, 2]
    classifier, num_classes = True, 10

    params = init_densenet(k_param, feature_num, growth_rate, block_nums,
                           compress_ratio=0.5, scale_factor=4,
                           classifier=classifier, num_classes=num_classes)

    x = jax.random.normal(k_data, (2, 3, 32, 32), dtype=jnp.float32)

    fwd = jax.jit(functools.partial(densenet_forward, classifier=classifier))
    out = fwd(params, x)
    jax.block_until_ready(out)

    assert out.shape == (2, num_classes)
    assert bool(jnp.all(jnp.isfinite(out)))
    print("KERNEL_OK")
</pallas_src>

<mosaic_0001>
module attributes {stable_mosaic.version = 11 : i64} {
  func.func @_mm_multi_kernel(%arg0: i32, %arg1: memref<256x147xbf16, #tpu.memory_space<vmem>>, %arg2: memref<147x16xbf16, #tpu.memory_space<vmem>>, %arg3: memref<1x16xf32, #tpu.memory_space<vmem>>, %arg4: memref<256x16xbf16, #tpu.memory_space<vmem>>) attributes {dimension_semantics = [#tpu.dimension_semantics<parallel>], iteration_bounds = array<i64: 2>, scalar_prefetch = 0 : i64, scratch_operands = 0 : i64, tpu.core_type = #tpu.core_type<tc>, window_params = [{transform_indices = @transform_0, window_bounds = array<i64: 256, 147>}, {pipeline_mode = #tpu.pipeline_mode<synchronous>, transform_indices = @transform_1, window_bounds = array<i64: 147, 16>}, {pipeline_mode = #tpu.pipeline_mode<synchronous>, transform_indices = @transform_2, window_bounds = array<i64: 1, 16>}, {transform_indices = @transform_3, window_bounds = array<i64: 256, 16>}]} {
    %c0 = arith.constant 0 : index
    %c0_0 = arith.constant 0 : index
    %0 = vector.load %arg1[%c0, %c0_0] : memref<256x147xbf16, #tpu.memory_space<vmem>>, vector<256x147xbf16>
    %c0_1 = arith.constant 0 : index
    %c0_2 = arith.constant 0 : index
    %1 = vector.load %arg2[%c0_1, %c0_2] : memref<147x16xbf16, #tpu.memory_space<vmem>>, vector<147x16xbf16>
    %cst = arith.constant dense<0.000000e+00> : vector<256x16xf32>
    %2 = tpu.matmul %0, %1, %cst {dimension_numbers = #tpu.dot_dimension_numbers<[1], [0], [0], [1], [0, 0, 1, 1], [], []>} : vector<256x147xbf16>, vector<147x16xbf16>, vector<256x16xf32> -> vector<256x16xf32>
    %c0_3 = arith.constant 0 : index
    %c0_4 = arith.constant 0 : index
    %3 = vector.load %arg3[%c0_3, %c0_4] : memref<1x16xf32, #tpu.memory_space<vmem>>, vector<1x16xf32>
    %4 = vector.broadcast %3 : vector<1x16xf32> to vector<256x16xf32>
    %5 = arith.addf %2, %4 : vector<256x16xf32>
    %cst_5 = arith.constant 0.000000e+00 : f32
    %6 = vector.broadcast %cst_5 : f32 to vector<256x16xf32>
    %7 = arith.maximumf %5, %6 : vector<256x16xf32>
    %8 = arith.truncf %7 : vector<256x16xf32> to vector<256x16xbf16>
    %c0_6 = arith.constant 0 : index
    %c0_7 = arith.constant 0 : index
    %9 = vector.load %arg4[%c0_6, %c0_7] : memref<256x16xbf16, #tpu.memory_space<vmem>>, vector<256x16xbf16>
    tpu.vector_store %arg4[%c0_6, %c0_7], %8 {strides = array<i32>} : memref<256x16xbf16, #tpu.memory_space<vmem>>, vector<256x16xbf16>,
    return
  }
  func.func @transform_0(%arg0: i32) -> (i32, i32) {
    %c0_i32 = arith.constant 0 : i32
    %c0_i32_0 = arith.constant 0 : i32
    return %arg0, %c0_i32 : i32, i32
  }
  func.func @transform_1(%arg0: i32) -> (i32, i32) {
    %c0_i32 = arith.constant 0 : i32
    %c0_i32_0 = arith.constant 0 : i32
    %c0_i32_1 = arith.constant 0 : i32
    return %c0_i32, %c0_i32_0 : i32, i32
  }
  func.func @transform_2(%arg0: i32) -> (i32, i32) {
    %c0_i32 = arith.constant 0 : i32
    %c0_i32_0 = arith.constant 0 : i32
    %c0_i32_1 = arith.constant 0 : i32
    return %c0_i32, %c0_i32_0 : i32, i32
  }
  func.func @transform_3(%arg0: i32) -> (i32, i32) {
    %c0_i32 = arith.constant 0 : i32
    %c0_i32_0 = arith.constant 0 : i32
    return %arg0, %c0_i32 : i32, i32
  }
}

module attributes {stable_mosaic.version = 11 : i64} {
  func.func @_max_reduce_kernel(%arg0: i32, %arg1: memref<9x64x16xbf16, #tpu.memory_space<vmem>>, %arg2: memref<64x16xbf16, #tpu.memory_space<vmem>>) attributes {dimension_semantics = [#tpu.dimension_semantics<parallel>], iteration_bounds = array<i64: 2>, scalar_prefetch = 0 : i64, scratch_operands = 0 : i64, tpu.core_type = #tpu.core_type<tc>, window_params = [{transform_indices = @transform_0, window_bounds = array<i64: 9, 64, 16>}, {transform_indices = @transform_1, window_bounds = array<i64: 64, 16>}]} {
    %c0 = arith.constant 0 : index
    %c0_0 = arith.constant 0 : index
    %c0_1 = arith.constant 0 : index
    %0 = vector.load %arg1[%c0, %c0_0, %c0_1] : memref<9x64x16xbf16, #tpu.memory_space<vmem>>, vector<9x64x16xbf16>
    %cst = arith.constant dense<0xFF80> : vector<64x16xbf16>
    %1 = vector.multi_reduction <maximumf>, %0, %cst [0] : vector<9x64x16xbf16> to vector<64x16xbf16>
    %c0_2 = arith.constant 0 : index
    %c0_3 = arith.constant 0 : index
    %2 = vector.load %arg2[%c0_2, %c0_3] : memref<64x16xbf16, #tpu.memory_space<vmem>>, vector<64x16xbf16>
    tpu.vector_store %arg2[%c0_2, %c0_3], %1 {strides = array<i32>} : memref<64x16xbf16, #tpu.memory_space<vmem>>, vector<64x16xbf16>,
    return
  }
  func.func @transform_0(%arg0: i32) -> (i32, i32, i32) {
    %c0_i32 = arith.constant 0 : i32
    %c0_i32_0 = arith.constant 0 : i32
    %c0_i32_1 = arith.constant 0 : i32
    return %c0_i32, %arg0, %c0_i32_0 : i32, i32, i32
  }
  func.func @transform_1(%arg0: i32) -> (i32, i32) {
    %c0_i32 = arith.constant 0 : i32
    %c0_i32_0 = arith.constant 0 : i32
    return %arg0, %c0_i32 : i32, i32
  }
}

module attributes {stable_mosaic.version = 11 : i64} {
  func.func @_mm_multi_kernel(%arg0: i32, %arg1: memref<64x16xbf16, #tpu.memory_space<vmem>>, %arg2: memref<16x32xbf16, #tpu.memory_space<vmem>>, %arg3: memref<1x16xf32, #tpu.memory_space<vmem>>, %arg4: memref<1x16xf32, #tpu.memory_space<vmem>>, %arg5: memref<1x32xf32, #tpu.memory_space<vmem>>, %arg6: memref<64x32xbf16, #tpu.memory_space<vmem>>) attributes {dimension_semantics = [#tpu.dimension_semantics<parallel>], iteration_bounds = array<i64: 2>, scalar_prefetch = 0 : i64, scratch_operands = 0 : i64, tpu.core_type = #tpu.core_type<tc>, window_params = [{transform_indices = @transform_0, window_bounds = array<i64: 64, 16>}, {pipeline_mode = #tpu.pipeline_mode<synchronous>, transform_indices = @transform_1, window_bounds = array<i64: 16, 32>}, {pipeline_mode = #tpu.pipeline_mode<synchronous>, transform_indices = @transform_2, window_bounds = array<i64: 1, 16>}, {pipeline_mode = #tpu.pipeline_mode<synchronous>, transform_indices = @transform_3, window_bounds = array<i64: 1, 16>}, {pipeline_mode = #tpu.pipeline_mode<synchronous>, transform_indices = @transform_4, window_bounds = array<i64: 1, 32>}, {transform_indices = @transform_5, window_bounds = array<i64: 64, 32>}]} {
    %c0 = arith.constant 0 : index
    %c0_0 = arith.constant 0 : index
    %0 = vector.load %arg1[%c0, %c0_0] : memref<64x16xbf16, #tpu.memory_space<vmem>>, vector<64x16xbf16>
    %1 = arith.extf %0 : vector<64x16xbf16> to vector<64x16xf32>
    %c0_1 = arith.constant 0 : index
    %c0_2 = arith.constant 0 : index
    %2 = vector.load %arg3[%c0_1, %c0_2] : memref<1x16xf32, #tpu.memory_space<vmem>>, vector<1x16xf32>
    %3 = vector.broadcast %2 : vector<1x16xf32> to vector<64x16xf32>
    %4 = arith.mulf %1, %3 : vector<64x16xf32>
    %c0_3 = arith.constant 0 : index
    %c0_4 = arith.constant 0 : index
    %5 = vector.load %arg4[%c0_3, %c0_4] : memref<1x16xf32, #tpu.memory_space<vmem>>, vector<1x16xf32>
    %6 = vector.broadcast %5 : vector<1x16xf32> to vector<64x16xf32>
    %7 = arith.addf %4, %6 : vector<64x16xf32>
    %cst = arith.constant 0.000000e+00 : f32
    %8 = vector.broadcast %cst : f32 to vector<64x16xf32>
    %9 = arith.maximumf %7, %8 : vector<64x16xf32>
    %10 = arith.truncf %9 : vector<64x16xf32> to vector<64x16xbf16>
    %c0_5 = arith.constant 0 : index
    %c0_6 = arith.constant 0 : index
    %11 = vector.load %arg2[%c0_5, %c0_6] : memref<16x32xbf16, #tpu.memory_space<vmem>>, vector<16x32xbf16>
    %cst_7 = arith.constant dense<0.000000e+00> : vector<64x32xf32>
    %12 = tpu.matmul %10, %11, %cst_7 {dimension_numbers = #tpu.dot_dimension_numbers<[1], [0], [0], [1], [0, 0, 1, 1], [], []>} : vector<64x16xbf16>, vector<16x32xbf16>, vector<64x32xf32> -> vector<64x32xf32>
    %c0_8 = arith.constant 0 : index
    %c0_9 = arith.constant 0 : index
    %13 = vector.load %arg5[%c0_8, %c0_9] : memref<1x32xf32, #tpu.memory_space<vmem>>, vector<1x32xf32>
    %14 = vector.broadcast %13 : vector<1x32xf32> to vector<64x32xf32>
    %15 = arith.addf %12, %14 : vector<64x32xf32>
    %cst_10 = arith.constant 0.000000e+00 : f32
    %16 = vector.broadcast %cst_10 : f32 to vector<64x32xf32>
    %17 = arith.maximumf %15, %16 : vector<64x32xf32>
    %18 = arith.truncf %17 : vector<64x32xf32> to vector<64x32xbf16>
    %c0_11 = arith.constant 0 : index
    %c0_12 = arith.constant 0 : index
    %19 = vector.load %arg6[%c0_11, %c0_12] : memref<64x32xbf16, #tpu.memory_space<vmem>>, vector<64x32xbf16>
    tpu.vector_store %arg6[%c0_11, %c0_12], %18 {strides = array<i32>} : memref<64x32xbf16, #tpu.memory_space<vmem>>, vector<64x32xbf16>,
    return
  }
  func.func @transform_0(%arg0: i32) -> (i32, i32) {
    %c0_i32 = arith.constant 0 : i32
    %c0_i32_0 = arith.constant 0 : i32
    return %arg0, %c0_i32 : i32, i32
  }
  func.func @transform_1(%arg0: i32) -> (i32, i32) {
    %c0_i32 = arith.constant 0 : i32
    %c0_i32_0 = arith.constant 0 : i32
    %c0_i32_1 = arith.constant 0 : i32
    return %c0_i32, %c0_i32_0 : i32, i32
  }
  func.func @transform_2(%arg0: i32) -> (i32, i32) {
    %c0_i32 = arith.constant 0 : i32
    %c0_i32_0 = arith.constant 0 : i32
    %c0_i32_1 = arith.constant 0 : i32
    return %c0_i32, %c0_i32_0 : i32, i32
  }
  func.func @transform_3(%arg0: i32) -> (i32, i32) {
    %c0_i32 = arith.constant 0 : i32
    %c0_i32_0 = arith.constant 0 : i32
    %c0_i32_1 = arith.constant 0 : i32
    return %c0_i32, %c0_i32_0 : i32, i32
  }
  func.func @transform_4(%arg0: i32) -> (i32, i32) {
    %c0_i32 = arith.constant 0 : i32
    %c0_i32_0 = arith.constant 0 : i32
    %c0_i32_1 = arith.constant 0 : i32
    return %c0_i32, %c0_i32_0 : i32, i32
  }
  func.func @transform_5(%arg0: i32) -> (i32, i32) {
    %c0_i32 = arith.constant 0 : i32
    %c0_i32_0 = arith.constant 0 : i32
    return %arg0, %c0_i32 : i32, i32
  }
}

module attributes {stable_mosaic.version = 11 : i64} {
  func.func @_conv3x3_kernel(%arg0: i32, %arg1: memref<1x10x16x96xbf16, #tpu.memory_space<vmem>>, %arg2: memref<3x96x8xbf16, #tpu.memory_space<vmem>>, %arg3: memref<1x128x8xbf16, #tpu.memory_space<vmem>>) attributes {dimension_semantics = [#tpu.dimension_semantics<parallel>], iteration_bounds = array<i64: 2>, scalar_prefetch = 0 : i64, scratch_operands = 0 : i64, tpu.core_type = #tpu.core_type<tc>, window_params = [{transform_indices = @transform_0, window_bounds = array<i64: 1, 10, 16, 96>}, {pipeline_mode = #tpu.pipeline_mode<synchronous>, transform_indices = @transform_1, window_bounds = array<i64: 3, 96, 8>}, {transform_indices = @transform_2, window_bounds = array<i64: 1, 128, 8>}]} {
    %c0 = arith.constant 0 : index
    %c0_0 = arith.constant 0 : index
    %c0_1 = arith.constant 0 : index
    %c0_2 = arith.constant 0 : index
    %0 = vector.load %arg1[%c0, %c0_0, %c0_1, %c0_2] : memref<1x10x16x96xbf16, #tpu.memory_space<vmem>>, vector<1x8x16x96xbf16>
    %1 = vector.shape_cast %0 : vector<1x8x16x96xbf16> to vector<8x16x96xbf16>
    %2 = vector.shape_cast %1 : vector<8x16x96xbf16> to vector<128x96xbf16>
    %c0_3 = arith.constant 0 : index
    %c0_4 = arith.constant 0 : index
    %c0_5 = arith.constant 0 : index
    %3 = vector.load %arg2[%c0_3, %c0_4, %c0_5] : memref<3x96x8xbf16, #tpu.memory_space<vmem>>, vector<1x96x8xbf16>
    %4 = vector.shape_cast %3 : vector<1x96x8xbf16> to vector<96x8xbf16>
    %cst = arith.constant dense<0.000000e+00> : vector<128x8xf32>
    %5 = tpu.matmul %2, %4, %cst {dimension_numbers = #tpu.dot_dimension_numbers<[1], [0], [0], [1], [0, 0, 1, 1], [], []>} : vector<128x96xbf16>, vector<96x8xbf16>, vector<128x8xf32> -> vector<128x8xf32>
    %c0_6 = arith.constant 0 : index
    %c1 = arith.constant 1 : index
    %c0_7 = arith.constant 0 : index
    %c0_8 = arith.constant 0 : index
    %6 = vector.load %arg1[%c0_6, %c1, %c0_7, %c0_8] : memref<1x10x16x96xbf16, #tpu.memory_space<vmem>>, vector<1x8x16x96xbf16>
    %7 = vector.shape_cast %6 : vector<1x8x16x96xbf16> to vector<8x16x96xbf16>
    %8 = vector.shape_cast %7 : vector<8x16x96xbf16> to vector<128x96xbf16>
    %c1_9 = arith.constant 1 : index
    %c0_10 = arith.constant 0 : index
    %c0_11 = arith.constant 0 : index
    %9 = vector.load %arg2[%c1_9, %c0_10, %c0_11] : memref<3x96x8xbf16, #tpu.memory_space<vmem>>, vector<1x96x8xbf16>
    %10 = vector.shape_cast %9 : vector<1x96x8xbf16> to vector<96x8xbf16>
    %cst_12 = arith.constant dense<0.000000e+00> : vector<128x8xf32>
    %11 = tpu.matmul %8, %10, %cst_12 {dimension_numbers = #tpu.dot_dimension_numbers<[1], [0], [0], [1], [0, 0, 1, 1], [], []>} : vector<128x96xbf16>, vector<96x8xbf16>, vector<128x8xf32> -> vector<128x8xf32>
    %12 = arith.addf %5, %11 : vector<128x8xf32>
    %c0_13 = arith.constant 0 : index
    %c2 = arith.constant 2 : index
    %c0_14 = arith.constant 0 : index
    %c0_15 = arith.constant 0 : index
    %13 = vector.load %arg1[%c0_13, %c2, %c0_14, %c0_15] : memref<1x10x16x96xbf16, #tpu.memory_space<vmem>>, vector<1x8x16x96xbf16>
    %14 = vector.shape_cast %13 : vector<1x8x16x96xbf16> to vector<8x16x96xbf16>
    %15 = vector.shape_cast %14 : vector<8x16x96xbf16> to vector<128x96xbf16>
    %c2_16 = arith.constant 2 : index
    %c0_17 = arith.constant 0 : index
    %c0_18 = arith.constant 0 : index
    %16 = vector.load %arg2[%c2_16, %c0_17, %c0_18] : memref<3x96x8xbf16, #tpu.memory_space<vmem>>, vector<1x96x8xbf16>
    %17 = vector.shape_cast %16 : vector<1x96x8xbf16> to vector<96x8xbf16>
    %cst_19 = arith.constant dense<0.000000e+00> : vector<128x8xf32>
    %18 = tpu.matmul %15, %17, %cst_19 {dimension_numbers = #tpu.dot_dimension_numbers<[1], [0], [0], [1], [0, 0, 1, 1], [], []>} : vector<128x96xbf16>, vector<96x8xbf16>, vector<128x8xf32> -> vector<128x8xf32>
    %19 = arith.addf %12, %18 : vector<128x8xf32>
    %20 = arith.truncf %19 : vector<128x8xf32> to vector<128x8xbf16>
    %c0_20 = arith.constant 0 : index
    %c0_21 = arith.constant 0 : index
    %c0_22 = arith.constant 0 : index
    %21 = vector.load %arg3[%c0_20, %c0_21, %c0_22] : memref<1x128x8xbf16, #tpu.memory_space<vmem>>, vector<1x128x8xbf16>
    %22 = vector.shape_cast %21 : vector<1x128x8xbf16> to vector<128x8xbf16>
    %23 = vector.shape_cast %20 : vector<128x8xbf16> to vector<1x128x8xbf16>
    tpu.vector_store %arg3[%c0_20, %c0_21, %c0_22], %23 {strides = array<i32>} : memref<1x128x8xbf16, #tpu.memory_space<vmem>>, vector<1x128x8xbf16>,
    return
  }
  func.func @transform_0(%arg0: i32) -> (i32, i32, i32, i32) {
    %c0_i32 = arith.constant 0 : i32
    %c0_i32_0 = arith.constant 0 : i32
    %c0_i32_1 = arith.constant 0 : i32
    %c0_i32_2 = arith.constant 0 : i32
    return %arg0, %c0_i32, %c0_i32_0, %c0_i32_1 : i32, i32, i32, i32
  }
  func.func @transform_1(%arg0: i32) -> (i32, i32, i32) {
    %c0_i32 = arith.constant 0 : i32
    %c0_i32_0 = arith.constant 0 : i32
    %c0_i32_1 = arith.constant 0 : i32
    %c0_i32_2 = arith.constant 0 : i32
    return %c0_i32, %c0_i32_0, %c0_i32_1 : i32, i32, i32
  }
  func.func @transform_2(%arg0: i32) -> (i32, i32, i32) {
    %c0_i32 = arith.constant 0 : i32
    %c0_i32_0 = arith.constant 0 : i32
    %c0_i32_1 = arith.constant 0 : i32
    return %arg0, %c0_i32, %c0_i32_0 : i32, i32, i32
  }
}

module attributes {stable_mosaic.version = 11 : i64} {
  func.func @_mm_multi_kernel(%arg0: i32, %arg1: memref<64x16xbf16, #tpu.memory_space<vmem>>, %arg2: memref<64x8xbf16, #tpu.memory_space<vmem>>, %arg3: memref<64x8xbf16, #tpu.memory_space<vmem>>, %arg4: memref<16x8xbf16, #tpu.memory_space<vmem>>, %arg5: memref<8x8xbf16, #tpu.memory_space<vmem>>, %arg6: memref<8x8xbf16, #tpu.memory_space<vmem>>, %arg7: memref<1x16xf32, #tpu.memory_space<vmem>>, %arg8: memref<1x8xf32, #tpu.memory_space<vmem>>, %arg9: memref<1x8xf32, #tpu.memory_space<vmem>>, %arg10: memref<1x16xf32, #tpu.memory_space<vmem>>, %arg11: memref<1x8xf32, #tpu.memory_space<vmem>>, %arg12: memref<1x8xf32, #tpu.memory_space<vmem>>, %arg13: memref<64x8xbf16, #tpu.memory_space<vmem>>) attributes {dimension_semantics = [#tpu.dimension_semantics<parallel>], iteration_bounds = array<i64: 2>, scalar_prefetch = 0 : i64, scratch_operands = 0 : i64, tpu.core_type = #tpu.core_type<tc>, window_params = [{transform_indices = @transform_0, window_bounds = array<i64: 64, 16>}, {transform_indices = @transform_1, window_bounds = array<i64: 64, 8>}, {transform_indices = @transform_2, window_bounds = array<i64: 64, 8>}, {pipeline_mode = #tpu.pipeline_mode<synchronous>, transform_indices = @transform_3, window_bounds = array<i64: 16, 8>}, {pipeline_mode = #tpu.pipeline_mode<synchronous>, transform_indices = @transform_4, window_bounds = array<i64: 8, 8>}, {pipeline_mode = #tpu.pipeline_mode<synchronous>, transform_indices = @transform_5, window_bounds = array<i64: 8, 8>}, {pipeline_mode = #tpu.pipeline_mode<synchronous>, transform_indices = @transform_6, window_bounds = array<i64: 1, 16>}, {pipeline_mode = #tpu.pipeline_mode<synchronous>, transform_indices = @transform_7, window_bounds = array<i64: 1, 8>}, {pipeline_mode = #tpu.pipeline_mode<synchronous>, transform_indices = @transform_8, window_bounds = array<i64: 1, 8>}, {pipeline_mode = #tpu.pipeline_mode<synchronous>, transform_indices = @transform_9, window_bounds = array<i64: 1, 16>}, {pipeline_mode = #tpu.pipeline_mode<synchronous>, transform_indices = @transform_10, window_bounds = array<i64: 1, 8>}, {pipeline_mode = #tpu.pipeline_mode<synchronous>, transform_indices = @transform_11, window_bounds = array<i64: 1, 8>}, {transform_indices = @transform_12, window_bounds = array<i64: 64, 8>}]} {
    %c0 = arith.constant 0 : index
    %c0_0 = arith.constant 0 : index
    %0 = vector.load %arg1[%c0, %c0_0] : memref<64x16xbf16, #tpu.memory_space<vmem>>, vector<64x16xbf16>
    %1 = arith.extf %0 : vector<64x16xbf16> to vector<64x16xf32>
    %c0_1 = arith.constant 0 : index
    %c0_2 = arith.constant 0 : index
    %2 = vector.load %arg7[%c0_1, %c0_2] : memref<1x16xf32, #tpu.memory_space<vmem>>, vector<1x16xf32>
    %3 = vector.broadcast %2 : vector<1x16xf32> to vector<64x16xf32>
    %4 = arith.mulf %1, %3 : vector<64x16xf32>
    %c0_3 = arith.constant 0 : index
    %c0_4 = arith.constant 0 : index
    %5 = vector.load %arg10[%c0_3, %c0_4] : memref<1x16xf32, #tpu.memory_space<vmem>>, vector<1x16xf32>
    %6 = vector.broadcast %5 : vector<1x16xf32> to vector<64x16xf32>
    %7 = arith.addf %4, %6 : vector<64x16xf32>
    %cst = arith.constant 0.000000e+00 : f32
    %8 = vector.broadcast %cst : f32 to vector<64x16xf32>
    %9 = arith.maximumf %7, %8 : vector<64x16xf32>
    %10 = arith.truncf %9 : vector<64x16xf32> to vector<64x16xbf16>
    %c0_5 = arith.constant 0 : index
    %c0_6 = arith.constant 0 : index
    %11 = vector.load %arg4[%c0_5, %c0_6] : memref<16x8xbf16, #tpu.memory_space<vmem>>, vector<16x8xbf16>
    %cst_7 = arith.constant dense<0.000000e+00> : vector<64x8xf32>
    %12 = tpu.matmul %10, %11, %cst_7 {dimension_numbers = #tpu.dot_dimension_numbers<[1], [0], [0], [1], [0, 0, 1, 1], [], []>} : vector<64x16xbf16>, vector<16x8xbf16>, vector<64x8xf32> -> vector<64x8xf32>
    %c0_8 = arith.constant 0 : index
    %c0_9 = arith.constant 0 : index
    %13 = vector.load %arg2[%c0_8, %c0_9] : memref<64x8xbf16, #tpu.memory_space<vmem>>, vector<64x8xbf16>
    %14 = arith.extf %13 : vector<64x8xbf16> to vector<64x8xf32>
    %c0_10 = arith.constant 0 : index
    %c0_11 = arith.constant 0 : index
    %15 = vector.load %arg8[%c0_10, %c0_11] : memref<1x8xf32, #tpu.memory_space<vmem>>, vector<1x8xf32>
    %16 = vector.broadcast %15 : vector<1x8xf32> to vector<64x8xf32>
    %17 = arith.mulf %14, %16 : vector<64x8xf32>
    %c0_12 = arith.constant 0 : index
    %c0_13 = arith.constant 0 : index
    %18 = vector.load %arg11[%c0_12, %c0_13] : memref<1x8xf32, #tpu.memory_space<vmem>>, vector<1x8xf32>
    %19 = vector.broadcast %18 : vector<1x8xf32> to vector<64x8xf32>
    %20 = arith.addf %17, %19 : vector<64x8xf32>
    %cst_14 = arith.constant 0.000000e+00 : f32
    %21 = vector.broadcast %cst_14 : f32 to vector<64x8xf32>
    %22 = arith.maximumf %20, %21 : vector<64x8xf32>
    %23 = arith.truncf %22 : vector<64x8xf32> to vector<64x8xbf16>
    %c0_15 = arith.constant 0 : index
    %c0_16 = arith.constant 0 : index
    %24 = vector.load %arg5[%c0_15, %c0_16] : memref<8x8xbf16, #tpu.memory_space<vmem>>, vector<8x8xbf16>
    %cst_17 = arith.constant dense<0.000000e+00> : vector<64x8xf32>
    %25 = tpu.matmul %23, %24, %cst_17 {dimension_numbers = #tpu.dot_dimension_numbers<[1], [0], [0], [1], [0, 0, 1, 1], [], []>} : vector<64x8xbf16>, vector<8x8xbf16>, vector<64x8xf32> -> vector<64x8xf32>
    %26 = arith.addf %12, %25 : vector<64x8xf32>
    %c0_18 = arith.constant 0 : index
    %c0_19 = arith.constant 0 : index
    %27 = vector.load %arg3[%c0_18, %c0_19] : memref<64x8xbf16, #tpu.memory_space<vmem>>, vector<64x8xbf16>
    %28 = arith.extf %27 : vector<64x8xbf16> to vector<64x8xf32>
    %c0_20 = arith.constant 0 : index
    %c0_21 = arith.constant 0 : index
    %29 = vector.load %arg9[%c0_20, %c0_21] : memref<1x8xf32, #tpu.memory_space<vmem>>, vector<1x8xf32>
    %30 = vector.broadcast %29 : vector<1x8xf32> to vector<64x8xf32>
    %31 = arith.mulf %28, %30 : vector<64x8xf32>
    %c0_22 = arith.constant 0 : index
    %c0_23 = arith.constant 0 : index
    %32 = vector.load %arg12[%c0_22, %c0_23] : memref<1x8xf32, #tpu.memory_space<vmem>>, vector<1x8xf32>
    %33 = vector.broadcast %32 : vector<1x8xf32> to vector<64x8xf32>
    %34 = arith.addf %31, %33 : vector<64x8xf32>
    %cst_24 = arith.constant 0.000000e+00 : f32
    %35 = vector.broadcast %cst_24 : f32 to vector<64x8xf32>
    %36 = arith.maximumf %34, %35 : vector<64x8xf32>
    %37 = arith.truncf %36 : vector<64x8xf32> to vector<64x8xbf16>
    %c0_25 = arith.constant 0 : index
    %c0_26 = arith.constant 0 : index
    %38 = vector.load %arg6[%c0_25, %c0_26] : memref<8x8xbf16, #tpu.memory_space<vmem>>, vector<8x8xbf16>
    %cst_27 = arith.constant dense<0.000000e+00> : vector<64x8xf32>
    %39 = tpu.matmul %37, %38, %cst_27 {dimension_numbers = #tpu.dot_dimension_numbers<[1], [0], [0], [1], [0, 0, 1, 1], [], []>} : vector<64x8xbf16>, vector<8x8xbf16>, vector<64x8xf32> -> vector<64x8xf32>
    %40 = arith.addf %26, %39 : vector<64x8xf32>
    %41 = arith.truncf %40 : vector<64x8xf32> to vector<64x8xbf16>
    %c0_28 = arith.constant 0 : index
    %c0_29 = arith.constant 0 : index
    %42 = vector.load %arg13[%c0_28, %c0_29] : memref<64x8xbf16, #tpu.memory_space<vmem>>, vector<64x8xbf16>
    tpu.vector_store %arg13[%c0_28, %c0_29], %41 {strides = array<i32>} : memref<64x8xbf16, #tpu.memory_space<vmem>>, vector<64x8xbf16>,
    return
  }
  func.func @transform_0(%arg0: i32) -> (i32, i32) {
    %c0_i32 = arith.constant 0 : i32
    %c0_i32_0 = arith.constant 0 : i32
    return %arg0, %c0_i32 : i32, i32
  }
  func.func @transform_1(%arg0: i32) -> (i32, i32) {
    %c0_i32 = arith.constant 0 : i32
    %c0_i32_0 = arith.constant 0 : i32
    return %arg0, %c0_i32 : i32, i32
  }
  func.func @transform_2(%arg0: i32) -> (i32, i32) {
    %c0_i32 = arith.constant 0 : i32
    %c0_i32_0 = arith.constant 0 : i32
    return %arg0, %c0_i32 : i32, i32
  }
  func.func @transform_3(%arg0: i32) -> (i32, i32) {
    %c0_i32 = arith.constant 0 : i32
    %c0_i32_0 = arith.constant 0 : i32
    %c0_i32_1 = arith.constant 0 : i32
    return %c0_i32, %c0_i32_0 : i32, i32
  }
  func.func @transform_4(%arg0: i32) -> (i32, i32) {
    %c0_i32 = arith.constant 0 : i32
    %c0_i32_0 = arith.constant 0 : i32
    %c0_i32_1 = arith.constant 0 : i32
    return %c0_i32, %c0_i32_0 : i32, i32
  }
  func.func @transform_5(%arg0: i32) -> (i32, i32) {
    %c0_i32 = arith.constant 0 : i32
    %c0_i32_0 = arith.constant 0 : i32
    %c0_i32_1 = arith.constant 0 : i32
    return %c0_i32, %c0_i32_0 : i32, i32
  }
  func.func @transform_6(%arg0: i32) -> (i32, i32) {
    %c0_i32 = arith.constant 0 : i32
    %c0_i32_0 = arith.constant 0 : i32
    %c0_i32_1 = arith.constant 0 : i32
    return %c0_i32, %c0_i32_0 : i32, i32
  }
  func.func @transform_7(%arg0: i32) -> (i32, i32) {
    %c0_i32 = arith.constant 0 : i32
    %c0_i32_0 = arith.constant 0 : i32
    %c0_i32_1 = arith.constant 0 : i32
    return %c0_i32, %c0_i32_0 : i32, i32
  }
  func.func @transform_8(%arg0: i32) -> (i32, i32) {
    %c0_i32 = arith.constant 0 : i32
    %c0_i32_0 = arith.constant 0 : i32
    %c0_i32_1 = arith.constant 0 : i32
    return %c0_i32, %c0_i32_0 : i32, i32
  }
  func.func @transform_9(%arg0: i32) -> (i32, i32) {
    %c0_i32 = arith.constant 0 : i32
    %c0_i32_0 = arith.constant 0 : i32
    %c0_i32_1 = arith.constant 0 : i32
    return %c0_i32, %c0_i32_0 : i32, i32
  }
  func.func @transform_10(%arg0: i32) -> (i32, i32) {
    %c0_i32 = arith.constant 0 : i32
    %c0_i32_0 = arith.constant 0 : i32
    %c0_i32_1 = arith.constant 0 : i32
    return %c0_i32, %c0_i32_0 : i32, i32
  }
  func.func @transform_11(%arg0: i32) -> (i32, i32) {
    %c0_i32 = arith.constant 0 : i32
    %c0_i32_0 = arith.constant 0 : i32
    %c0_i32_1 = arith.constant 0 : i32
    return %c0_i32, %c0_i32_0 : i32, i32
  }
  func.func @transform_12(%arg0: i32) -> (i32, i32) {
    %c0_i32 = arith.constant 0 : i32
    %c0_i32_0 = arith.constant 0 : i32
    return %arg0, %c0_i32 : i32, i32
  }
}

module attributes {stable_mosaic.version = 11 : i64} {
  func.func @_mm_multi_kernel(%arg0: i32, %arg1: memref<64x16xbf16, #tpu.memory_space<vmem>>, %arg2: memref<64x8xbf16, #tpu.memory_space<vmem>>, %arg3: memref<16x32xbf16, #tpu.memory_space<vmem>>, %arg4: memref<8x32xbf16, #tpu.memory_space<vmem>>, %arg5: memref<1x16xf32, #tpu.memory_space<vmem>>, %arg6: memref<1x8xf32, #tpu.memory_space<vmem>>, %arg7: memref<1x16xf32, #tpu.memory_space<vmem>>, %arg8: memref<1x8xf32, #tpu.memory_space<vmem>>, %arg9: memref<1x32xf32, #tpu.memory_space<vmem>>, %arg10: memref<64x32xbf16, #tpu.memory_space<vmem>>) attributes {dimension_semantics = [#tpu.dimension_semantics<parallel>], iteration_bounds = array<i64: 2>, scalar_prefetch = 0 : i64, scratch_operands = 0 : i64, tpu.core_type = #tpu.core_type<tc>, window_params = [{transform_indices = @transform_0, window_bounds = array<i64: 64, 16>}, {transform_indices = @transform_1, window_bounds = array<i64: 64, 8>}, {pipeline_mode = #tpu.pipeline_mode<synchronous>, transform_indices = @transform_2, window_bounds = array<i64: 16, 32>}, {pipeline_mode = #tpu.pipeline_mode<synchronous>, transform_indices = @transform_3, window_bounds = array<i64: 8, 32>}, {pipeline_mode = #tpu.pipeline_mode<synchronous>, transform_indices = @transform_4, window_bounds = array<i64: 1, 16>}, {pipeline_mode = #tpu.pipeline_mode<synchronous>, transform_indices = @transform_5, window_bounds = array<i64: 1, 8>}, {pipeline_mode = #tpu.pipeline_mode<synchronous>, transform_indices = @transform_6, window_bounds = array<i64: 1, 16>}, {pipeline_mode = #tpu.pipeline_mode<synchronous>, transform_indices = @transform_7, window_bounds = array<i64: 1, 8>}, {pipeline_mode = #tpu.pipeline_mode<synchronous>, transform_indices = @transform_8, window_bounds = array<i64: 1, 32>}, {transform_indices = @transform_9, window_bounds = array<i64: 64, 32>}]} {
    %c0 = arith.constant 0 : index
    %c0_0 = arith.constant 0 : index
    %0 = vector.load %arg1[%c0, %c0_0] : memref<64x16xbf16, #tpu.memory_space<vmem>>, vector<64x16xbf16>
    %1 = arith.extf %0 : vector<64x16xbf16> to vector<64x16xf32>
    %c0_1 = arith.constant 0 : index
    %c0_2 = arith.constant 0 : index
    %2 = vector.load %arg5[%c0_1, %c0_2] : memref<1x16xf32, #tpu.memory_space<vmem>>, vector<1x16xf32>
    %3 = vector.broadcast %2 : vector<1x16xf32> to vector<64x16xf32>
    %4 = arith.mulf %1, %3 : vector<64x16xf32>
    %c0_3 = arith.constant 0 : index
    %c0_4 = arith.constant 0 : index
    %5 = vector.load %arg7[%c0_3, %c0_4] : memref<1x16xf32, #tpu.memory_space<vmem>>, vector<1x16xf32>
    %6 = vector.broadcast %5 : vector<1x16xf32> to vector<64x16xf32>
    %7 = arith.addf %4, %6 : vector<64x16xf32>
    %cst = arith.constant 0.000000e+00 : f32
    %8 = vector.broadcast %cst : f32 to vector<64x16xf32>
    %9 = arith.maximumf %7, %8 : vector<64x16xf32>
    %10 = arith.truncf %9 : vector<64x16xf32> to vector<64x16xbf16>
    %c0_5 = arith.constant 0 : index
    %c0_6 = arith.constant 0 : index
    %11 = vector.load %arg3[%c0_5, %c0_6] : memref<16x32xbf16, #tpu.memory_space<vmem>>, vector<16x32xbf16>
    %cst_7 = arith.constant dense<0.000000e+00> : vector<64x32xf32>
    %12 = tpu.matmul %10, %11, %cst_7 {dimension_numbers = #tpu.dot_dimension_numbers<[1], [0], [0], [1], [0, 0, 1, 1], [], []>} : vector<64x16xbf16>, vector<16x32xbf16>, vector<64x32xf32> -> vector<64x32xf32>
    %c0_8 = arith.constant 0 : index
    %c0_9 = arith.constant 0 : index
    %13 = vector.load %arg2[%c0_8, %c0_9] : memref<64x8xbf16, #tpu.memory_space<vmem>>, vector<64x8xbf16>
    %14 = arith.extf %13 : vector<64x8xbf16> to vector<64x8xf32>
    %c0_10 = arith.constant 0 : index
    %c0_11 = arith.constant 0 : index
    %15 = vector.load %arg6[%c0_10, %c0_11] : memref<1x8xf32, #tpu.memory_space<vmem>>, vector<1x8xf32>
    %16 = vector.broadcast %15 : vector<1x8xf32> to vector<64x8xf32>
    %17 = arith.mulf %14, %16 : vector<64x8xf32>
    %c0_12 = arith.constant 0 : index
    %c0_13 = arith.constant 0 : index
    %18 = vector.load %arg8[%c0_12, %c0_13] : memref<1x8xf32, #tpu.memory_space<vmem>>, vector<1x8xf32>
    %19 = vector.broadcast %18 : vector<1x8xf32> to vector<64x8xf32>
    %20 = arith.addf %17, %19 : vector<64x8xf32>
    %cst_14 = arith.constant 0.000000e+00 : f32
    %21 = vector.broadcast %cst_14 : f32 to vector<64x8xf32>
    %22 = arith.maximumf %20, %21 : vector<64x8xf32>
    %23 = arith.truncf %22 : vector<64x8xf32> to vector<64x8xbf16>
    %c0_15 = arith.constant 0 : index
    %c0_16 = arith.constant 0 : index
    %24 = vector.load %arg4[%c0_15, %c0_16] : memref<8x32xbf16, #tpu.memory_space<vmem>>, vector<8x32xbf16>
    %cst_17 = arith.constant dense<0.000000e+00> : vector<64x32xf32>
    %25 = tpu.matmul %23, %24, %cst_17 {dimension_numbers = #tpu.dot_dimension_numbers<[1], [0], [0], [1], [0, 0, 1, 1], [], []>} : vector<64x8xbf16>, vector<8x32xbf16>, vector<64x32xf32> -> vector<64x32xf32>
    %26 = arith.addf %12, %25 : vector<64x32xf32>
    %c0_18 = arith.constant 0 : index
    %c0_19 = arith.constant 0 : index
    %27 = vector.load %arg9[%c0_18, %c0_19] : memref<1x32xf32, #tpu.memory_space<vmem>>, vector<1x32xf32>
    %28 = vector.broadcast %27 : vector<1x32xf32> to vector<64x32xf32>
    %29 = arith.addf %26, %28 : vector<64x32xf32>
    %cst_20 = arith.constant 0.000000e+00 : f32
    %30 = vector.broadcast %cst_20 : f32 to vector<64x32xf32>
    %31 = arith.maximumf %29, %30 : vector<64x32xf32>
    %32 = arith.truncf %31 : vector<64x32xf32> to vector<64x32xbf16>
    %c0_21 = arith.constant 0 : index
    %c0_22 = arith.constant 0 : index
    %33 = vector.load %arg10[%c0_21, %c0_22] : memref<64x32xbf16, #tpu.memory_space<vmem>>, vector<64x32xbf16>
    tpu.vector_store %arg10[%c0_21, %c0_22], %32 {strides = array<i32>} : memref<64x32xbf16, #tpu.memory_space<vmem>>, vector<64x32xbf16>,
    return
  }
  func.func @transform_0(%arg0: i32) -> (i32, i32) {
    %c0_i32 = arith.constant 0 : i32
    %c0_i32_0 = arith.constant 0 : i32
    return %arg0, %c0_i32 : i32, i32
  }
  func.func @transform_1(%arg0: i32) -> (i32, i32) {
    %c0_i32 = arith.constant 0 : i32
    %c0_i32_0 = arith.constant 0 : i32
    return %arg0, %c0_i32 : i32, i32
  }
  func.func @transform_2(%arg0: i32) -> (i32, i32) {
    %c0_i32 = arith.constant 0 : i32
    %c0_i32_0 = arith.constant 0 : i32
    %c0_i32_1 = arith.constant 0 : i32
    return %c0_i32, %c0_i32_0 : i32, i32
  }
  func.func @transform_3(%arg0: i32) -> (i32, i32) {
    %c0_i32 = arith.constant 0 : i32
    %c0_i32_0 = arith.constant 0 : i32
    %c0_i32_1 = arith.constant 0 : i32
    return %c0_i32, %c0_i32_0 : i32, i32
  }
  func.func @transform_4(%arg0: i32) -> (i32, i32) {
    %c0_i32 = arith.constant 0 : i32
    %c0_i32_0 = arith.constant 0 : i32
    %c0_i32_1 = arith.constant 0 : i32
    return %c0_i32, %c0_i32_0 : i32, i32
  }
  func.func @transform_5(%arg0: i32) -> (i32, i32) {
    %c0_i32 = arith.constant 0 : i32
    %c0_i32_0 = arith.constant 0 : i32
    %c0_i32_1 = arith.constant 0 : i32
    return %c0_i32, %c0_i32_0 : i32, i32
  }
  func.func @transform_6(%arg0: i32) -> (i32, i32) {
    %c0_i32 = arith.constant 0 : i32
    %c0_i32_0 = arith.constant 0 : i32
    %c0_i32_1 = arith.constant 0 : i32
    return %c0_i32, %c0_i32_0 : i32, i32
  }
  func.func @transform_7(%arg0: i32) -> (i32, i32) {
    %c0_i32 = arith.constant 0 : i32
    %c0_i32_0 = arith.constant 0 : i32
    %c0_i32_1 = arith.constant 0 : i32
    return %c0_i32, %c0_i32_0 : i32, i32
  }
  func.func @transform_8(%arg0: i32) -> (i32, i32) {
    %c0_i32 = arith.constant 0 : i32
    %c0_i32_0 = arith.constant 0 : i32
    %c0_i32_1 = arith.constant 0 : i32
    return %c0_i32, %c0_i32_0 : i32, i32
  }
  func.func @transform_9(%arg0: i32) -> (i32, i32) {
    %c0_i32 = arith.constant 0 : i32
    %c0_i32_0 = arith.constant 0 : i32
    return %arg0, %c0_i32 : i32, i32
  }
}

module attributes {stable_mosaic.version = 11 : i64} {
  func.func @_avgpool2x2_kernel(%arg0: i32, %arg1: memref<1x4x2x4x16xbf16, #tpu.memory_space<vmem>>, %arg2: memref<1x4x4x8xbf16, #tpu.memory_space<vmem>>) attributes {dimension_semantics = [#tpu.dimension_semantics<parallel>], iteration_bounds = array<i64: 2>, scalar_prefetch = 0 : i64, scratch_operands = 0 : i64, tpu.core_type = #tpu.core_type<tc>, window_params = [{transform_indices = @transform_0, window_bounds = array<i64: 1, 4, 2, 4, 16>}, {transform_indices = @transform_1, window_bounds = array<i64: 1, 4, 4, 8>}]} {
    %c0 = arith.constant 0 : index
    %c0_0 = arith.constant 0 : index
    %c0_1 = arith.constant 0 : index
    %c0_2 = arith.constant 0 : index
    %c0_3 = arith.constant 0 : index
    %0 = vector.load %arg1[%c0, %c0_0, %c0_1, %c0_2, %c0_3] : memref<1x4x2x4x16xbf16, #tpu.memory_space<vmem>>, vector<1x4x2x4x16xbf16>
    %1 = vector.shape_cast %0 : vector<1x4x2x4x16xbf16> to vector<4x2x4x16xbf16>
    %2 = arith.extf %1 : vector<4x2x4x16xbf16> to vector<4x2x4x16xf32>
    %3 = vector.extract_strided_slice %2 {offsets = [0, 0, 0, 0], sizes = [4, 1, 4, 16], strides = [1, 1, 1, 1]} : vector<4x2x4x16xf32> to vector<4x1x4x16xf32>
    %4 = vector.shape_cast %3 : vector<4x1x4x16xf32> to vector<4x4x16xf32>
    %5 = vector.extract_strided_slice %2 {offsets = [0, 1, 0, 0], sizes = [4, 1, 4, 16], strides = [1, 1, 1, 1]} : vector<4x2x4x16xf32> to vector<4x1x4x16xf32>
    %6 = vector.shape_cast %5 : vector<4x1x4x16xf32> to vector<4x4x16xf32>
    %7 = arith.addf %4, %6 : vector<4x4x16xf32>
    %8 = vector.extract_strided_slice %7 {offsets = [0, 0, 0], sizes = [4, 4, 8], strides = [1, 1, 1]} : vector<4x4x16xf32> to vector<4x4x8xf32>
    %9 = vector.extract_strided_slice %7 {offsets = [0, 0, 8], sizes = [4, 4, 8], strides = [1, 1, 1]} : vector<4x4x16xf32> to vector<4x4x8xf32>
    %10 = arith.addf %8, %9 : vector<4x4x8xf32>
    %cst = arith.constant 2.500000e-01 : f32
    %11 = vector.broadcast %cst : f32 to vector<4x4x8xf32>
    %12 = arith.mulf %10, %11 : vector<4x4x8xf32>
    %13 = arith.truncf %12 : vector<4x4x8xf32> to vector<4x4x8xbf16>
    %c0_4 = arith.constant 0 : index
    %c0_5 = arith.constant 0 : index
    %c0_6 = arith.constant 0 : index
    %c0_7 = arith.constant 0 : index
    %14 = vector.load %arg2[%c0_4, %c0_5, %c0_6, %c0_7] : memref<1x4x4x8xbf16, #tpu.memory_space<vmem>>, vector<1x4x4x8xbf16>
    %15 = vector.shape_cast %14 : vector<1x4x4x8xbf16> to vector<4x4x8xbf16>
    %16 = vector.shape_cast %13 : vector<4x4x8xbf16> to vector<1x4x4x8xbf16>
    tpu.vector_store %arg2[%c0_4, %c0_5, %c0_6, %c0_7], %16 {strides = array<i32>} : memref<1x4x4x8xbf16, #tpu.memory_space<vmem>>, vector<1x4x4x8xbf16>,
    return
  }
  func.func @transform_0(%arg0: i32) -> (i32, i32, i32, i32, i32) {
    %c0_i32 = arith.constant 0 : i32
    %c0_i32_0 = arith.constant 0 : i32
    %c0_i32_1 = arith.constant 0 : i32
    %c0_i32_2 = arith.constant 0 : i32
    %c0_i32_3 = arith.constant 0 : i32
    return %arg0, %c0_i32, %c0_i32_0, %c0_i32_1, %c0_i32_2 : i32, i32, i32, i32, i32
  }
  func.func @transform_1(%arg0: i32) -> (i32, i32, i32, i32) {
    %c0_i32 = arith.constant 0 : i32
    %c0_i32_0 = arith.constant 0 : i32
    %c0_i32_1 = arith.constant 0 : i32
    %c0_i32_2 = arith.constant 0 : i32
    return %arg0, %c0_i32, %c0_i32_0, %c0_i32_1 : i32, i32, i32, i32
  }
}

module attributes {stable_mosaic.version = 11 : i64} {
  func.func @_mm_multi_kernel(%arg0: i32, %arg1: memref<32x8xbf16, #tpu.memory_space<vmem>>, %arg2: memref<8x32xbf16, #tpu.memory_space<vmem>>, %arg3: memref<1x8xf32, #tpu.memory_space<vmem>>, %arg4: memref<1x8xf32, #tpu.memory_space<vmem>>, %arg5: memref<1x32xf32, #tpu.memory_space<vmem>>, %arg6: memref<32x32xbf16, #tpu.memory_space<vmem>>) attributes {dimension_semantics = [#tpu.dimension_semantics<parallel>], iteration_bounds = array<i64: 1>, scalar_prefetch = 0 : i64, scratch_operands = 0 : i64, tpu.core_type = #tpu.core_type<tc>, window_params = [{transform_indices = @transform_0, window_bounds = array<i64: 32, 8>}, {pipeline_mode = #tpu.pipeline_mode<synchronous>, transform_indices = @transform_1, window_bounds = array<i64: 8, 32>}, {pipeline_mode = #tpu.pipeline_mode<synchronous>, transform_indices = @transform_2, window_bounds = array<i64: 1, 8>}, {pipeline_mode = #tpu.pipeline_mode<synchronous>, transform_indices = @transform_3, window_bounds = array<i64: 1, 8>}, {pipeline_mode = #tpu.pipeline_mode<synchronous>, transform_indices = @transform_4, window_bounds = array<i64: 1, 32>}, {transform_indices = @transform_5, window_bounds = array<i64: 32, 32>}]} {
    %c0 = arith.constant 0 : index
    %c0_0 = arith.constant 0 : index
    %0 = vector.load %arg1[%c0, %c0_0] : memref<32x8xbf16, #tpu.memory_space<vmem>>, vector<32x8xbf16>
    %1 = arith.extf %0 : vector<32x8xbf16> to vector<32x8xf32>
    %c0_1 = arith.constant 0 : index
    %c0_2 = arith.constant 0 : index
    %2 = vector.load %arg3[%c0_1, %c0_2] : memref<1x8xf32, #tpu.memory_space<vmem>>, vector<1x8xf32>
    %3 = vector.broadcast %2 : vector<1x8xf32> to vector<32x8xf32>
    %4 = arith.mulf %1, %3 : vector<32x8xf32>
    %c0_3 = arith.constant 0 : index
    %c0_4 = arith.constant 0 : index
    %5 = vector.load %arg4[%c0_3, %c0_4] : memref<1x8xf32, #tpu.memory_space<vmem>>, vector<1x8xf32>
    %6 = vector.broadcast %5 : vector<1x8xf32> to vector<32x8xf32>
    %7 = arith.addf %4, %6 : vector<32x8xf32>
    %cst = arith.constant 0.000000e+00 : f32
    %8 = vector.broadcast %cst : f32 to vector<32x8xf32>
    %9 = arith.maximumf %7, %8 : vector<32x8xf32>
    %10 = arith.truncf %9 : vector<32x8xf32> to vector<32x8xbf16>
    %c0_5 = arith.constant 0 : index
    %c0_6 = arith.constant 0 : index
    %11 = vector.load %arg2[%c0_5, %c0_6] : memref<8x32xbf16, #tpu.memory_space<vmem>>, vector<8x32xbf16>
    %cst_7 = arith.constant dense<0.000000e+00> : vector<32x32xf32>
    %12 = tpu.matmul %10, %11, %cst_7 {dimension_numbers = #tpu.dot_dimension_numbers<[1], [0], [0], [1], [0, 0, 1, 1], [], []>} : vector<32x8xbf16>, vector<8x32xbf16>, vector<32x32xf32> -> vector<32x32xf32>
    %c0_8 = arith.constant 0 : index
    %c0_9 = arith.constant 0 : index
    %13 = vector.load %arg5[%c0_8, %c0_9] : memref<1x32xf32, #tpu.memory_space<vmem>>, vector<1x32xf32>
    %14 = vector.broadcast %13 : vector<1x32xf32> to vector<32x32xf32>
    %15 = arith.addf %12, %14 : vector<32x32xf32>
    %cst_10 = arith.constant 0.000000e+00 : f32
    %16 = vector.broadcast %cst_10 : f32 to vector<32x32xf32>
    %17 = arith.maximumf %15, %16 : vector<32x32xf32>
    %18 = arith.truncf %17 : vector<32x32xf32> to vector<32x32xbf16>
    %c0_11 = arith.constant 0 : index
    %c0_12 = arith.constant 0 : index
    %19 = vector.load %arg6[%c0_11, %c0_12] : memref<32x32xbf16, #tpu.memory_space<vmem>>, vector<32x32xbf16>
    tpu.vector_store %arg6[%c0_11, %c0_12], %18 {strides = array<i32>} : memref<32x32xbf16, #tpu.memory_space<vmem>>, vector<32x32xbf16>,
    return
  }
  func.func @transform_0(%arg0: i32) -> (i32, i32) {
    %c0_i32 = arith.constant 0 : i32
    %c0_i32_0 = arith.constant 0 : i32
    return %arg0, %c0_i32 : i32, i32
  }
  func.func @transform_1(%arg0: i32) -> (i32, i32) {
    %c0_i32 = arith.constant 0 : i32
    %c0_i32_0 = arith.constant 0 : i32
    %c0_i32_1 = arith.constant 0 : i32
    return %c0_i32, %c0_i32_0 : i32, i32
  }
  func.func @transform_2(%arg0: i32) -> (i32, i32) {
    %c0_i32 = arith.constant 0 : i32
    %c0_i32_0 = arith.constant 0 : i32
    %c0_i32_1 = arith.constant 0 : i32
    return %c0_i32, %c0_i32_0 : i32, i32
  }
  func.func @transform_3(%arg0: i32) -> (i32, i32) {
    %c0_i32 = arith.constant 0 : i32
    %c0_i32_0 = arith.constant 0 : i32
    %c0_i32_1 = arith.constant 0 : i32
    return %c0_i32, %c0_i32_0 : i32, i32
  }
  func.func @transform_4(%arg0: i32) -> (i32, i32) {
    %c0_i32 = arith.constant 0 : i32
    %c0_i32_0 = arith.constant 0 : i32
    %c0_i32_1 = arith.constant 0 : i32
    return %c0_i32, %c0_i32_0 : i32, i32
  }
  func.func @transform_5(%arg0: i32) -> (i32, i32) {
    %c0_i32 = arith.constant 0 : i32
    %c0_i32_0 = arith.constant 0 : i32
    return %arg0, %c0_i32 : i32, i32
  }
}

module attributes {stable_mosaic.version = 11 : i64} {
  func.func @_conv3x3_kernel(%arg0: i32, %arg1: memref<1x6x16x96xbf16, #tpu.memory_space<vmem>>, %arg2: memref<3x96x8xbf16, #tpu.memory_space<vmem>>, %arg3: memref<1x64x8xbf16, #tpu.memory_space<vmem>>) attributes {dimension_semantics = [#tpu.dimension_semantics<parallel>], iteration_bounds = array<i64: 2>, scalar_prefetch = 0 : i64, scratch_operands = 0 : i64, tpu.core_type = #tpu.core_type<tc>, window_params = [{transform_indices = @transform_0, window_bounds = array<i64: 1, 6, 16, 96>}, {pipeline_mode = #tpu.pipeline_mode<synchronous>, transform_indices = @transform_1, window_bounds = array<i64: 3, 96, 8>}, {transform_indices = @transform_2, window_bounds = array<i64: 1, 64, 8>}]} {
    %c0 = arith.constant 0 : index
    %c0_0 = arith.constant 0 : index
    %c0_1 = arith.constant 0 : index
    %c0_2 = arith.constant 0 : index
    %0 = vector.load %arg1[%c0, %c0_0, %c0_1, %c0_2] : memref<1x6x16x96xbf16, #tpu.memory_space<vmem>>, vector<1x4x16x96xbf16>
    %1 = vector.shape_cast %0 : vector<1x4x16x96xbf16> to vector<4x16x96xbf16>
    %2 = vector.shape_cast %1 : vector<4x16x96xbf16> to vector<64x96xbf16>
    %c0_3 = arith.constant 0 : index
    %c0_4 = arith.constant 0 : index
    %c0_5 = arith.constant 0 : index
    %3 = vector.load %arg2[%c0_3, %c0_4, %c0_5] : memref<3x96x8xbf16, #tpu.memory_space<vmem>>, vector<1x96x8xbf16>
    %4 = vector.shape_cast %3 : vector<1x96x8xbf16> to vector<96x8xbf16>
    %cst = arith.constant dense<0.000000e+00> : vector<64x8xf32>
    %5 = tpu.matmul %2, %4, %cst {dimension_numbers = #tpu.dot_dimension_numbers<[1], [0], [0], [1], [0, 0, 1, 1], [], []>} : vector<64x96xbf16>, vector<96x8xbf16>, vector<64x8xf32> -> vector<64x8xf32>
    %c0_6 = arith.constant 0 : index
    %c1 = arith.constant 1 : index
    %c0_7 = arith.constant 0 : index
    %c0_8 = arith.constant 0 : index
    %6 = vector.load %arg1[%c0_6, %c1, %c0_7, %c0_8] : memref<1x6x16x96xbf16, #tpu.memory_space<vmem>>, vector<1x4x16x96xbf16>
    %7 = vector.shape_cast %6 : vector<1x4x16x96xbf16> to vector<4x16x96xbf16>
    %8 = vector.shape_cast %7 : vector<4x16x96xbf16> to vector<64x96xbf16>
    %c1_9 = arith.constant 1 : index
    %c0_10 = arith.constant 0 : index
    %c0_11 = arith.constant 0 : index
    %9 = vector.load %arg2[%c1_9, %c0_10, %c0_11] : memref<3x96x8xbf16, #tpu.memory_space<vmem>>, vector<1x96x8xbf16>
    %10 = vector.shape_cast %9 : vector<1x96x8xbf16> to vector<96x8xbf16>
    %cst_12 = arith.constant dense<0.000000e+00> : vector<64x8xf32>
    %11 = tpu.matmul %8, %10, %cst_12 {dimension_numbers = #tpu.dot_dimension_numbers<[1], [0], [0], [1], [0, 0, 1, 1], [], []>} : vector<64x96xbf16>, vector<96x8xbf16>, vector<64x8xf32> -> vector<64x8xf32>
    %12 = arith.addf %5, %11 : vector<64x8xf32>
    %c0_13 = arith.constant 0 : index
    %c2 = arith.constant 2 : index
    %c0_14 = arith.constant 0 : index
    %c0_15 = arith.constant 0 : index
    %13 = vector.load %arg1[%c0_13, %c2, %c0_14, %c0_15] : memref<1x6x16x96xbf16, #tpu.memory_space<vmem>>, vector<1x4x16x96xbf16>
    %14 = vector.shape_cast %13 : vector<1x4x16x96xbf16> to vector<4x16x96xbf16>
    %15 = vector.shape_cast %14 : vector<4x16x96xbf16> to vector<64x96xbf16>
    %c2_16 = arith.constant 2 : index
    %c0_17 = arith.constant 0 : index
    %c0_18 = arith.constant 0 : index
    %16 = vector.load %arg2[%c2_16, %c0_17, %c0_18] : memref<3x96x8xbf16, #tpu.memory_space<vmem>>, vector<1x96x8xbf16>
    %17 = vector.shape_cast %16 : vector<1x96x8xbf16> to vector<96x8xbf16>
    %cst_19 = arith.constant dense<0.000000e+00> : vector<64x8xf32>
    %18 = tpu.matmul %15, %17, %cst_19 {dimension_numbers = #tpu.dot_dimension_numbers<[1], [0], [0], [1], [0, 0, 1, 1], [], []>} : vector<64x96xbf16>, vector<96x8xbf16>, vector<64x8xf32> -> vector<64x8xf32>
    %19 = arith.addf %12, %18 : vector<64x8xf32>
    %20 = arith.truncf %19 : vector<64x8xf32> to vector<64x8xbf16>
    %c0_20 = arith.constant 0 : index
    %c0_21 = arith.constant 0 : index
    %c0_22 = arith.constant 0 : index
    %21 = vector.load %arg3[%c0_20, %c0_21, %c0_22] : memref<1x64x8xbf16, #tpu.memory_space<vmem>>, vector<1x64x8xbf16>
    %22 = vector.shape_cast %21 : vector<1x64x8xbf16> to vector<64x8xbf16>
    %23 = vector.shape_cast %20 : vector<64x8xbf16> to vector<1x64x8xbf16>
    tpu.vector_store %arg3[%c0_20, %c0_21, %c0_22], %23 {strides = array<i32>} : memref<1x64x8xbf16, #tpu.memory_space<vmem>>, vector<1x64x8xbf16>,
    return
  }
  func.func @transform_0(%arg0: i32) -> (i32, i32, i32, i32) {
    %c0_i32 = arith.constant 0 : i32
    %c0_i32_0 = arith.constant 0 : i32
    %c0_i32_1 = arith.constant 0 : i32
    %c0_i32_2 = arith.constant 0 : i32
    return %arg0, %c0_i32, %c0_i32_0, %c0_i32_1 : i32, i32, i32, i32
  }
  func.func @transform_1(%arg0: i32) -> (i32, i32, i32) {
    %c0_i32 = arith.constant 0 : i32
    %c0_i32_0 = arith.constant 0 : i32
    %c0_i32_1 = arith.constant 0 : i32
    %c0_i32_2 = arith.constant 0 : i32
    return %c0_i32, %c0_i32_0, %c0_i32_1 : i32, i32, i32
  }
  func.func @transform_2(%arg0: i32) -> (i32, i32, i32) {
    %c0_i32 = arith.constant 0 : i32
    %c0_i32_0 = arith.constant 0 : i32
    %c0_i32_1 = arith.constant 0 : i32
    return %arg0, %c0_i32, %c0_i32_0 : i32, i32, i32
  }
}

module attributes {stable_mosaic.version = 11 : i64} {
  func.func @_mm_multi_kernel(%arg0: i32, %arg1: memref<32x8xbf16, #tpu.memory_space<vmem>>, %arg2: memref<32x8xbf16, #tpu.memory_space<vmem>>, %arg3: memref<8x32xbf16, #tpu.memory_space<vmem>>, %arg4: memref<8x32xbf16, #tpu.memory_space<vmem>>, %arg5: memref<1x8xf32, #tpu.memory_space<vmem>>, %arg6: memref<1x8xf32, #tpu.memory_space<vmem>>, %arg7: memref<1x8xf32, #tpu.memory_space<vmem>>, %arg8: memref<1x8xf32, #tpu.memory_space<vmem>>, %arg9: memref<1x32xf32, #tpu.memory_space<vmem>>, %arg10: memref<32x32xbf16, #tpu.memory_space<vmem>>) attributes {dimension_semantics = [#tpu.dimension_semantics<parallel>], iteration_bounds = array<i64: 1>, scalar_prefetch = 0 : i64, scratch_operands = 0 : i64, tpu.core_type = #tpu.core_type<tc>, window_params = [{transform_indices = @transform_0, window_bounds = array<i64: 32, 8>}, {transform_indices = @transform_1, window_bounds = array<i64: 32, 8>}, {pipeline_mode = #tpu.pipeline_mode<synchronous>, transform_indices = @transform_2, window_bounds = array<i64: 8, 32>}, {pipeline_mode = #tpu.pipeline_mode<synchronous>, transform_indices = @transform_3, window_bounds = array<i64: 8, 32>}, {pipeline_mode = #tpu.pipeline_mode<synchronous>, transform_indices = @transform_4, window_bounds = array<i64: 1, 8>}, {pipeline_mode = #tpu.pipeline_mode<synchronous>, transform_indices = @transform_5, window_bounds = array<i64: 1, 8>}, {pipeline_mode = #tpu.pipeline_mode<synchronous>, transform_indices = @transform_6, window_bounds = array<i64: 1, 8>}, {pipeline_mode = #tpu.pipeline_mode<synchronous>, transform_indices = @transform_7, window_bounds = array<i64: 1, 8>}, {pipeline_mode = #tpu.pipeline_mode<synchronous>, transform_indices = @transform_8, window_bounds = array<i64: 1, 32>}, {transform_indices = @transform_9, window_bounds = array<i64: 32, 32>}]} {
    %c0 = arith.constant 0 : index
    %c0_0 = arith.constant 0 : index
    %0 = vector.load %arg1[%c0, %c0_0] : memref<32x8xbf16, #tpu.memory_space<vmem>>, vector<32x8xbf16>
    %1 = arith.extf %0 : vector<32x8xbf16> to vector<32x8xf32>
    %c0_1 = arith.constant 0 : index
    %c0_2 = arith.constant 0 : index
    %2 = vector.load %arg5[%c0_1, %c0_2] : memref<1x8xf32, #tpu.memory_space<vmem>>, vector<1x8xf32>
    %3 = vector.broadcast %2 : vector<1x8xf32> to vector<32x8xf32>
    %4 = arith.mulf %1, %3 : vector<32x8xf32>
    %c0_3 = arith.constant 0 : index
    %c0_4 = arith.constant 0 : index
    %5 = vector.load %arg7[%c0_3, %c0_4] : memref<1x8xf32, #tpu.memory_space<vmem>>, vector<1x8xf32>
    %6 = vector.broadcast %5 : vector<1x8xf32> to vector<32x8xf32>
    %7 = arith.addf %4, %6 : vector<32x8xf32>
    %cst = arith.constant 0.000000e+00 : f32
    %8 = vector.broadcast %cst : f32 to vector<32x8xf32>
    %9 = arith.maximumf %7, %8 : vector<32x8xf32>
    %10 = arith.truncf %9 : vector<32x8xf32> to vector<32x8xbf16>
    %c0_5 = arith.constant 0 : index
    %c0_6 = arith.constant 0 : index
    %11 = vector.load %arg3[%c0_5, %c0_6] : memref<8x32xbf16, #tpu.memory_space<vmem>>, vector<8x32xbf16>
    %cst_7 = arith.constant dense<0.000000e+00> : vector<32x32xf32>
    %12 = tpu.matmul %10, %11, %cst_7 {dimension_numbers = #tpu.dot_dimension_numbers<[1], [0], [0], [1], [0, 0, 1, 1], [], []>} : vector<32x8xbf16>, vector<8x32xbf16>, vector<32x32xf32> -> vector<32x32xf32>
    %c0_8 = arith.constant 0 : index
    %c0_9 = arith.constant 0 : index
    %13 = vector.load %arg2[%c0_8, %c0_9] : memref<32x8xbf16, #tpu.memory_space<vmem>>, vector<32x8xbf16>
    %14 = arith.extf %13 : vector<32x8xbf16> to vector<32x8xf32>
    %c0_10 = arith.constant 0 : index
    %c0_11 = arith.constant 0 : index
    %15 = vector.load %arg6[%c0_10, %c0_11] : memref<1x8xf32, #tpu.memory_space<vmem>>, vector<1x8xf32>
    %16 = vector.broadcast %15 : vector<1x8xf32> to vector<32x8xf32>
    %17 = arith.mulf %14, %16 : vector<32x8xf32>
    %c0_12 = arith.constant 0 : index
    %c0_13 = arith.constant 0 : index
    %18 = vector.load %arg8[%c0_12, %c0_13] : memref<1x8xf32, #tpu.memory_space<vmem>>, vector<1x8xf32>
    %19 = vector.broadcast %18 : vector<1x8xf32> to vector<32x8xf32>
    %20 = arith.addf %17, %19 : vector<32x8xf32>
    %cst_14 = arith.constant 0.000000e+00 : f32
    %21 = vector.broadcast %cst_14 : f32 to vector<32x8xf32>
    %22 = arith.maximumf %20, %21 : vector<32x8xf32>
    %23 = arith.truncf %22 : vector<32x8xf32> to vector<32x8xbf16>
    %c0_15 = arith.constant 0 : index
    %c0_16 = arith.constant 0 : index
    %24 = vector.load %arg4[%c0_15, %c0_16] : memref<8x32xbf16, #tpu.memory_space<vmem>>, vector<8x32xbf16>
    %cst_17 = arith.constant dense<0.000000e+00> : vector<32x32xf32>
    %25 = tpu.matmul %23, %24, %cst_17 {dimension_numbers = #tpu.dot_dimension_numbers<[1], [0], [0], [1], [0, 0, 1, 1], [], []>} : vector<32x8xbf16>, vector<8x32xbf16>, vector<32x32xf32> -> vector<32x32xf32>
    %26 = arith.addf %12, %25 : vector<32x32xf32>
    %c0_18 = arith.constant 0 : index
    %c0_19 = arith.constant 0 : index
    %27 = vector.load %arg9[%c0_18, %c0_19] : memref<1x32xf32, #tpu.memory_space<vmem>>, vector<1x32xf32>
    %28 = vector.broadcast %27 : vector<1x32xf32> to vector<32x32xf32>
    %29 = arith.addf %26, %28 : vector<32x32xf32>
    %cst_20 = arith.constant 0.000000e+00 : f32
    %30 = vector.broadcast %cst_20 : f32 to vector<32x32xf32>
    %31 = arith.maximumf %29, %30 : vector<32x32xf32>
    %32 = arith.truncf %31 : vector<32x32xf32> to vector<32x32xbf16>
    %c0_21 = arith.constant 0 : index
    %c0_22 = arith.constant 0 : index
    %33 = vector.load %arg10[%c0_21, %c0_22] : memref<32x32xbf16, #tpu.memory_space<vmem>>, vector<32x32xbf16>
    tpu.vector_store %arg10[%c0_21, %c0_22], %32 {strides = array<i32>} : memref<32x32xbf16, #tpu.memory_space<vmem>>, vector<32x32xbf16>,
    return
  }
  func.func @transform_0(%arg0: i32) -> (i32, i32) {
    %c0_i32 = arith.constant 0 : i32
    %c0_i32_0 = arith.constant 0 : i32
    return %arg0, %c0_i32 : i32, i32
  }
  func.func @transform_1(%arg0: i32) -> (i32, i32) {
    %c0_i32 = arith.constant 0 : i32
    %c0_i32_0 = arith.constant 0 : i32
    return %arg0, %c0_i32 : i32, i32
  }
  func.func @transform_2(%arg0: i32) -> (i32, i32) {
    %c0_i32 = arith.constant 0 : i32
    %c0_i32_0 = arith.constant 0 : i32
    %c0_i32_1 = arith.constant 0 : i32
    return %c0_i32, %c0_i32_0 : i32, i32
  }
  func.func @transform_3(%arg0: i32) -> (i32, i32) {
    %c0_i32 = arith.constant 0 : i32
    %c0_i32_0 = arith.constant 0 : i32
    %c0_i32_1 = arith.constant 0 : i32
    return %c0_i32, %c0_i32_0 : i32, i32
  }
  func.func @transform_4(%arg0: i32) -> (i32, i32) {
    %c0_i32 = arith.constant 0 : i32
    %c0_i32_0 = arith.constant 0 : i32
    %c0_i32_1 = arith.constant 0 : i32
    return %c0_i32, %c0_i32_0 : i32, i32
  }
  func.func @transform_5(%arg0: i32) -> (i32, i32) {
    %c0_i32 = arith.constant 0 : i32
    %c0_i32_0 = arith.constant 0 : i32
    %c0_i32_1 = arith.constant 0 : i32
    return %c0_i32, %c0_i32_0 : i32, i32
  }
  func.func @transform_6(%arg0: i32) -> (i32, i32) {
    %c0_i32 = arith.constant 0 : i32
    %c0_i32_0 = arith.constant 0 : i32
    %c0_i32_1 = arith.constant 0 : i32
    return %c0_i32, %c0_i32_0 : i32, i32
  }
  func.func @transform_7(%arg0: i32) -> (i32, i32) {
    %c0_i32 = arith.constant 0 : i32
    %c0_i32_0 = arith.constant 0 : i32
    %c0_i32_1 = arith.constant 0 : i32
    return %c0_i32, %c0_i32_0 : i32, i32
  }
  func.func @transform_8(%arg0: i32) -> (i32, i32) {
    %c0_i32 = arith.constant 0 : i32
    %c0_i32_0 = arith.constant 0 : i32
    %c0_i32_1 = arith.constant 0 : i32
    return %c0_i32, %c0_i32_0 : i32, i32
  }
  func.func @transform_9(%arg0: i32) -> (i32, i32) {
    %c0_i32 = arith.constant 0 : i32
    %c0_i32_0 = arith.constant 0 : i32
    return %arg0, %c0_i32 : i32, i32
  }
}

module attributes {stable_mosaic.version = 11 : i64} {
  func.func @_head_kernel(%arg0: memref<2x16x8xbf16, #tpu.memory_space<vmem>>, %arg1: memref<2x16x8xbf16, #tpu.memory_space<vmem>>, %arg2: memref<2x16x8xbf16, #tpu.memory_space<vmem>>, %arg3: memref<8x10xbf16, #tpu.memory_space<vmem>>, %arg4: memref<8x10xbf16, #tpu.memory_space<vmem>>, %arg5: memref<8x10xbf16, #tpu.memory_space<vmem>>, %arg6: memref<1x10xf32, #tpu.memory_space<vmem>>, %arg7: memref<2x10xf32, #tpu.memory_space<vmem>>) attributes {dimension_semantics = [], scalar_prefetch = 0 : i64, scratch_operands = 0 : i64, tpu.core_type = #tpu.core_type<tc>} {
    %c0 = arith.constant 0 : index
    %c0_0 = arith.constant 0 : index
    %c0_1 = arith.constant 0 : index
    %0 = vector.load %arg0[%c0, %c0_0, %c0_1] : memref<2x16x8xbf16, #tpu.memory_space<vmem>>, vector<2x16x8xbf16>
    %1 = arith.extf %0 : vector<2x16x8xbf16> to vector<2x16x8xf32>
    %cst = arith.constant dense<0.000000e+00> : vector<2x8xf32>
    %2 = vector.multi_reduction <add>, %1, %cst [1] : vector<2x16x8xf32> to vector<2x8xf32>
    %cst_2 = arith.constant 6.250000e-02 : f32
    %3 = vector.broadcast %cst_2 : f32 to vector<2x8xf32>
    %4 = arith.mulf %2, %3 : vector<2x8xf32>
    %5 = arith.truncf %4 : vector<2x8xf32> to vector<2x8xbf16>
    %c0_3 = arith.constant 0 : index
    %c0_4 = arith.constant 0 : index
    %6 = vector.load %arg3[%c0_3, %c0_4] : memref<8x10xbf16, #tpu.memory_space<vmem>>, vector<8x10xbf16>
    %cst_5 = arith.constant dense<0.000000e+00> : vector<2x10xf32>
    %7 = tpu.matmul %5, %6, %cst_5 {dimension_numbers = #tpu.dot_dimension_numbers<[1], [0], [0], [1], [0, 0, 1, 1], [], []>} : vector<2x8xbf16>, vector<8x10xbf16>, vector<2x10xf32> -> vector<2x10xf32>
    %c0_6 = arith.constant 0 : index
    %c0_7 = arith.constant 0 : index
    %c0_8 = arith.constant 0 : index
    %8 = vector.load %arg1[%c0_6, %c0_7, %c0_8] : memref<2x16x8xbf16, #tpu.memory_space<vmem>>, vector<2x16x8xbf16>
    %9 = arith.extf %8 : vector<2x16x8xbf16> to vector<2x16x8xf32>
    %cst_9 = arith.constant dense<0.000000e+00> : vector<2x8xf32>
    %10 = vector.multi_reduction <add>, %9, %cst_9 [1] : vector<2x16x8xf32> to vector<2x8xf32>
    %cst_10 = arith.constant 6.250000e-02 : f32
    %11 = vector.broadcast %cst_10 : f32 to vector<2x8xf32>
    %12 = arith.mulf %10, %11 : vector<2x8xf32>
    %13 = arith.truncf %12 : vector<2x8xf32> to vector<2x8xbf16>
    %c0_11 = arith.constant 0 : index
    %c0_12 = arith.constant 0 : index
    %14 = vector.load %arg4[%c0_11, %c0_12] : memref<8x10xbf16, #tpu.memory_space<vmem>>, vector<8x10xbf16>
    %cst_13 = arith.constant dense<0.000000e+00> : vector<2x10xf32>
    %15 = tpu.matmul %13, %14, %cst_13 {dimension_numbers = #tpu.dot_dimension_numbers<[1], [0], [0], [1], [0, 0, 1, 1], [], []>} : vector<2x8xbf16>, vector<8x10xbf16>, vector<2x10xf32> -> vector<2x10xf32>
    %16 = arith.addf %7, %15 : vector<2x10xf32>
    %c0_14 = arith.constant 0 : index
    %c0_15 = arith.constant 0 : index
    %c0_16 = arith.constant 0 : index
    %17 = vector.load %arg2[%c0_14, %c0_15, %c0_16] : memref<2x16x8xbf16, #tpu.memory_space<vmem>>, vector<2x16x8xbf16>
    %18 = arith.extf %17 : vector<2x16x8xbf16> to vector<2x16x8xf32>
    %cst_17 = arith.constant dense<0.000000e+00> : vector<2x8xf32>
    %19 = vector.multi_reduction <add>, %18, %cst_17 [1] : vector<2x16x8xf32> to vector<2x8xf32>
    %cst_18 = arith.constant 6.250000e-02 : f32
    %20 = vector.broadcast %cst_18 : f32 to vector<2x8xf32>
    %21 = arith.mulf %19, %20 : vector<2x8xf32>
    %22 = arith.truncf %21 : vector<2x8xf32> to vector<2x8xbf16>
    %c0_19 = arith.constant 0 : index
    %c0_20 = arith.constant 0 : index
    %23 = vector.load %arg5[%c0_19, %c0_20] : memref<8x10xbf16, #tpu.memory_space<vmem>>, vector<8x10xbf16>
    %cst_21 = arith.constant dense<0.000000e+00> : vector<2x10xf32>
    %24 = tpu.matmul %22, %23, %cst_21 {dimension_numbers = #tpu.dot_dimension_numbers<[1], [0], [0], [1], [0, 0, 1, 1], [], []>} : vector<2x8xbf16>, vector<8x10xbf16>, vector<2x10xf32> -> vector<2x10xf32>
    %25 = arith.addf %16, %24 : vector<2x10xf32>
    %c0_22 = arith.constant 0 : index
    %c0_23 = arith.constant 0 : index
    %26 = vector.load %arg6[%c0_22, %c0_23] : memref<1x10xf32, #tpu.memory_space<vmem>>, vector<1x10xf32>
    %27 = vector.broadcast %26 : vector<1x10xf32> to vector<2x10xf32>
    %28 = arith.addf %25, %27 : vector<2x10xf32>
    %cst_24 = arith.constant dense<0xFF800000> : vector<2xf32>
    %29 = vector.multi_reduction <maximumf>, %28, %cst_24 [1] : vector<2x10xf32> to vector<2xf32>
    %30 = vector.shape_cast %29 : vector<2xf32> to vector<2x1xf32>
    %31 = vector.broadcast %30 : vector<2x1xf32> to vector<2x10xf32>
    %32 = arith.subf %28, %31 : vector<2x10xf32>
    %33 = math.exp %32 : vector<2x10xf32>
    %cst_25 = arith.constant dense<0.000000e+00> : vector<2xf32>
    %34 = vector.multi_reduction <add>, %33, %cst_25 [1] : vector<2x10xf32> to vector<2xf32>
    %35 = vector.shape_cast %34 : vector<2xf32> to vector<2x1xf32>
    %36 = tpu.reciprocal %35 {approx = true} : vector<2x1xf32> -> vector<2x1xf32>
    %37 = vector.broadcast %36 : vector<2x1xf32> to vector<2x10xf32>
    %38 = arith.mulf %33, %37 : vector<2x10xf32>
    %c0_26 = arith.constant 0 : index
    %c0_27 = arith.constant 0 : index
    %39 = vector.load %arg7[%c0_26, %c0_27] : memref<2x10xf32, #tpu.memory_space<vmem>>, vector<2x10xf32>
    tpu.vector_store %arg7[%c0_26, %c0_27], %38 {strides = array<i32>} : memref<2x10xf32, #tpu.memory_space<vmem>>, vector<2x10xf32>,
    return
  }
}

</mosaic_0001>

<bundles_post_ra>
// kernel: densenet_forward.13
= control target key start
LH: loop header
LB: loop body
LE: loop exit
PB: predicated region body
PF: predicated region fallthrough
CT: control target
= control target key end

     0   :  { %s1104_s12 = smov 0   ;;  %s1346_s0 = inlined_call_operand.vmem [shape: bf16[512,147], index: 0, kind: input, shape index: {}]   ;;  %s1347_s1 = inlined_call_operand.vmem [shape: bf16[147,16], index: 1, kind: input, shape index: {}]   ;;  %s1348_s2 = inlined_call_operand.vmem [shape: f32[1,16], index: 2, kind: input, shape index: {}]   ;;  %s1349_s3 = inlined_call_operand.vmem [shape: bf16[512,16], index: 3, kind: output, shape index: {}]  }
   0x1 LB: > { %s821_s13 = sadd.s32 4294967295, %s1081_s12   ;;  %p825_p0 = scmp.ge.s32.totalorder %s1081_s12, 1  ;;  %s1081_s12 = sphi %s1104_s12, %s13_s12  }
   0x2   : > { %p139_p1 = scmp.lt.s32.totalorder %s1081_s12, 3 }
   0x4   : > { %p140_p2 = pnand %p825_p0, %p139_p1 }
   0x5   : > { %s826_s18 = sshll.u32 (!%p140_p2), %s821_s13, 5 }
   0x6   : > { %143 = sbr.rel (%p140_p2) target bundleno = 304 (0x130), region = 32  ;;  %p165_p3 = scmp.lt.s32.totalorder (!%p140_p2), %s826_s18, 63 }
   0xb   : > { %v1053_v0 = vld [vmem:[%s1347_s1 + $0x38] sm:$0xff]  ;;  %v228_v1 = vld [vmem:[%s1347_s1 + $0x48] sm:$0x3]  ;;  %vm483_vm0 = vcmask 1040384   ;;  %vm484_vm1 = vcmask 1041408   ;;  %v1052_v3 = vld [vmem:[%s1347_s1 + $0x30] sm:$0xff] }
   0xc   : > { %v414_v2 = vunpack.c.l.b16 %v228_v1  ;;  %490 = vmatpush.bf16.msra.mxu0 %v1053_v0  ;;  %1055 = vmatpush.bf16.msra.mxu2 %v1053_v0  ;;  %v1083_v4 = vmov 65535   ;;  %s1351_s18 = smov (!%p165_p3, %s826_s18), 63  ;;  %v1051_v9 = vld [vmem:[%s1347_s1 + $0x28] sm:$0xff]  ;;  %v1054_v10 = vld [vmem:[%s1347_s1 + $0x40] sm:$0xff]  ;;  %vm434_vm2 = vcmask 154624   ;;  %v1049_v18 = vld [vmem:[%s1347_s1 + $0x18] sm:$0xff] }
   0xd   : > { %v485_v5 = vsel %vm483_vm0, 4294967295, %v1083_v4  ;;  %s1013_s23 = sshll.u32 %s1351_s18, 3  ;;  %v1050_v14 = vld [vmem:[%s1347_s1 + $0x20] sm:$0xff]  ;;  %v1048_v19 = vld [vmem:[%s1347_s1 + $0x10] sm:$0xff]  ;;  %v1047_v20 = vld [vmem:[%s1347_s1 + $0x8] sm:$0xff]  ;;  %s830_s15 = sshll.u32 %s1351_s18, 2 }
   0xe   : > { %v424_v6 = vpack.c.b16 %v414_v2, %v414_v2  ;;  %v486_v7 = vsel %vm484_vm1, %v485_v5, 0  ;;  %s1133_s28 = scalar_lea.vmem %s1346_s0, %s1013_s23  ;;  %v1046_v26 = vld [vmem:[%s1347_s1] sm:$0xff]  ;;  %s1240_s19 = scalar_lea.vmem %s1349_s3, %s830_s15  ;;  %vm732_vm3 = vcmask 125952  }
   0xf   : > { %v1014_v11 = vld [vmem:[%s1133_s28 + $0x4] sm:$0xf]  ;;  %v835_v12 = vld [vmem:[%s1133_s28 + $0x8] sm:$0xf0]  ;;  %v1032_v15 = vld [vmem:[%s1133_s28 + $0x94] sm:$0xf] }
  0x10   : > { %v488_v8 = vand.u32 %v486_v7, %v424_v6  ;;  %491 = vmatpush.bf16.msra.mxu0 %v1052_v3  ;;  %1056 = vmatpush.bf16.msra.mxu2 %v1052_v3  ;;  %v838_v13 = vor.u32 %v1014_v11, %v835_v12  ;;  %v907_v16 = vld [vmem:[%s1133_s28 + $0x98] sm:$0xf0]  ;;  %v1016_v21 = vld [vmem:[%s1133_s28 + $0x14] sm:$0xf]  ;;  %v1034_v23 = vld [vmem:[%s1133_s28 + $0xa4] sm:$0xf] }
  0x11   : > { %v910_v17 = vor.u32 %v1032_v15, %v907_v16  ;;  %v843_v22 = vld [vmem:[%s1133_s28 + $0x18] sm:$0xf0]  ;;  %v915_v24 = vld [vmem:[%s1133_s28 + $0xa8] sm:$0xf0]  ;;  %v833_v27 = vld [vmem:[%s1133_s28] sm:$0xf] }
  0x12   : > { %585 = vmatpush.bf16.msra.mxu1 %v488_v8  ;;  %1063 = vmatpush.bf16.msra.mxu3 %v488_v8  ;;  %v846_v25 = vor.u32 %v1016_v21, %v843_v22  ;;  %v1015_v28 = vld [vmem:[%s1133_s28 + $0x4] sm:$0xf0]  ;;  %v897_v29 = vld [vmem:[%s1133_s28 + $0x80] sm:$0xf]  ;;  %v918_v31 = vor.u32 %v1034_v23, %v915_v24  ;;  %v1018_v34 = vld [vmem:[%s1133_s28 + $0x24] sm:$0xf] }
  0x13   : > { %v1031_v30 = vld [vmem:[%s1133_s28 + $0x84] sm:$0xf0]  ;;  %v834_v32 = vor.u32 %v1015_v28, %v833_v27  ;;  %v851_v35 = vld [vmem:[%s1133_s28 + $0x28] sm:$0xf0]  ;;  %v1036_v36 = vld [vmem:[%s1133_s28 + $0xb4] sm:$0xf] }
  0x14   : > { %492 = vmatpush.bf16.msra.mxu0 %v1051_v9  ;;  %1057 = vmatpush.bf16.msra.mxu2 %v1051_v9  ;;  %v898_v33 = vor.u32 %v1031_v30, %v897_v29  ;;  %v923_v37 = vld [vmem:[%s1133_s28 + $0xb8] sm:$0xf0]  ;;  %v854_v38 = vor.u32 %v1018_v34, %v851_v35  ;;  %v841_v39 = vld [vmem:[%s1133_s28 + $0x10] sm:$0xf]  ;;  %v1017_v40 = vld [vmem:[%s1133_s28 + $0x14] sm:$0xf0] }
  0x15   : > { %v905_v41 = vld [vmem:[%s1133_s28 + $0x90] sm:$0xf]  ;;  %v1033_v42 = vld [vmem:[%s1133_s28 + $0x94] sm:$0xf0]  ;;  %v926_v43 = vor.u32 %v1036_v36, %v923_v37  ;;  %v842_v44 = vor.u32 %v1017_v40, %v841_v39  ;;  %v1020_v46 = vld [vmem:[%s1133_s28 + $0x34] sm:$0xf] }
  0x16   : > { %586 = vmatpush.bf16.msra.mxu1 %v1054_v10  ;;  %1064 = vmatpush.bf16.msra.mxu3 %v1054_v10  ;;  %v906_v45 = vor.u32 %v1033_v42, %v905_v41  ;;  %v859_v47 = vld [vmem:[%s1133_s28 + $0x38] sm:$0xf0]  ;;  %v1038_v48 = vld [vmem:[%s1133_s28 + $0xc4] sm:$0xf]  ;;  %v931_v49 = vld [vmem:[%s1133_s28 + $0xc8] sm:$0xf0] }
  0x17   : > { %v862_v50 = vor.u32 %v1020_v46, %v859_v47  ;;  %v849_v51 = vld [vmem:[%s1133_s28 + $0x20] sm:$0xf]  ;;  %v1019_v52 = vld [vmem:[%s1133_s28 + $0x24] sm:$0xf0]  ;;  %v934_v55 = vor.u32 %v1038_v48, %v931_v49  ;;  %v1022_v58 = vld [vmem:[%s1133_s28 + $0x44] sm:$0xf] }
  0x18   : > { %493 = vmatpush.bf16.msra.mxu0 %v1050_v14  ;;  %1058 = vmatpush.bf16.msra.mxu2 %v1050_v14  ;;  %v913_v53 = vld [vmem:[%s1133_s28 + $0xa0] sm:$0xf]  ;;  %v1035_v54 = vld [vmem:[%s1133_s28 + $0xa4] sm:$0xf0]  ;;  %v850_v56 = vor.u32 %v1019_v52, %v849_v51  ;;  %v867_v59 = vld [vmem:[%s1133_s28 + $0x48] sm:$0xf0] }
  0x19   : > { %995 = vmatmul.msk.bf16.vlgmr.msra.gmra.mxu1 %vm434_vm2, %v838_v13  ;;  %1004 = vmatmul.msk.bf16.vlgmr.msra.gmra.mxu3 %vm434_vm2, %v910_v17  ;;  %v914_v57 = vor.u32 %v1035_v54, %v913_v53  ;;  %v1040_v60 = vld [vmem:[%s1133_s28 + $0xd4] sm:$0xf]  ;;  %v939_v61 = vld [vmem:[%s1133_s28 + $0xd8] sm:$0xf0]  ;;  %v870_v62 = vor.u32 %v1022_v58, %v867_v59  ;;  %v857_v63 = vld [vmem:[%s1133_s28 + $0x30] sm:$0xf] }
  0x1a   : > { %v1021_v0 = vld [vmem:[%s1133_s28 + $0x34] sm:$0xf0]  ;;  %v921_v1 = vld [vmem:[%s1133_s28 + $0xb0] sm:$0xf]  ;;  %v942_v3 = vor.u32 %v1040_v60, %v939_v61  ;;  %v1024_v6 = vld [vmem:[%s1133_s28 + $0x54] sm:$0xf] }
  0x1b   : > { %v1037_v2 = vld [vmem:[%s1133_s28 + $0xb4] sm:$0xf0]  ;;  %v858_v4 = vor.u32 %v1021_v0, %v857_v63  ;;  %v875_v7 = vld [vmem:[%s1133_s28 + $0x58] sm:$0xf0]  ;;  %v1042_v8 = vld [vmem:[%s1133_s28 + $0xe4] sm:$0xf] }
  0x1c   : > { %494 = vmatpush.bf16.msra.mxu0 %v1049_v18  ;;  %1059 = vmatpush.bf16.msra.mxu2 %v1049_v18  ;;  %v922_v5 = vor.u32 %v1037_v2, %v921_v1  ;;  %v947_v9 = vld [vmem:[%s1133_s28 + $0xe8] sm:$0xf0]  ;;  %v878_v10 = vor.u32 %v1024_v6, %v875_v7  ;;  %v865_v11 = vld [vmem:[%s1133_s28 + $0x40] sm:$0xf]  ;;  %v1023_v12 = vld [vmem:[%s1133_s28 + $0x44] sm:$0xf0] }
  0x1d   : > { %v929_v13 = vld [vmem:[%s1133_s28 + $0xc0] sm:$0xf]  ;;  %v1039_v14 = vld [vmem:[%s1133_s28 + $0xc4] sm:$0xf0]  ;;  %v950_v15 = vor.u32 %v1042_v8, %v947_v9  ;;  %v866_v16 = vor.u32 %v1023_v12, %v865_v11  ;;  %v1026_v18 = vld [vmem:[%s1133_s28 + $0x64] sm:$0xf] }
  0x1e   : > { %v930_v17 = vor.u32 %v1039_v14, %v929_v13  ;;  %v955_v21 = vld [vmem:[%s1133_s28 + $0xf8] sm:$0xf0]  ;;  %v873_v23 = vld [vmem:[%s1133_s28 + $0x50] sm:$0xf]  ;;  %v1025_v24 = vld [vmem:[%s1133_s28 + $0x54] sm:$0xf0] }
  0x1f   : > { %v874_v28 = vor.u32 %v1025_v24, %v873_v23  ;;  %v1028_v30 = vld [vmem:[%s1133_s28 + $0x74] sm:$0xf]  ;;  %v1027_v34 = vld [vmem:[%s1133_s28 + $0x64] sm:$0xf0]  ;;  %v945_v35 = vld [vmem:[%s1133_s28 + $0xe0] sm:$0xf] }
  0x20   : > { %495 = vmatpush.bf16.msra.mxu0 %v1048_v19  ;;  %1060 = vmatpush.bf16.msra.mxu2 %v1048_v19  ;;  %v883_v19 = vld [vmem:[%s1133_s28 + $0x68] sm:$0xf0]  ;;  %v1043_v36 = vld [vmem:[%s1133_s28 + $0xe4] sm:$0xf0]  ;;  %v1030_v39 = vld [vmem:[%s1133_s28 + $0x84] sm:$0xf] }
  0x21   : > { %v886_v22 = vor.u32 %v1026_v18, %v883_v19  ;;  %v899_v40 = vld [vmem:[%s1133_s28 + $0x88] sm:$0xf0]  ;;  %v889_v42 = vld [vmem:[%s1133_s28 + $0x70] sm:$0xf]  ;;  %v1045_v46 = vld [vmem:[%s1133_s28 + $0xf4] sm:$0xf0] }
  0x22   : > { %v902_v41 = vor.u32 %v1030_v39, %v899_v40  ;;  %v1233_v51 = vld [vmem:[%s1348_s2] ss:$0 sm:$0xff] }
  0x24   : > { %496 = vmatpush.bf16.msra.mxu0 %v1047_v20  ;;  %1061 = vmatpush.bf16.msra.mxu2 %v1047_v20  ;;  %v1044_v20 = vld [vmem:[%s1133_s28 + $0xf4] sm:$0xf] }
  0x25   : > { %v958_v27 = vor.u32 %v1044_v20, %v955_v21 }
  0x28   : > { %497 = vmatpush.bf16.msra.mxu0 %v1046_v26  ;;  %1062 = vmatpush.bf16.msra.mxu2 %v1046_v26  ;;  %v1041_v26 = vld [vmem:[%s1133_s28 + $0xd4] sm:$0xf0] }
  0x29   : > { %996 = vmatmul.msk.bf16.gmra.mxu1 %vm434_vm2, %v846_v25  ;;  %1005 = vmatmul.msk.bf16.gmra.mxu3 %vm434_vm2, %v918_v31  ;;  %v937_v25 = vld [vmem:[%s1133_s28 + $0xd0] sm:$0xf]  ;;  %v891_v31 = vld [vmem:[%s1133_s28 + $0x78] sm:$0xf0] }
  0x2a   : > { %v938_v29 = vor.u32 %v1041_v26, %v937_v25 }
  0x2b   : > { %498 = vmatmul.bf16.vlgmr.msra.gmra.mxu0 %v834_v32  ;;  %538 = vmatmul.bf16.vlgmr.msra.gmra.mxu2 %v898_v33  ;;  %v894_v32 = vor.u32 %v1028_v30, %v891_v31  ;;  %v881_v33 = vld [vmem:[%s1133_s28 + $0x60] sm:$0xf] }
  0x2c   : > { %v882_v37 = vor.u32 %v1027_v34, %v881_v33 }
  0x39   : > { %997 = vmatmul.msk.bf16.gmra.mxu1 %vm434_vm2, %v854_v38  ;;  %1006 = vmatmul.msk.bf16.gmra.mxu3 %vm434_vm2, %v926_v43  ;;  %v946_v38 = vor.u32 %v1043_v36, %v945_v35  ;;  %v1029_v43 = vld [vmem:[%s1133_s28 + $0x74] sm:$0xf0] }
  0x3a   : > { %v890_v47 = vor.u32 %v1029_v43, %v889_v42 }
  0x3b   : > { %503 = vmatmul.bf16.gmra.mxu0 %v842_v44  ;;  %543 = vmatmul.bf16.gmra.mxu2 %v906_v45  ;;  %v953_v45 = vld [vmem:[%s1133_s28 + $0xf0] sm:$0xf] }
  0x3c   : > { %v954_v48 = vor.u32 %v1045_v46, %v953_v45 }
  0x49   : > { %998 = vmatmul.msk.bf16.gmra.mxu1 %vm434_vm2, %v862_v50  ;;  %1007 = vmatmul.msk.bf16.gmra.mxu3 %vm434_vm2, %v934_v55 }
  0x4b   : > { %508 = vmatmul.bf16.gmra.mxu0 %v850_v56  ;;  %548 = vmatmul.bf16.gmra.mxu2 %v914_v57 }
  0x59   : > { %999 = vmatmul.msk.bf16.gmra.mxu1 %vm434_vm2, %v870_v62  ;;  %1008 = vmatmul.msk.bf16.gmra.mxu3 %vm434_vm2, %v942_v3 }
  0x5b   : > { %513 = vmatmul.bf16.gmra.mxu0 %v858_v4  ;;  %553 = vmatmul.bf16.gmra.mxu2 %v922_v5 }
  0x69   : > { %1000 = vmatmul.msk.bf16.gmra.mxu1 %vm434_vm2, %v878_v10  ;;  %1009 = vmatmul.msk.bf16.gmra.mxu3 %vm434_vm2, %v950_v15 }
  0x6b   : > { %518 = vmatmul.bf16.gmra.mxu0 %v866_v16  ;;  %558 = vmatmul.bf16.gmra.mxu2 %v930_v17 }
  0x79   : > { %1001 = vmatmul.msk.bf16.gmra.mxu1 %vm434_vm2, %v886_v22  ;;  %1010 = vmatmul.msk.bf16.gmra.mxu3 %vm434_vm2, %v958_v27 }
  0x7b   : > { %523 = vmatmul.bf16.gmra.mxu0 %v874_v28  ;;  %563 = vmatmul.bf16.gmra.mxu2 %v938_v29 }
  0x89   : > { %1002 = vmatmul.msk.bf16.gmra.mxu1 %vm434_vm2, %v894_v32 }
  0x8b   : > { %528 = vmatmul.bf16.gmra.mxu0 %v882_v37  ;;  %568 = vmatmul.bf16.gmra.mxu2 %v946_v38 }
  0x96   : > { %v588_v44 = vpop.f32.mrf.mxu1 }
  0x99   : > { %1003 = vmatmul.msk.bf16.gmra.mxu1 %vm434_vm2, %v902_v41 }
  0x9b   : > { %533 = vmatmul.bf16.gmra.mxu0 %v890_v47  ;;  %573 = vmatmul.bf16.gmra.mxu2 %v954_v48 }
  0x9c   : > { %v633_v52 = vpop.f32.mrf.mxu3 }
  0x9e   : > { %v590_v49 = vpop.f32.mrf.mxu1 }
  0xa4   : > { %v635_v62 = vpop.f32.mrf.mxu3 }
  0xa6   : > { %v593_v50 = vpop.f32.mrf.mxu1 }
  0xa8   : > { %v499_v53 = vpop.f32.mrf.mxu0 }
  0xa9   : > { %v500_v54 = vadd.f32 %v1233_v51, %v499_v53 }
  0xab   : > { %v589_v55 = vadd.f32 %v588_v44, %v500_v54 }
  0xac   : > { %v638_v7 = vpop.f32.mrf.mxu3 }
  0xad   : > { %v668_v56 = vmax.f32 %v589_v55, 0.0 }
  0xae   : > { %v595_v57 = vpop.f32.mrf.mxu1  ;;  %v1242_v59 = vpop.f32.mrf.mxu2 }
  0xaf   : > { %v700_v58 = vpack.c.bf16 %v668_v56, %v668_v56 }
  0xb0   : > { %v501_v60 = vpop.f32.mrf.mxu0 }
  0xb1   : > { %733 = vst.msk [vmem:[%s1240_s19] sm:$0xf] %vm732_vm3, %v700_v58  ;;  %v502_v61 = vadd.f32 %v1233_v51, %v501_v60 }
  0xb3   : > { %v591_v63 = vadd.f32 %v590_v49, %v502_v61 }
  0xb4   : > { %v640_v20 = vpop.f32.mrf.mxu3 }
  0xb5   : > { %v669_v0 = vmax.f32 %v591_v63, 0.0 }
  0xb6   : > { %v598_v1 = vpop.f32.mrf.mxu1  ;;  %v1247_v3 = vpop.f32.mrf.mxu2 }
  0xb7   : > { %v701_v2 = vpack.c.bf16 %v669_v0, %v669_v0 }
  0xb8   : > { %v504_v4 = vpop.f32.mrf.mxu0 }
  0xb9   : > { %734 = vst.msk [vmem:[%s1240_s19 + $0x4] sm:$0xf] %vm732_vm3, %v701_v2  ;;  %v505_v5 = vadd.f32 %v1233_v51, %v504_v4 }
  0xbb   : > { %v594_v6 = vadd.f32 %v593_v50, %v505_v5 }
  0xbc   : > { %v643_v35 = vpop.f32.mrf.mxu3 }
  0xbd   : > { %v670_v8 = vmax.f32 %v594_v6, 0.0 }
  0xbe   : > { %v600_v9 = vpop.f32.mrf.mxu1  ;;  %v544_v11 = vpop.f32.mrf.mxu2 }
  0xbf   : > { %v702_v10 = vpack.c.bf16 %v670_v8, %v670_v8  ;;  %v545_v12 = vadd.f32 %v1233_v51, %v544_v11 }
  0xc0   : > { %v506_v13 = vpop.f32.mrf.mxu0 }
  0xc1   : > { %735 = vst.msk [vmem:[%s1240_s19 + $0x8] sm:$0xf] %vm732_vm3, %v702_v10  ;;  %v507_v14 = vadd.f32 %v1233_v51, %v506_v13  ;;  %v634_v15 = vadd.f32 %v633_v52, %v545_v12 }
  0xc3   : > { %v596_v16 = vadd.f32 %v595_v57, %v507_v14  ;;  %v686_v17 = vmax.f32 %v634_v15, 0.0 }
  0xc4   : > { %v645_v50 = vpop.f32.mrf.mxu3 }
  0xc5   : > { %v671_v18 = vmax.f32 %v596_v16, 0.0  ;;  %v718_v21 = vpack.c.bf16 %v686_v17, %v686_v17 }
  0xc6   : > { %v603_v19 = vpop.f32.mrf.mxu1  ;;  %v546_v23 = vpop.f32.mrf.mxu2 }
  0xc7   : > { %v703_v22 = vpack.c.bf16 %v671_v18, %v671_v18  ;;  %751 = vst.msk [vmem:[%s1240_s19 + $0x48] sm:$0xf] %vm732_vm3, %v718_v21  ;;  %v547_v24 = vadd.f32 %v1233_v51, %v546_v23 }
  0xc8   : > { %v509_v25 = vpop.f32.mrf.mxu0 }
  0xc9   : > { %736 = vst.msk [vmem:[%s1240_s19 + $0xc] sm:$0xf] %vm732_vm3, %v703_v22  ;;  %v510_v26 = vadd.f32 %v1233_v51, %v509_v25  ;;  %v636_v27 = vadd.f32 %v635_v62, %v547_v24 }
  0xcb   : > { %v599_v28 = vadd.f32 %v598_v1, %v510_v26  ;;  %v687_v29 = vmax.f32 %v636_v27, 0.0 }
  0xcc   : > { %v648_v2 = vpop.f32.mrf.mxu3 }
  0xcd   : > { %v672_v30 = vmax.f32 %v599_v28, 0.0  ;;  %v719_v32 = vpack.c.bf16 %v687_v29, %v687_v29 }
  0xce   : > { %v605_v31 = vpop.f32.mrf.mxu1  ;;  %v549_v34 = vpop.f32.mrf.mxu2 }
  0xcf   : > { %v704_v33 = vpack.c.bf16 %v672_v30, %v672_v30  ;;  %752 = vst.msk [vmem:[%s1240_s19 + $0x4c] sm:$0xf] %vm732_vm3, %v719_v32  ;;  %v550_v36 = vadd.f32 %v1233_v51, %v549_v34 }
  0xd0   : > { %v511_v37 = vpop.f32.mrf.mxu0 }
  0xd1   : > { %737 = vst.msk [vmem:[%s1240_s19 + $0x10] sm:$0xf] %vm732_vm3, %v704_v33  ;;  %v512_v38 = vadd.f32 %v1233_v51, %v511_v37  ;;  %v639_v39 = vadd.f32 %v638_v7, %v550_v36 }
  0xd3   : > { %v601_v40 = vadd.f32 %v600_v9, %v512_v38  ;;  %v688_v41 = vmax.f32 %v639_v39, 0.0 }
  0xd4   : > { %v650_v18 = vpop.f32.mrf.mxu3 }
  0xd5   : > { %v673_v42 = vmax.f32 %v601_v40, 0.0  ;;  %v720_v44 = vpack.c.bf16 %v688_v41, %v688_v41 }
  0xd6   : > { %v608_v43 = vpop.f32.mrf.mxu1  ;;  %v551_v46 = vpop.f32.mrf.mxu2 }
  0xd7   : > { %v705_v45 = vpack.c.bf16 %v673_v42, %v673_v42  ;;  %753 = vst.msk [vmem:[%s1240_s19 + $0x50] sm:$0xf] %vm732_vm3, %v720_v44  ;;  %v552_v47 = vadd.f32 %v1233_v51, %v551_v46 }
  0xd8   : > { %v514_v48 = vpop.f32.mrf.mxu0 }
  0xd9   : > { %738 = vst.msk [vmem:[%s1240_s19 + $0x14] sm:$0xf] %vm732_vm3, %v705_v45  ;;  %v515_v49 = vadd.f32 %v1233_v51, %v514_v48  ;;  %v641_v52 = vadd.f32 %v640_v20, %v552_v47 }
  0xdb   : > { %v604_v53 = vadd.f32 %v603_v19, %v515_v49  ;;  %v689_v54 = vmax.f32 %v641_v52, 0.0 }
  0xdc   : > { %v653_v33 = vpop.f32.mrf.mxu3 }
  0xdd   : > { %v674_v55 = vmax.f32 %v604_v53, 0.0  ;;  %v721_v57 = vpack.c.bf16 %v689_v54, %v689_v54 }
  0xde   : > { %v610_v56 = vpop.f32.mrf.mxu1  ;;  %v554_v60 = vpop.f32.mrf.mxu2 }
  0xdf   : > { %v706_v58 = vpack.c.bf16 %v674_v55, %v674_v55  ;;  %754 = vst.msk [vmem:[%s1240_s19 + $0x54] sm:$0xf] %vm732_vm3, %v721_v57  ;;  %v555_v61 = vadd.f32 %v1233_v51, %v554_v60 }
  0xe0   : > { %v516_v62 = vpop.f32.mrf.mxu0 }
  0xe1   : > { %739 = vst.msk [vmem:[%s1240_s19 + $0x18] sm:$0xf] %vm732_vm3, %v706_v58  ;;  %v517_v63 = vadd.f32 %v1233_v51, %v516_v62  ;;  %v644_v0 = vadd.f32 %v643_v35, %v555_v61 }
  0xe3   : > { %v606_v1 = vadd.f32 %v605_v31, %v517_v63  ;;  %v690_v4 = vmax.f32 %v644_v0, 0.0 }
  0xe4   : > { %v655_v48 = vpop.f32.mrf.mxu3 }
  0xe5   : > { %v675_v5 = vmax.f32 %v606_v1, 0.0  ;;  %v722_v7 = vpack.c.bf16 %v690_v4, %v690_v4 }
  0xe6   : > { %v613_v6 = vpop.f32.mrf.mxu1  ;;  %v556_v9 = vpop.f32.mrf.mxu2 }
  0xe7   : > { %v707_v8 = vpack.c.bf16 %v675_v5, %v675_v5  ;;  %755 = vst.msk [vmem:[%s1240_s19 + $0x58] sm:$0xf] %vm732_vm3, %v722_v7  ;;  %v557_v10 = vadd.f32 %v1233_v51, %v556_v9 }
  0xe8   : > { %v519_v11 = vpop.f32.mrf.mxu0 }
  0xe9   : > { %740 = vst.msk [vmem:[%s1240_s19 + $0x1c] sm:$0xf] %vm732_vm3, %v707_v8  ;;  %v520_v12 = vadd.f32 %v1233_v51, %v519_v11  ;;  %v646_v13 = vadd.f32 %v645_v50, %v557_v10 }
  0xeb   : > { %v609_v14 = vadd.f32 %v608_v43, %v520_v12  ;;  %v691_v15 = vmax.f32 %v646_v13, 0.0  ;;  %v540_v13 = vadd.f32 %v1233_v51, %v1242_v59 }
  0xec   : > { %v658_v0 = vpop.f32.mrf.mxu3 }
  0xed   : > { %v676_v16 = vmax.f32 %v609_v14, 0.0  ;;  %v723_v19 = vpack.c.bf16 %v691_v15, %v691_v15 }
  0xee   : > { %v615_v17 = vpop.f32.mrf.mxu1  ;;  %v559_v21 = vpop.f32.mrf.mxu2 }
  0xef   : > { %v708_v20 = vpack.c.bf16 %v676_v16, %v676_v16  ;;  %756 = vst.msk [vmem:[%s1240_s19 + $0x5c] sm:$0xf] %vm732_vm3, %v723_v19  ;;  %v560_v22 = vadd.f32 %v1233_v51, %v559_v21 }
  0xf0   : > { %v521_v23 = vpop.f32.mrf.mxu0 }
  0xf1   : > { %741 = vst.msk [vmem:[%s1240_s19 + $0x20] sm:$0xf] %vm732_vm3, %v708_v20  ;;  %v522_v24 = vadd.f32 %v1233_v51, %v521_v23  ;;  %v649_v25 = vadd.f32 %v648_v2, %v560_v22 }
  0xf3   : > { %v611_v26 = vadd.f32 %v610_v56, %v522_v24  ;;  %v692_v27 = vmax.f32 %v649_v25, 0.0 }
  0xf4   : > { %v660_v16 = vpop.f32.mrf.mxu3 }
  0xf5   : > { %v677_v28 = vmax.f32 %v611_v26, 0.0  ;;  %v724_v30 = vpack.c.bf16 %v692_v27, %v692_v27 }
  0xf6   : > { %v618_v29 = vpop.f32.mrf.mxu1  ;;  %v561_v32 = vpop.f32.mrf.mxu2 }
  0xf7   : > { %v709_v31 = vpack.c.bf16 %v677_v28, %v677_v28  ;;  %757 = vst.msk [vmem:[%s1240_s19 + $0x60] sm:$0xf] %vm732_vm3, %v724_v30  ;;  %v562_v34 = vadd.f32 %v1233_v51, %v561_v32  ;;  %v542_v28 = vadd.f32 %v1233_v51, %v1247_v3 }
  0xf8   : > { %v524_v35 = vpop.f32.mrf.mxu0 }
  0xf9   : > { %742 = vst.msk [vmem:[%s1240_s19 + $0x24] sm:$0xf] %vm732_vm3, %v709_v31  ;;  %v525_v36 = vadd.f32 %v1233_v51, %v524_v35  ;;  %v651_v37 = vadd.f32 %v650_v18, %v562_v34 }
  0xfb   : > { %v614_v38 = vadd.f32 %v613_v6, %v525_v36  ;;  %v693_v39 = vmax.f32 %v651_v37, 0.0 }
  0xfc   : > { %v663_v35 = vpop.f32.mrf.mxu3 }
  0xfd   : > { %v678_v40 = vmax.f32 %v614_v38, 0.0  ;;  %v725_v42 = vpack.c.bf16 %v693_v39, %v693_v39 }
  0xfe   : > { %v620_v41 = vpop.f32.mrf.mxu1  ;;  %v564_v44 = vpop.f32.mrf.mxu2 }
  0xff   : > { %v710_v43 = vpack.c.bf16 %v678_v40, %v678_v40  ;;  %758 = vst.msk [vmem:[%s1240_s19 + $0x64] sm:$0xf] %vm732_vm3, %v725_v42  ;;  %v565_v45 = vadd.f32 %v1233_v51, %v564_v44 }
 0x100   : > { %v526_v46 = vpop.f32.mrf.mxu0 }
 0x101   : > { %743 = vst.msk [vmem:[%s1240_s19 + $0x28] sm:$0xf] %vm732_vm3, %v710_v43  ;;  %v527_v47 = vadd.f32 %v1233_v51, %v526_v46  ;;  %v654_v49 = vadd.f32 %v653_v33, %v565_v45 }
 0x103   : > { %v616_v50 = vadd.f32 %v615_v17, %v527_v47  ;;  %v694_v52 = vmax.f32 %v654_v49, 0.0 }
 0x104   : > { %v665_v49 = vpop.f32.mrf.mxu3 }
 0x105   : > { %v679_v53 = vmax.f32 %v616_v50, 0.0  ;;  %v726_v55 = vpack.c.bf16 %v694_v52, %v694_v52 }
 0x106   : > { %v623_v54 = vpop.f32.mrf.mxu1  ;;  %v566_v57 = vpop.f32.mrf.mxu2 }
 0x107   : > { %v711_v56 = vpack.c.bf16 %v679_v53, %v679_v53  ;;  %759 = vst.msk [vmem:[%s1240_s19 + $0x68] sm:$0xf] %vm732_vm3, %v726_v55  ;;  %v567_v58 = vadd.f32 %v1233_v51, %v566_v57 }
 0x108   : > { %v529_v60 = vpop.f32.mrf.mxu0 }
 0x109   : > { %744 = vst.msk [vmem:[%s1240_s19 + $0x2c] sm:$0xf] %vm732_vm3, %v711_v56  ;;  %v530_v61 = vadd.f32 %v1233_v51, %v529_v60  ;;  %v656_v62 = vadd.f32 %v655_v48, %v567_v58 }
 0x10b   : > { %v619_v63 = vadd.f32 %v618_v29, %v530_v61  ;;  %v695_v1 = vmax.f32 %v656_v62, 0.0 }
 0x10d   : > { %v680_v2 = vmax.f32 %v619_v63, 0.0  ;;  %v727_v5 = vpack.c.bf16 %v695_v1, %v695_v1 }
 0x10e   : > { %v625_v4 = vpop.f32.mrf.mxu1  ;;  %v569_v7 = vpop.f32.mrf.mxu2 }
 0x10f   : > { %v712_v6 = vpack.c.bf16 %v680_v2, %v680_v2  ;;  %760 = vst.msk [vmem:[%s1240_s19 + $0x6c] sm:$0xf] %vm732_vm3, %v727_v5  ;;  %v570_v8 = vadd.f32 %v1233_v51, %v569_v7 }
 0x110   : > { %v531_v9 = vpop.f32.mrf.mxu0 }
 0x111   : > { %745 = vst.msk [vmem:[%s1240_s19 + $0x30] sm:$0xf] %vm732_vm3, %v712_v6  ;;  %v532_v10 = vadd.f32 %v1233_v51, %v531_v9  ;;  %v659_v11 = vadd.f32 %v658_v0, %v570_v8 }
 0x113   : > { %v621_v12 = vadd.f32 %v620_v41, %v532_v10  ;;  %v696_v14 = vmax.f32 %v659_v11, 0.0 }
 0x115   : > { %v681_v15 = vmax.f32 %v621_v12, 0.0  ;;  %v728_v18 = vpack.c.bf16 %v696_v14, %v696_v14 }
 0x116   : > { %v628_v17 = vpop.f32.mrf.mxu1  ;;  %v571_v21 = vpop.f32.mrf.mxu2 }
 0x117   : > { %v629_v19 = vadd.f32 %v628_v17, %v540_v13  ;;  %v713_v20 = vpack.c.bf16 %v681_v15, %v681_v15  ;;  %761 = vst.msk [vmem:[%s1240_s19 + $0x70] sm:$0xf] %vm732_vm3, %v728_v18  ;;  %v572_v23 = vadd.f32 %v1233_v51, %v571_v21 }
 0x118   : > { %v534_v24 = vpop.f32.mrf.mxu0 }
 0x119   : > { %v684_v22 = vmax.f32 %v629_v19, 0.0  ;;  %746 = vst.msk [vmem:[%s1240_s19 + $0x34] sm:$0xf] %vm732_vm3, %v713_v20  ;;  %v535_v59 = vadd.f32 %v1233_v51, %v534_v24  ;;  %v661_v26 = vadd.f32 %v660_v16, %v572_v23 }
 0x11b   : > { %v716_v25 = vpack.c.bf16 %v684_v22, %v684_v22  ;;  %v624_v27 = vadd.f32 %v623_v54, %v535_v59  ;;  %v697_v29 = vmax.f32 %v661_v26, 0.0 }
 0x11d   : > { %749 = vst.msk [vmem:[%s1240_s19 + $0x40] sm:$0xf] %vm732_vm3, %v716_v25  ;;  %v682_v30 = vmax.f32 %v624_v27, 0.0  ;;  %v729_v32 = vpack.c.bf16 %v697_v29, %v697_v29 }
 0x11e   : > { %v630_v31 = vpop.f32.mrf.mxu1  ;;  %v574_v36 = vpop.f32.mrf.mxu2 }
 0x11f   : > { %v631_v33 = vadd.f32 %v630_v31, %v542_v28  ;;  %v714_v34 = vpack.c.bf16 %v682_v30, %v682_v30  ;;  %762 = vst.msk [vmem:[%s1240_s19 + $0x74] sm:$0xf] %vm732_vm3, %v729_v32  ;;  %v575_v38 = vadd.f32 %v1233_v51, %v574_v36 }
 0x120   : > { %v536_v39 = vpop.f32.mrf.mxu0 }
 0x121   : > { %v685_v37 = vmax.f32 %v631_v33, 0.0  ;;  %747 = vst.msk [vmem:[%s1240_s19 + $0x38] sm:$0xf] %vm732_vm3, %v714_v34  ;;  %v537_v3 = vadd.f32 %v1233_v51, %v536_v39  ;;  %v664_v41 = vadd.f32 %v663_v35, %v575_v38 }
 0x123   : > { %v717_v40 = vpack.c.bf16 %v685_v37, %v685_v37  ;;  %v626_v42 = vadd.f32 %v625_v4, %v537_v3  ;;  %v698_v43 = vmax.f32 %v664_v41, 0.0 }
 0x125   : > { %750 = vst.msk [vmem:[%s1240_s19 + $0x44] sm:$0xf] %vm732_vm3, %v717_v40  ;;  %v683_v44 = vmax.f32 %v626_v42, 0.0  ;;  %v730_v45 = vpack.c.bf16 %v698_v43, %v698_v43 }
 0x126   : > { %v576_v47 = vpop.f32.mrf.mxu2 }
 0x127   : > { %v715_v46 = vpack.c.bf16 %v683_v44, %v683_v44  ;;  %763 = vst.msk [vmem:[%s1240_s19 + $0x78] sm:$0xf] %vm732_vm3, %v730_v45  ;;  %v577_v48 = vadd.f32 %v1233_v51, %v576_v47 }
 0x129   : > { %748 = vst.msk [vmem:[%s1240_s19 + $0x3c] sm:$0xf] %vm732_vm3, %v715_v46  ;;  %v666_v50 = vadd.f32 %v665_v49, %v577_v48 }
 0x12b   : > { %v699_v52 = vmax.f32 %v666_v50, 0.0 }
 0x12d   : > { %v731_v53 = vpack.c.bf16 %v699_v52, %v699_v52 }
 0x12f   : > { %764 = vst.msk [vmem:[%s1240_s19 + $0x7c] sm:$0xf] %vm732_vm3, %v731_v53 }
 0x130 PF: > { %s13_s12 = sadd.s32 1, %s1081_s12  }
 0x131   : > { %p10_p4 = scmp.ge.s32.totalorder %s13_s12, 4  }
 0x133   :  { %12 = sbr.rel (!%p10_p4) target bundleno = 1 (0x1), region = 62 }

// kernel: densenet_forward.15
= control target key start
LH: loop header
LB: loop body
LE: loop exit
PB: predicated region body
PF: predicated region fallthrough
CT: control target
= control target key end

     0   :  { %s507_s18 = smov 0   ;;  %s565_s0 = inlined_call_operand.vmem [shape: bf16[128,16], index: 0, kind: input, shape index: {}]   ;;  %s566_s1 = inlined_call_operand.vmem [shape: bf16[16,32], index: 1, kind: input, shape index: {}]   ;;  %s567_s2 = inlined_call_operand.vmem [shape: f32[1,16], index: 2, kind: input, shape index: {}]   ;;  %s568_s3 = inlined_call_operand.vmem [shape: f32[1,16], index: 3, kind: input, shape index: {}]   ;;  %s569_s4 = inlined_call_operand.vmem [shape: f32[1,32], index: 4, kind: input, shape index: {}]   ;;  %s570_s5 = inlined_call_operand.vmem [shape: bf16[128,32], index: 5, kind: output, shape index: {}]  }
   0x1 LB: > { %s416_s19 = sadd.s32 4294967295, %s475_s18   ;;  %p420_p0 = scmp.ge.s32.totalorder %s475_s18, 1  ;;  %s475_s18 = sphi %s507_s18, %s15_s18  }
   0x2   : > { %p188_p1 = scmp.lt.s32.totalorder %s475_s18, 3 }
   0x4   : > { %p189_p2 = pnand %p420_p0, %p188_p1 }
   0x5   : > { %s421_s22 = sshll.u32 (!%p189_p2), %s416_s19, 3 }
   0x6   : > { %192 = sbr.rel (%p189_p2) target bundleno = 174 (0xae), region = 40  ;;  %p217_p3 = scmp.lt.s32.totalorder (!%p189_p2), %s421_s22, 15 }
   0xb   : > { %v435_v0 = vld [vmem:[%s566_s1] sm:$0xff]  ;;  %s572_s22 = smov (!%p217_p3, %s421_s22), 15  ;;  %vm293_vm0 = vcmask 130048   ;;  %vm351_vm1 = vcmask 257024  }
   0xc   : > { %313 = vmatpush.bf16.msra.mxu0 %v435_v0  ;;  %455 = vmatpush.bf16.msra.mxu1 %v435_v0  ;;  %s422_s23 = sshll.u32 %s572_s22, 2  ;;  %v466_v1 = vld [vmem:[%s567_s2] ss:$0 sm:$0xff] }
   0xd   : > { %456 = vmatpush.bf16.msra.mxu2 %v435_v0  ;;  %457 = vmatpush.bf16.msra.mxu3 %v435_v0  ;;  %s220_s26 = scalar_lea.vmem %s565_s0, %s422_s23  ;;  %v467_v7 = vld [vmem:[%s568_s3] ss:$0 sm:$0xff]  ;;  %s544_s10 = scalar_lea.vmem %s570_s5, %s422_s23 }
   0xe   : > { %v437_v2 = vld [vmem:[%s220_s26] sm:$0xff]   ;;  %v452_v3 = vld [vmem:[%s220_s26 + $0x8] sm:$0xff]   ;;  %v453_v4 = vld [vmem:[%s220_s26 + $0x10] sm:$0xff]  }
   0xf   : > { %v438_v5 = vunpack.c.l.bf16 %v437_v2  ;;  %v439_v6 = vunpack.c.h.bf16 %v437_v2  ;;  %v442_v8 = vunpack.c.l.bf16 %v452_v3  ;;  %v443_v9 = vunpack.c.h.bf16 %v452_v3  ;;  %v454_v10 = vld [vmem:[%s220_s26 + $0x18] sm:$0xff]   ;;  %v468_v43 = vld [vmem:[%s569_s4] ss:$0 sm:$0xff] }
  0x10   : > { %v446_v11 = vunpack.c.l.bf16 %v453_v4  ;;  %v447_v12 = vunpack.c.h.bf16 %v453_v4  ;;  %v450_v13 = vunpack.c.l.bf16 %v454_v10  ;;  %v451_v14 = vunpack.c.h.bf16 %v454_v10 }
  0x11   : > { %v249_v15 = vmul.f32 %v466_v1, %v438_v5  ;;  %v250_v16 = vmul.f32 %v466_v1, %v439_v6  ;;  %v251_v17 = vmul.f32 %v466_v1, %v442_v8  ;;  %v252_v18 = vmul.f32 %v466_v1, %v443_v9 }
  0x12   : > { %v253_v19 = vmul.f32 %v466_v1, %v446_v11  ;;  %v254_v20 = vmul.f32 %v466_v1, %v447_v12  ;;  %v255_v21 = vmul.f32 %v466_v1, %v450_v13  ;;  %v256_v22 = vmul.f32 %v466_v1, %v451_v14 }
  0x13   : > { %v261_v23 = vadd.f32 %v467_v7, %v249_v15  ;;  %v262_v24 = vadd.f32 %v467_v7, %v250_v16  ;;  %v263_v25 = vadd.f32 %v467_v7, %v251_v17  ;;  %v264_v26 = vadd.f32 %v467_v7, %v252_v18 }
  0x14   : > { %v265_v27 = vadd.f32 %v467_v7, %v253_v19  ;;  %v266_v28 = vadd.f32 %v467_v7, %v254_v20  ;;  %v267_v29 = vadd.f32 %v467_v7, %v255_v21  ;;  %v268_v30 = vadd.f32 %v467_v7, %v256_v22 }
  0x15   : > { %v269_v31 = vmax.f32 %v261_v23, 0.0  ;;  %v270_v32 = vmax.f32 %v262_v24, 0.0  ;;  %v271_v33 = vmax.f32 %v263_v25, 0.0  ;;  %v272_v34 = vmax.f32 %v264_v26, 0.0 }
  0x16   : > { %v273_v35 = vmax.f32 %v265_v27, 0.0  ;;  %v274_v36 = vmax.f32 %v266_v28, 0.0  ;;  %v275_v37 = vmax.f32 %v267_v29, 0.0  ;;  %v276_v38 = vmax.f32 %v268_v30, 0.0 }
  0x17   : > { %v277_v39 = vpack.c.bf16 %v270_v32, %v269_v31  ;;  %v278_v40 = vpack.c.bf16 %v272_v34, %v271_v33 }
  0x18   : > { %v279_v41 = vpack.c.bf16 %v274_v36, %v273_v35  ;;  %v280_v42 = vpack.c.bf16 %v276_v38, %v275_v37 }
  0x19   : > { %429 = vmatmul.msk.bf16.vlgmr.msra.gmra.mxu0 %vm293_vm0, %v277_v39  ;;  %430 = vmatmul.msk.bf16.vlgmr.msra.gmra.mxu1 %vm293_vm0, %v278_v40 }
  0x1a   : > { %431 = vmatmul.msk.bf16.vlgmr.msra.gmra.mxu2 %vm293_vm0, %v279_v41  ;;  %432 = vmatmul.msk.bf16.vlgmr.msra.gmra.mxu3 %vm293_vm0, %v280_v42 }
  0x96   : > { %v315_v44 = vpop.f32.mrf.mxu0  ;;  %v320_v45 = vpop.f32.mrf.mxu1 }
  0x97   : > { %v316_v46 = vadd.f32 %v468_v43, %v315_v44  ;;  %v321_v47 = vadd.f32 %v468_v43, %v320_v45 }
  0x99   : > { %v335_v48 = vmax.f32 %v316_v46, 0.0  ;;  %v337_v49 = vmax.f32 %v321_v47, 0.0 }
  0x9b   : > { %v343_v50 = vpack.c.bf16 %v335_v48, %v335_v48  ;;  %v345_v51 = vpack.c.bf16 %v337_v49, %v337_v49 }
  0x9d   : > { %352 = vst.msk [vmem:[%s544_s10] sm:$0xf] %vm351_vm1, %v343_v50  ;;  %v325_v52 = vpop.f32.mrf.mxu2  ;;  %v330_v53 = vpop.f32.mrf.mxu3 }
  0x9e   : > { %354 = vst.msk [vmem:[%s544_s10 + $0x8] sm:$0xf] %vm351_vm1, %v345_v51  ;;  %v326_v54 = vadd.f32 %v468_v43, %v325_v52  ;;  %v331_v55 = vadd.f32 %v468_v43, %v330_v53  ;;  %v317_v56 = vpop.f32.mrf.mxu0  ;;  %v322_v57 = vpop.f32.mrf.mxu1 }
  0x9f   : > { %v318_v58 = vadd.f32 %v468_v43, %v317_v56  ;;  %v323_v59 = vadd.f32 %v468_v43, %v322_v57 }
  0xa0   : > { %v339_v60 = vmax.f32 %v326_v54, 0.0  ;;  %v341_v61 = vmax.f32 %v331_v55, 0.0 }
  0xa1   : > { %v336_v62 = vmax.f32 %v318_v58, 0.0  ;;  %v338_v63 = vmax.f32 %v323_v59, 0.0 }
  0xa2   : > { %v347_v0 = vpack.c.bf16 %v339_v60, %v339_v60  ;;  %v349_v1 = vpack.c.bf16 %v341_v61, %v341_v61 }
  0xa3   : > { %v344_v2 = vpack.c.bf16 %v336_v62, %v336_v62  ;;  %v346_v3 = vpack.c.bf16 %v338_v63, %v338_v63 }
  0xa4   : > { %356 = vst.msk [vmem:[%s544_s10 + $0x10] sm:$0xf] %vm351_vm1, %v347_v0 }
  0xa5   : > { %358 = vst.msk [vmem:[%s544_s10 + $0x18] sm:$0xf] %vm351_vm1, %v349_v1  ;;  %v327_v4 = vpop.f32.mrf.mxu2  ;;  %v332_v5 = vpop.f32.mrf.mxu3 }
  0xa6   : > { %353 = vst.msk [vmem:[%s544_s10 + $0x4] sm:$0xf] %vm351_vm1, %v344_v2  ;;  %v328_v6 = vadd.f32 %v468_v43, %v327_v4  ;;  %v333_v7 = vadd.f32 %v468_v43, %v332_v5 }
  0xa7   : > { %355 = vst.msk [vmem:[%s544_s10 + $0xc] sm:$0xf] %vm351_vm1, %v346_v3 }
  0xa8   : > { %v340_v8 = vmax.f32 %v328_v6, 0.0  ;;  %v342_v9 = vmax.f32 %v333_v7, 0.0 }
  0xaa   : > { %v348_v10 = vpack.c.bf16 %v340_v8, %v340_v8  ;;  %v350_v11 = vpack.c.bf16 %v342_v9, %v342_v9 }
  0xac   : > { %357 = vst.msk [vmem:[%s544_s10 + $0x14] sm:$0xf] %vm351_vm1, %v348_v10 }
  0xad   : > { %359 = vst.msk [vmem:[%s544_s10 + $0x1c] sm:$0xf] %vm351_vm1, %v350_v11 }
  0xae PF: > { %s15_s18 = sadd.s32 1, %s475_s18  }
  0xaf   : > { %p12_p4 = scmp.ge.s32.totalorder %s15_s18, 4  }
  0xb1   :  { %14 = sbr.rel (!%p12_p4) target bundleno = 1 (0x1), region = 70 }

// kernel: densenet_forward.14
= control target key start
LH: loop header
LB: loop body
LE: loop exit
PB: predicated region body
PF: predicated region fallthrough
CT: control target
= control target key end

     0   :  { %s1058_s6 = smov 0   ;;  %s1060_s7 = smov 0   ;;  %s1399_s0 = inlined_call_operand.vmem [shape: bf16[9,128,16], index: 0, kind: input, shape index: {}]   ;;  %s1400_s1 = inlined_call_operand.vmem [shape: bf16[128,16], index: 1, kind: output, shape index: {}]  }
   0x1   :  { %s1062_s8 = smov 0  }
   0x2 LB: > { %s807_s9 = sadd.s32 4294967295, %s1046_s8   ;;  %s1075_s10 = sadd.s32 1, %s1046_s8   ;;  %s1046_s8 = sphi %s1062_s8, %s1403_s8   ;;  %s1042_s7 = sphi %s1060_s7, %s1402_s7   ;;  %s1038_s6 = sphi %s1058_s6, %s1401_s6  }
   0x3   : > { %s15_s11 = ssub.s32 %s1046_s8, %s1075_s10  ;;  %s18_s12 = sadd.s32 1, %s1042_s7 }
   0x4   : > { %p16_p0 = scmp.eq.s32.totalorder %s15_s11, 0  ;;  %p25_p1 = scmp.ne.s32.totalorder %s1042_s7, %s1038_s6 }
   0x5   : > { %p26_p2 = scmp.eq.s32.totalorder %s1046_s8, 0  ;;  %p810_p4 = scmp.ge.s32.totalorder %s1046_s8, 2 }
   0x6   : > { %s1084_s13 = scalar_select %p16_p0, %s1042_s7, %s18_s12  }
   0x7   : > { %p27_p3 = por %p26_p2, %p25_p1  ;;  %77 = sbr.rel (%p810_p4) target bundleno = 52 (0x34), region = 16 }
   0xc   : > { %80 = sbr.rel (!%p27_p3) target bundleno = 52 (0x34), region = 20  ;;  %s82_s14 = sand.u32 (%p27_p3), 1, %s1042_s7  }
   0xd   : > { %s818_s15 = sshll.u32 (%p27_p3), %s1046_s8, 5  ;;  %s998_s16 = smul.u32 (%p27_p3), 288, %s82_s14 }
   0xe   : > { %s1092_s19 = scalar_lea.vmem (%p27_p3), %s1399_s0, %s818_s15 }
   0xf   : > { %v104_v0 = vld [vmem:[%s1092_s19] sm:$0xff] (%p27_p3)   ;;  %v108_v1 = vld [vmem:[%s1092_s19 + $0x8] sm:$0xff] (%p27_p3)   ;;  %v112_v2 = vld [vmem:[%s1092_s19 + $0x10] sm:$0xff] (%p27_p3)   ;;  %s1097_s20 = scalar_lea.vmem (%p27_p3), [#allocation2], %s998_s16 }
  0x10   : > { %105 = vst [vmem:[%s1097_s20] sm:$0xff] (%p27_p3), %v104_v0   ;;  %v116_v3 = vld [vmem:[%s1092_s19 + $0x18] sm:$0xff] (%p27_p3)   ;;  %v120_v4 = vld [vmem:[%s1092_s19 + $0x40] sm:$0xff] (%p27_p3)   ;;  %v124_v5 = vld [vmem:[%s1092_s19 + $0x48] sm:$0xff] (%p27_p3)  }
  0x11   : > { %109 = vst [vmem:[%s1097_s20 + $0x8] sm:$0xff] %v108_v1   ;;  %v128_v6 = vld [vmem:[%s1092_s19 + $0x50] sm:$0xff]   ;;  %v132_v7 = vld [vmem:[%s1092_s19 + $0x58] sm:$0xff]   ;;  %v136_v8 = vld [vmem:[%s1092_s19 + $0x80] sm:$0xff]  }
  0x12   : > { %113 = vst [vmem:[%s1097_s20 + $0x10] sm:$0xff] %v112_v2   ;;  %v140_v9 = vld [vmem:[%s1092_s19 + $0x88] sm:$0xff]   ;;  %v144_v10 = vld [vmem:[%s1092_s19 + $0x90] sm:$0xff]   ;;  %v148_v11 = vld [vmem:[%s1092_s19 + $0x98] sm:$0xff]  }
  0x13   : > { %117 = vst [vmem:[%s1097_s20 + $0x18] sm:$0xff] %v116_v3   ;;  %v152_v12 = vld [vmem:[%s1092_s19 + $0xc0] sm:$0xff]   ;;  %v156_v13 = vld [vmem:[%s1092_s19 + $0xc8] sm:$0xff]   ;;  %v160_v14 = vld [vmem:[%s1092_s19 + $0xd0] sm:$0xff]  }
  0x14   : > { %121 = vst [vmem:[%s1097_s20 + $0x20] sm:$0xff] %v120_v4   ;;  %v164_v15 = vld [vmem:[%s1092_s19 + $0xd8] sm:$0xff]   ;;  %v168_v16 = vld [vmem:[%s1092_s19 + $0x100] sm:$0xff]   ;;  %v172_v17 = vld [vmem:[%s1092_s19 + $0x108] sm:$0xff]  }
  0x15   : > { %125 = vst [vmem:[%s1097_s20 + $0x28] sm:$0xff] %v124_v5   ;;  %v176_v18 = vld [vmem:[%s1092_s19 + $0x110] sm:$0xff]   ;;  %v180_v19 = vld [vmem:[%s1092_s19 + $0x118] sm:$0xff]   ;;  %v184_v20 = vld [vmem:[%s1092_s19 + $0x140] sm:$0xff]  }
  0x16   : > { %129 = vst [vmem:[%s1097_s20 + $0x30] sm:$0xff] %v128_v6   ;;  %v188_v21 = vld [vmem:[%s1092_s19 + $0x148] sm:$0xff]   ;;  %v192_v22 = vld [vmem:[%s1092_s19 + $0x150] sm:$0xff]   ;;  %v196_v23 = vld [vmem:[%s1092_s19 + $0x158] sm:$0xff]  }
  0x17   : > { %133 = vst [vmem:[%s1097_s20 + $0x38] sm:$0xff] %v132_v7   ;;  %v200_v24 = vld [vmem:[%s1092_s19 + $0x180] sm:$0xff]   ;;  %v204_v25 = vld [vmem:[%s1092_s19 + $0x188] sm:$0xff]   ;;  %v208_v26 = vld [vmem:[%s1092_s19 + $0x190] sm:$0xff]  }
  0x18   : > { %137 = vst [vmem:[%s1097_s20 + $0x40] sm:$0xff] %v136_v8   ;;  %v212_v27 = vld [vmem:[%s1092_s19 + $0x198] sm:$0xff]   ;;  %v216_v28 = vld [vmem:[%s1092_s19 + $0x1c0] sm:$0xff]   ;;  %v220_v29 = vld [vmem:[%s1092_s19 + $0x1c8] sm:$0xff]  }
  0x19   : > { %141 = vst [vmem:[%s1097_s20 + $0x48] sm:$0xff] %v140_v9   ;;  %v224_v30 = vld [vmem:[%s1092_s19 + $0x1d0] sm:$0xff]   ;;  %v228_v31 = vld [vmem:[%s1092_s19 + $0x1d8] sm:$0xff]   ;;  %v232_v32 = vld [vmem:[%s1092_s19 + $0x200] sm:$0xff]  }
  0x1a   : > { %145 = vst [vmem:[%s1097_s20 + $0x50] sm:$0xff] %v144_v10   ;;  %v236_v33 = vld [vmem:[%s1092_s19 + $0x208] sm:$0xff]   ;;  %v240_v34 = vld [vmem:[%s1092_s19 + $0x210] sm:$0xff]   ;;  %v244_v35 = vld [vmem:[%s1092_s19 + $0x218] sm:$0xff]  }
  0x1b   : > { %149 = vst [vmem:[%s1097_s20 + $0x58] sm:$0xff] %v148_v11  }
  0x1c   : > { %153 = vst [vmem:[%s1097_s20 + $0x60] sm:$0xff] %v152_v12  }
  0x1d   : > { %157 = vst [vmem:[%s1097_s20 + $0x68] sm:$0xff] %v156_v13  }
  0x1e   : > { %161 = vst [vmem:[%s1097_s20 + $0x70] sm:$0xff] %v160_v14  }
  0x1f   : > { %165 = vst [vmem:[%s1097_s20 + $0x78] sm:$0xff] %v164_v15  }
  0x20   : > { %169 = vst [vmem:[%s1097_s20 + $0x80] sm:$0xff] %v168_v16  }
  0x21   : > { %173 = vst [vmem:[%s1097_s20 + $0x88] sm:$0xff] %v172_v17  }
  0x22   : > { %177 = vst [vmem:[%s1097_s20 + $0x90] sm:$0xff] %v176_v18  }
  0x23   : > { %181 = vst [vmem:[%s1097_s20 + $0x98] sm:$0xff] %v180_v19  }
  0x24   : > { %185 = vst [vmem:[%s1097_s20 + $0xa0] sm:$0xff] %v184_v20  }
  0x25   : > { %189 = vst [vmem:[%s1097_s20 + $0xa8] sm:$0xff] %v188_v21  }
  0x26   : > { %193 = vst [vmem:[%s1097_s20 + $0xb0] sm:$0xff] %v192_v22  }
  0x27   : > { %197 = vst [vmem:[%s1097_s20 + $0xb8] sm:$0xff] %v196_v23  }
  0x28   : > { %201 = vst [vmem:[%s1097_s20 + $0xc0] sm:$0xff] %v200_v24  }
  0x29   : > { %205 = vst [vmem:[%s1097_s20 + $0xc8] sm:$0xff] %v204_v25  }
  0x2a   : > { %209 = vst [vmem:[%s1097_s20 + $0xd0] sm:$0xff] %v208_v26  }
  0x2b   : > { %213 = vst [vmem:[%s1097_s20 + $0xd8] sm:$0xff] %v212_v27  }
  0x2c   : > { %217 = vst [vmem:[%s1097_s20 + $0xe0] sm:$0xff] %v216_v28  }
  0x2d   : > { %221 = vst [vmem:[%s1097_s20 + $0xe8] sm:$0xff] %v220_v29  }
  0x2e   : > { %225 = vst [vmem:[%s1097_s20 + $0xf0] sm:$0xff] %v224_v30  }
  0x2f   : > { %229 = vst [vmem:[%s1097_s20 + $0xf8] sm:$0xff] %v228_v31  }
  0x30   : > { %233 = vst [vmem:[%s1097_s20 + $0x100] sm:$0xff] %v232_v32  }
  0x31   : > { %237 = vst [vmem:[%s1097_s20 + $0x108] sm:$0xff] %v236_v33  }
  0x32   : > { %241 = vst [vmem:[%s1097_s20 + $0x110] sm:$0xff] %v240_v34  }
  0x33   : > { %245 = vst [vmem:[%s1097_s20 + $0x118] sm:$0xff] %v244_v35  }
  0x34 PF: > { %p813_p5 = scmp.ge.s32.totalorder %s1046_s8, 1  ;;  %p414_p6 = scmp.lt.s32.totalorder %s1046_s8, 3 }
  0x36   : > { %p415_p7 = pnand %p813_p5, %p414_p6 }
  0x37   : > { %s421_s21 = sand.u32 (!%p415_p7), 1, %s1038_s6   ;;  %s1195_s24 = sshll.u32 (!%p415_p7), %s807_s9, 3 }
  0x38   : > { %418 = sbr.rel (%p415_p7) target bundleno = 128 (0x80), region = 61  ;;  %p442_p8 = scmp.lt.s32.totalorder (!%p415_p7), %s1195_s24, 15 }
  0x39   : > { %s999_s22 = smul.u32 (!%p415_p7), 288, %s421_s21 }
  0x3b   : > { %s1171_s23 = scalar_lea.vmem (!%p415_p7), [#allocation2], %s999_s22 }
  0x3d   : > { %v820_v36 = vld [vmem:[%s1171_s23] sm:$0xff]   ;;  %vm591_vm0 = vcmask 130048   ;;  %v1205_v6 = vld [vmem:[%s1171_s23 + $0x8] sm:$0xff]   ;;  %vm736_vm1 = vcmask 125952   ;;  %s1405_s24 = smov (!%p442_p8, %s1195_s24), 15 }
  0x3e   : > { %v966_v37 = vld [vmem:[%s1171_s23 + $0x20] sm:$0xff]   ;;  %v821_v39 = vunpack.c.l.bf16 %v820_v36  ;;  %v822_v54 = vunpack.c.h.bf16 %v820_v36  ;;  %v1208_v7 = vld [vmem:[%s1171_s23 + $0x28] sm:$0xff]   ;;  %v825_v20 = vunpack.c.l.bf16 %v1205_v6  ;;  %s815_s25 = sshll.u32 %s1405_s24, 2 }
  0x3f   : > { %v970_v38 = vld [vmem:[%s1171_s23 + $0x40] sm:$0xff]   ;;  %v837_v40 = vunpack.c.l.bf16 %v966_v37  ;;  %v838_v55 = vunpack.c.h.bf16 %v966_v37  ;;  %v1213_v12 = vld [vmem:[%s1171_s23 + $0x48] sm:$0xff]   ;;  %v841_v21 = vunpack.c.l.bf16 %v1208_v7  ;;  %s1269_s28 = scalar_lea.vmem %s1400_s1, %s815_s25 }
  0x40   : > { %v853_v41 = vunpack.c.l.bf16 %v970_v38  ;;  %v974_v42 = vld [vmem:[%s1171_s23 + $0x60] sm:$0xff]   ;;  %v592_v51 = vsel %vm591_vm0, %v821_v39, -inf  ;;  %v854_v61 = vunpack.c.h.bf16 %v970_v38  ;;  %v609_v3 = vsel %vm591_vm0, %v822_v54, -inf  ;;  %v1216_v13 = vld [vmem:[%s1171_s23 + $0x68] sm:$0xff]  }
  0x41   : > { %v978_v43 = vld [vmem:[%s1171_s23 + $0x80] sm:$0xff]   ;;  %v869_v45 = vunpack.c.l.bf16 %v974_v42  ;;  %v593_v52 = vsel %vm591_vm0, %v837_v40, -inf  ;;  %v870_v62 = vunpack.c.h.bf16 %v974_v42  ;;  %v610_v4 = vsel %vm591_vm0, %v838_v55, -inf  ;;  %v1225_v22 = vld [vmem:[%s1171_s23 + $0x88] sm:$0xff]  }
  0x42   : > { %v982_v44 = vld [vmem:[%s1171_s23 + $0xa0] sm:$0xff]   ;;  %v885_v48 = vunpack.c.l.bf16 %v978_v43  ;;  %v595_v53 = vsel %vm591_vm0, %v853_v41, -inf  ;;  %v594_v58 = vmax.f32 %v592_v51, %v593_v52  ;;  %v886_v2 = vunpack.c.h.bf16 %v978_v43  ;;  %v1239_v31 = vld [vmem:[%s1171_s23 + $0xa8] sm:$0xff]  }
  0x43   : > { %v1180_v46 = vld [vmem:[%s1171_s23 + $0xc0] sm:$0xff]   ;;  %v901_v49 = vunpack.c.l.bf16 %v982_v44  ;;  %v597_v60 = vsel %vm591_vm0, %v869_v45, -inf  ;;  %v612_v5 = vsel %vm591_vm0, %v854_v61, -inf  ;;  %v902_v10 = vunpack.c.h.bf16 %v982_v44  ;;  %v1242_v32 = vld [vmem:[%s1171_s23 + $0xc8] sm:$0xff]  }
  0x44   : > { %v1183_v47 = vld [vmem:[%s1171_s23 + $0xe0] sm:$0xff]   ;;  %v917_v56 = vunpack.c.l.bf16 %v1180_v46  ;;  %v596_v63 = vmax.f32 %v594_v58, %v595_v53  ;;  %v599_v0 = vsel %vm591_vm0, %v885_v48, -inf  ;;  %v611_v11 = vmax.f32 %v609_v3, %v610_v4  ;;  %v1246_v34 = vld [vmem:[%s1171_s23 + $0xe8] sm:$0xff]   ;;  %v1277_v3 = vld [vmem:[%s1171_s23 + $0x10] sm:$0xff]  }
  0x45   : > { %v1186_v50 = vld [vmem:[%s1171_s23 + $0x100] sm:$0xff]   ;;  %v933_v57 = vunpack.c.l.bf16 %v1183_v47  ;;  %v601_v1 = vsel %vm591_vm0, %v901_v49, -inf  ;;  %v918_v16 = vunpack.c.h.bf16 %v1180_v46  ;;  %v614_v17 = vsel %vm591_vm0, %v870_v62, -inf  ;;  %v1259_v49 = vld [vmem:[%s1171_s23 + $0x108] sm:$0xff]  }
  0x46   : > { %v949_v59 = vunpack.c.l.bf16 %v1186_v50  ;;  %v598_v8 = vmax.f32 %v596_v63, %v597_v60  ;;  %v603_v9 = vsel %vm591_vm0, %v917_v56, -inf  ;;  %v613_v19 = vmax.f32 %v611_v11, %v612_v5 }
  0x47   : > { %v605_v14 = vsel %vm591_vm0, %v933_v57, -inf  ;;  %v934_v23 = vunpack.c.h.bf16 %v1183_v47  ;;  %v616_v24 = vsel %vm591_vm0, %v886_v2, -inf  ;;  %v857_v25 = vunpack.c.l.bf16 %v1213_v12 }
  0x48   : > { %v607_v15 = vsel %vm591_vm0, %v949_v59, -inf  ;;  %v600_v18 = vmax.f32 %v598_v8, %v599_v0  ;;  %v873_v26 = vunpack.c.l.bf16 %v1216_v13  ;;  %v950_v28 = vunpack.c.h.bf16 %v1186_v50  ;;  %v968_v8 = vld [vmem:[%s1171_s23 + $0x30] sm:$0xff]  }
  0x49   : > { %v615_v29 = vmax.f32 %v613_v19, %v614_v17  ;;  %v618_v30 = vsel %vm591_vm0, %v902_v10, -inf  ;;  %v889_v33 = vunpack.c.l.bf16 %v1225_v22  ;;  %v626_v35 = vsel %vm591_vm0, %v825_v20, -inf }
  0x4a   : > { %v602_v27 = vmax.f32 %v600_v18, %v601_v1  ;;  %v627_v36 = vsel %vm591_vm0, %v841_v21, -inf  ;;  %v629_v37 = vsel %vm591_vm0, %v857_v25, -inf  ;;  %v620_v40 = vsel %vm591_vm0, %v918_v16, -inf }
  0x4b   : > { %v617_v39 = vmax.f32 %v615_v29, %v616_v24  ;;  %v628_v41 = vmax.f32 %v626_v35, %v627_v36  ;;  %v622_v42 = vsel %vm591_vm0, %v934_v23, -inf  ;;  %v905_v43 = vunpack.c.l.bf16 %v1239_v31  ;;  %v1296_v23 = vld [vmem:[%s1171_s23 + $0x90] sm:$0xff]  }
  0x4c   : > { %v604_v38 = vmax.f32 %v602_v27, %v603_v9  ;;  %v921_v44 = vunpack.c.l.bf16 %v1242_v32  ;;  %v631_v45 = vsel %vm591_vm0, %v873_v26, -inf  ;;  %v937_v48 = vunpack.c.l.bf16 %v1246_v34 }
  0x4d   : > { %v619_v47 = vmax.f32 %v617_v39, %v618_v30  ;;  %v630_v50 = vmax.f32 %v628_v41, %v629_v37  ;;  %v633_v51 = vsel %vm591_vm0, %v889_v33, -inf  ;;  %v826_v52 = vunpack.c.h.bf16 %v1205_v6  ;;  %v1309_v33 = vld [vmem:[%s1171_s23 + $0xd0] sm:$0xff]  }
  0x4e   : > { %v606_v46 = vmax.f32 %v604_v38, %v605_v14  ;;  %v842_v53 = vunpack.c.h.bf16 %v1208_v7  ;;  %v858_v54 = vunpack.c.h.bf16 %v1213_v12  ;;  %v624_v57 = vsel %vm591_vm0, %v950_v28, -inf  ;;  %v1289_v14 = vld [vmem:[%s1171_s23 + $0x70] sm:$0xff]  }
  0x4f   : > { %v621_v56 = vmax.f32 %v619_v47, %v620_v40  ;;  %v632_v58 = vmax.f32 %v630_v50, %v631_v45  ;;  %v953_v59 = vunpack.c.l.bf16 %v1259_v49  ;;  %v635_v60 = vsel %vm591_vm0, %v905_v43, -inf }
  0x50   : > { %v608_v55 = vmax.f32 %v606_v46, %v607_v15  ;;  %v637_v61 = vsel %vm591_vm0, %v921_v44, -inf  ;;  %v874_v62 = vunpack.c.h.bf16 %v1216_v13  ;;  %v643_v2 = vsel %vm591_vm0, %v826_v52, -inf  ;;  %v972_v13 = vld [vmem:[%s1171_s23 + $0x50] sm:$0xff]  }
  0x51   : > { %v623_v0 = vmax.f32 %v621_v56, %v622_v42  ;;  %v634_v1 = vmax.f32 %v632_v58, %v633_v51  ;;  %v639_v4 = vsel %vm591_vm0, %v937_v48, -inf  ;;  %v890_v5 = vunpack.c.h.bf16 %v1225_v22  ;;  %v1329_v56 = vld [vmem:[%s1171_s23 + $0x110] sm:$0xff]  }
  0x52   : > { %v728_v63 = vpack.c.bf16 %v608_v55, %v608_v55  ;;  %v644_v6 = vsel %vm591_vm0, %v842_v53, -inf  ;;  %v646_v7 = vsel %vm591_vm0, %v858_v54, -inf  ;;  %v906_v11 = vunpack.c.h.bf16 %v1239_v31 }
  0x53   : > { %v625_v9 = vmax.f32 %v623_v0, %v624_v57  ;;  %v636_v10 = vmax.f32 %v634_v1, %v635_v60  ;;  %v645_v12 = vmax.f32 %v643_v2, %v644_v6  ;;  %v641_v15 = vsel %vm591_vm0, %v953_v59, -inf }
  0x54   : > { %737 = vst.msk [vmem:[%s1269_s28] sm:$0xf] %vm736_vm1, %v728_v63  ;;  %v922_v16 = vunpack.c.h.bf16 %v1242_v32  ;;  %v648_v17 = vsel %vm591_vm0, %v874_v62, -inf  ;;  %v829_v18 = vunpack.c.l.bf16 %v1277_v3  ;;  %v845_v22 = vunpack.c.l.bf16 %v968_v8  ;;  %v1306_v32 = vld [vmem:[%s1171_s23 + $0xb0] sm:$0xff]  }
  0x55   : > { %v729_v19 = vpack.c.bf16 %v625_v9, %v625_v9  ;;  %v638_v20 = vmax.f32 %v636_v10, %v637_v61  ;;  %v647_v21 = vmax.f32 %v645_v12, %v646_v7  ;;  %v938_v24 = vunpack.c.h.bf16 %v1246_v34  ;;  %v1313_v34 = vld [vmem:[%s1171_s23 + $0xf0] sm:$0xff]   ;;  %v973_v9 = vld [vmem:[%s1171_s23 + $0x58] sm:$0xff]  }
  0x56   : > { %v650_v25 = vsel %vm591_vm0, %v890_v5, -inf  ;;  %v861_v26 = vunpack.c.l.bf16 %v972_v13  ;;  %v877_v27 = vunpack.c.l.bf16 %v1289_v14  ;;  %v954_v29 = vunpack.c.h.bf16 %v1259_v49 }
  0x57   : > { %738 = vst.msk [vmem:[%s1269_s28 + $0x4] sm:$0xf] %vm736_vm1, %v729_v19  ;;  %v640_v28 = vmax.f32 %v638_v20, %v639_v4  ;;  %v649_v30 = vmax.f32 %v647_v21, %v648_v17  ;;  %v652_v31 = vsel %vm591_vm0, %v906_v11, -inf  ;;  %v893_v35 = vunpack.c.l.bf16 %v1296_v23  ;;  %v969_v4 = vld [vmem:[%s1171_s23 + $0x38] sm:$0xff]  }
  0x58   : > { %v660_v36 = vsel %vm591_vm0, %v829_v18, -inf  ;;  %v661_v37 = vsel %vm591_vm0, %v845_v22, -inf  ;;  %v663_v38 = vsel %vm591_vm0, %v861_v26, -inf  ;;  %v654_v41 = vsel %vm591_vm0, %v922_v16, -inf }
  0x59   : > { %v642_v39 = vmax.f32 %v640_v28, %v641_v15  ;;  %v651_v40 = vmax.f32 %v649_v30, %v650_v25  ;;  %v662_v42 = vmax.f32 %v660_v36, %v661_v37  ;;  %v656_v43 = vsel %vm591_vm0, %v938_v24, -inf  ;;  %v985_v28 = vld [vmem:[%s1171_s23 + $0xb8] sm:$0xff]  }
  0x5a   : > { %v909_v44 = vunpack.c.l.bf16 %v1306_v32  ;;  %v925_v45 = vunpack.c.l.bf16 %v1309_v33  ;;  %v665_v46 = vsel %vm591_vm0, %v877_v27, -inf  ;;  %v941_v49 = vunpack.c.l.bf16 %v1313_v34 }
  0x5b   : > { %v730_v47 = vpack.c.bf16 %v642_v39, %v642_v39  ;;  %v653_v48 = vmax.f32 %v651_v40, %v652_v31  ;;  %v664_v50 = vmax.f32 %v662_v42, %v663_v38  ;;  %v667_v51 = vsel %vm591_vm0, %v893_v35, -inf }
  0x5c   : > { %v830_v52 = vunpack.c.h.bf16 %v1277_v3  ;;  %v846_v53 = vunpack.c.h.bf16 %v968_v8  ;;  %v862_v54 = vunpack.c.h.bf16 %v972_v13  ;;  %v878_v58 = vunpack.c.h.bf16 %v1289_v14  ;;  %v965_v3 = vld [vmem:[%s1171_s23 + $0x18] sm:$0xff]  }
  0x5d   : > { %739 = vst.msk [vmem:[%s1269_s28 + $0x8] sm:$0xf] %vm736_vm1, %v730_v47  ;;  %v655_v55 = vmax.f32 %v653_v48, %v654_v41  ;;  %v666_v57 = vmax.f32 %v664_v50, %v665_v46  ;;  %v658_v59 = vsel %vm591_vm0, %v954_v29, -inf  ;;  %v669_v60 = vsel %vm591_vm0, %v909_v44, -inf  ;;  %v977_v14 = vld [vmem:[%s1171_s23 + $0x78] sm:$0xff]  }
  0x5e   : > { %v894_v61 = vunpack.c.h.bf16 %v1296_v23  ;;  %v677_v62 = vsel %vm591_vm0, %v830_v52, -inf  ;;  %v678_v1 = vsel %vm591_vm0, %v846_v53, -inf  ;;  %v680_v2 = vsel %vm591_vm0, %v862_v54, -inf  ;;  %v981_v23 = vld [vmem:[%s1171_s23 + $0x98] sm:$0xff]  }
  0x5f   : > { %v657_v63 = vmax.f32 %v655_v55, %v656_v43  ;;  %v668_v0 = vmax.f32 %v666_v57, %v667_v51  ;;  %v957_v5 = vunpack.c.l.bf16 %v1329_v56  ;;  %v671_v6 = vsel %vm591_vm0, %v925_v45, -inf  ;;  %v993_v45 = vld [vmem:[%s1171_s23 + $0xf8] sm:$0xff]  }
  0x60   : > { %v673_v7 = vsel %vm591_vm0, %v941_v49, -inf  ;;  %v679_v8 = vmax.f32 %v677_v62, %v678_v1  ;;  %v910_v12 = vunpack.c.h.bf16 %v1306_v32  ;;  %v682_v13 = vsel %vm591_vm0, %v878_v58, -inf  ;;  %v989_v32 = vld [vmem:[%s1171_s23 + $0xd8] sm:$0xff]  }
  0x61   : > { %v659_v10 = vmax.f32 %v657_v63, %v658_v59  ;;  %v670_v11 = vmax.f32 %v668_v0, %v669_v60  ;;  %v926_v15 = vunpack.c.h.bf16 %v1309_v33  ;;  %v833_v17 = vunpack.c.l.bf16 %v965_v3  ;;  %v997_v52 = vld [vmem:[%s1171_s23 + $0x118] sm:$0xff]  }
  0x62   : > { %v681_v16 = vmax.f32 %v679_v8, %v680_v2  ;;  %v849_v18 = vunpack.c.l.bf16 %v969_v4  ;;  %v684_v21 = vsel %vm591_vm0, %v894_v61, -inf  ;;  %v865_v22 = vunpack.c.l.bf16 %v973_v9 }
  0x63   : > { %v731_v19 = vpack.c.bf16 %v659_v10, %v659_v10  ;;  %v672_v20 = vmax.f32 %v670_v11, %v671_v6  ;;  %v675_v24 = vsel %vm591_vm0, %v957_v5, -inf  ;;  %v942_v25 = vunpack.c.h.bf16 %v1313_v34 }
  0x64   : > { %v683_v26 = vmax.f32 %v681_v16, %v682_v13  ;;  %v881_v27 = vunpack.c.l.bf16 %v977_v14  ;;  %v958_v30 = vunpack.c.h.bf16 %v1329_v56  ;;  %v686_v31 = vsel %vm591_vm0, %v910_v12, -inf }
  0x65   : > { %740 = vst.msk [vmem:[%s1269_s28 + $0xc] sm:$0xf] %vm736_vm1, %v731_v19  ;;  %v674_v29 = vmax.f32 %v672_v20, %v673_v7  ;;  %v694_v33 = vsel %vm591_vm0, %v833_v17, -inf  ;;  %v897_v36 = vunpack.c.l.bf16 %v981_v23  ;;  %v695_v37 = vsel %vm591_vm0, %v849_v18, -inf }
  0x66   : > { %v685_v35 = vmax.f32 %v683_v26, %v684_v21  ;;  %v697_v34 = vsel %vm591_vm0, %v865_v22, -inf  ;;  %v688_v39 = vsel %vm591_vm0, %v926_v15, -inf  ;;  %v913_v40 = vunpack.c.l.bf16 %v985_v28 }
  0x67   : > { %v676_v38 = vmax.f32 %v674_v29, %v675_v24  ;;  %v696_v41 = vmax.f32 %v694_v33, %v695_v37  ;;  %v690_v43 = vsel %vm591_vm0, %v942_v25, -inf  ;;  %v929_v44 = vunpack.c.l.bf16 %v989_v32 }
  0x68   : > { %v687_v42 = vmax.f32 %v685_v35, %v686_v31  ;;  %v699_v46 = vsel %vm591_vm0, %v881_v27, -inf  ;;  %v834_v49 = vunpack.c.h.bf16 %v965_v3  ;;  %v850_v50 = vunpack.c.h.bf16 %v969_v4 }
  0x69   : > { %v732_v47 = vpack.c.bf16 %v676_v38, %v676_v38  ;;  %v698_v48 = vmax.f32 %v696_v41, %v697_v34  ;;  %v701_v53 = vsel %vm591_vm0, %v897_v36, -inf  ;;  %v866_v54 = vunpack.c.h.bf16 %v973_v9 }
  0x6a   : > { %v689_v51 = vmax.f32 %v687_v42, %v688_v39  ;;  %v882_v55 = vunpack.c.h.bf16 %v977_v14  ;;  %v692_v56 = vsel %vm591_vm0, %v958_v30, -inf  ;;  %v945_v57 = vunpack.c.l.bf16 %v993_v45 }
  0x6b   : > { %741 = vst.msk [vmem:[%s1269_s28 + $0x10] sm:$0xf] %vm736_vm1, %v732_v47  ;;  %v700_v58 = vmax.f32 %v698_v48, %v699_v46  ;;  %v703_v59 = vsel %vm591_vm0, %v913_v40, -inf  ;;  %v898_v61 = vunpack.c.h.bf16 %v981_v23  ;;  %v711_v62 = vsel %vm591_vm0, %v834_v49, -inf }
  0x6c   : > { %v691_v60 = vmax.f32 %v689_v51, %v690_v43  ;;  %v712_v63 = vsel %vm591_vm0, %v850_v50, -inf  ;;  %v961_v0 = vunpack.c.l.bf16 %v997_v52  ;;  %v714_v3 = vsel %vm591_vm0, %v866_v54, -inf }
  0x6d   : > { %v702_v1 = vmax.f32 %v700_v58, %v701_v53  ;;  %v713_v2 = vmax.f32 %v711_v62, %v712_v63  ;;  %v705_v5 = vsel %vm591_vm0, %v929_v44, -inf  ;;  %v914_v6 = vunpack.c.h.bf16 %v985_v28 }
  0x6e   : > { %v693_v4 = vmax.f32 %v691_v60, %v692_v56  ;;  %v716_v7 = vsel %vm591_vm0, %v882_v55, -inf  ;;  %v707_v11 = vsel %vm591_vm0, %v945_v57, -inf  ;;  %v930_v12 = vunpack.c.h.bf16 %v989_v32 }
  0x6f   : > { %v704_v8 = vmax.f32 %v702_v1, %v703_v59  ;;  %v715_v9 = vmax.f32 %v713_v2, %v714_v3  ;;  %v718_v13 = vsel %vm591_vm0, %v898_v61, -inf  ;;  %v709_v16 = vsel %vm591_vm0, %v961_v0, -inf }
  0x70   : > { %v733_v10 = vpack.c.bf16 %v693_v4, %v693_v4  ;;  %v946_v17 = vunpack.c.h.bf16 %v993_v45  ;;  %v720_v18 = vsel %vm591_vm0, %v914_v6, -inf  ;;  %v962_v21 = vunpack.c.h.bf16 %v997_v52 }
  0x71   : > { %v706_v14 = vmax.f32 %v704_v8, %v705_v5  ;;  %v717_v15 = vmax.f32 %v715_v9, %v716_v7  ;;  %v722_v22 = vsel %vm591_vm0, %v930_v12, -inf }
  0x72   : > { %742 = vst.msk [vmem:[%s1269_s28 + $0x14] sm:$0xf] %vm736_vm1, %v733_v10  ;;  %v724_v25 = vsel %vm591_vm0, %v946_v17, -inf  ;;  %v726_v28 = vsel %vm591_vm0, %v962_v21, -inf }
  0x73   : > { %v708_v19 = vmax.f32 %v706_v14, %v707_v11  ;;  %v719_v20 = vmax.f32 %v717_v15, %v718_v13 }
  0x75   : > { %v710_v23 = vmax.f32 %v708_v19, %v709_v16  ;;  %v721_v24 = vmax.f32 %v719_v20, %v720_v18 }
  0x77   : > { %v734_v26 = vpack.c.bf16 %v710_v23, %v710_v23  ;;  %v723_v27 = vmax.f32 %v721_v24, %v722_v22 }
  0x79   : > { %743 = vst.msk [vmem:[%s1269_s28 + $0x18] sm:$0xf] %vm736_vm1, %v734_v26  ;;  %v725_v29 = vmax.f32 %v723_v27, %v724_v25 }
  0x7b   : > { %v727_v30 = vmax.f32 %v725_v29, %v726_v28 }
  0x7d   : > { %v735_v31 = vpack.c.bf16 %v727_v30, %v727_v30 }
  0x7f   : > { %744 = vst.msk [vmem:[%s1269_s28 + $0x1c] sm:$0xf] %vm736_vm1, %v735_v31 }
  0x80 PF: > { %p8_p9 = scmp.ge.s32.totalorder %s1075_s10, 4   ;;  %s1401_s6 = smov %s1042_s7 }
  0x81   : > { %s1402_s7 = smov %s1084_s13  ;;  %s1403_s8 = smov %s1075_s10 }
  0x82   :  { %10 = sbr.rel (!%p8_p9) target bundleno = 2 (0x2), region = 100 }

// kernel: squeeze.10
= control target key start
LH: loop header
LB: loop body
LE: loop exit
PB: predicated region body
PF: predicated region fallthrough
CT: control target
= control target key end

     0   :  { %vm124_vm0 = vcmask 1047556   ;;  %vm126_vm1 = vcmask 261120   ;;  %s165_s10 = smov 32   ;;  %vm136_vm2 = vcmask 785920   ;;  %vm146_vm3 = vcmask 523520   ;;  %s185_s0 = inlined_call_operand.vmem [shape: bf16[1,3,32,8], index: 0, kind: input, shape index: {}]   ;;  %s186_s1 = inlined_call_operand.vmem [shape: bf16[1,96,8], index: 1, kind: output, shape index: {}]  }
   0x1   :  { %v155_v0 = vld [vmem:[%s185_s0 + $0x8] sm:$0xff]   ;;  %v159_v1 = vld [vmem:[%s185_s0] sm:$0xff]   ;;  %s164_s0 = smov 64  }
   0x2   :  { %v15_v2 = vunpack.c.h.bf16 %v155_v0  ;;  %v45_v3 = vunpack.c.l.bf16 %v155_v0  ;;  %v75_v4 = vunpack.c.h.bf16 %v159_v1  ;;  %v105_v5 = vunpack.c.l.bf16 %v159_v1 }
   0x4   :  { %18 = vst [vmem:[#allocation1 + $0x34] sm:$0xf0] %v15_v2 }
   0x5   :  { %33 = vst [vmem:[#allocation1 + $0x30] sm:$0xf] %v15_v2 }
   0x6   :  { %48 = vst [vmem:[#allocation1 + $0x24] sm:$0xf0] %v45_v3 }
   0x7   :  { %63 = vst [vmem:[#allocation1 + $0x20] sm:$0xf] %v45_v3 }
   0x8   :  { %78 = vst [vmem:[#allocation1 + $0x14] sm:$0xf0] %v75_v4 }
   0x9   :  { %93 = vst [vmem:[#allocation1 + $0x10] sm:$0xf] %v75_v4 }
   0xa   :  { %108 = vst [vmem:[#allocation1 + $0x4] sm:$0xf0] %v105_v5 }
   0xb   :  { %121 = vst [vmem:[#allocation1] sm:$0xf] %v105_v5 }
   0xe   :  { %v131_v6 = vld [vmem:[#allocation1 + $0x2] ss:$8 sm:$0xf0]   ;;  %v123_v7 = vld [vmem:[#allocation1] ss:$8 sm:$0xf0]  }
   0xf   :  { %v141_v13 = vld [vmem:[#allocation1 + $0x1] ss:$8 sm:$0xf0]  }
  0x12   :  { %v122_v8 = vld [vmem:[#allocation1] ss:$8 sm:$0xf]   ;;  %v129_v9 = vld [vmem:[#allocation1 + $0x2] ss:$8 sm:$0xf]  }
  0x13   :  { %v133_v10 = vsel %vm124_vm0, %v131_v6, %v129_v9  ;;  %v125_v11 = vsel %vm124_vm0, %v123_v7, %v122_v8  ;;  %v139_v12 = vld [vmem:[#allocation1 + $0x1] ss:$8 sm:$0xf]  }
  0x14   :  { %134 = vrot.lane.b32.xlu0 %v133_v10, %s164_s0  ;;  %127 = vst.msk [vmem:[#allocation0] sm:$0xff] %vm126_vm1, %v125_v11   ;;  %v143_v14 = vsel %vm124_vm0, %v141_v13, %v139_v12 }
  0x1c   :  { %144 = vrot.lane.b32.xlu0 %v143_v14, %s165_s10 }
  0x86   :  { %v135_v15 = vpop.permute.xlu0 %134  }
  0x87   :  { %137 = vst.msk [vmem:[#allocation0] sm:$0xff] %vm136_vm2, %v135_v15  }
  0x8e   :  { %v145_v16 = vpop.permute.xlu0 %144  }
  0x8f   :  { %147 = vst.msk [vmem:[#allocation0] sm:$0xff] %vm146_vm3, %v145_v16  }
  0x96   :  { %v150_v17 = vld [vmem:[#allocation0] sm:$0xff] }
  0x97   :  { %v151_v18 = vpack.c.bf16 0.0, %v150_v17 }
  0x99   :  { %154 = vst [vmem:[%s186_s1] sm:$0xf] %v151_v18 }

// kernel: densenet_forward.16
= control target key start
LH: loop header
LB: loop body
LE: loop exit
PB: predicated region body
PF: predicated region fallthrough
CT: control target
= control target key end

     0   :  { %s1136_s9 = smov 0   ;;  %s1311_s0 = inlined_call_operand.vmem [shape: bf16[2,10,16,96], index: 0, kind: input, shape index: {}]   ;;  %s1312_s1 = inlined_call_operand.vmem [shape: bf16[3,96,8], index: 1, kind: input, shape index: {}]   ;;  %s1313_s2 = inlined_call_operand.vmem [shape: bf16[2,128,8], index: 2, kind: output, shape index: {}]  }
   0x1 LB: > { %s785_s10 = sadd.s32 4294967295, %s1119_s9   ;;  %p789_p0 = scmp.ge.s32.totalorder %s1119_s9, 1  ;;  %s1119_s9 = sphi %s1136_s9, %s12_s9  }
   0x2   : > { %p112_p1 = scmp.lt.s32.totalorder %s1119_s9, 3 }
   0x4   : > { %p113_p2 = pnand %p789_p0, %p112_p1 }
   0x5   : > { %p134_p3 = scmp.lt.s32.totalorder (!%p113_p2), %s785_s10, 1 }
   0x6   : > { %116 = sbr.rel (%p113_p2) target bundleno = 262 (0x106), region = 28 }
   0xb   : > { %v1071_v0 = vld [vmem:[%s1312_s1 + $0x58] sm:$0xff]  ;;  %v1057_v1 = vld [vmem:[%s1312_s1 + $0x28] sm:$0xff]  ;;  %v1070_v3 = vld [vmem:[%s1312_s1 + $0x50] sm:$0xff]  ;;  %s1315_s10 = smov (!%p134_p3, %s785_s10), 1  ;;  %vm279_vm0 = vcmask 785408   ;;  %vm713_vm1 = vcmask 60416  }
   0xc   : > { %v1153_v2 = vld [vmem:[%s1312_s1 + $0x88] sm:$0xff]  ;;  %306 = vmatpush.bf16.msra.mxu0 %v1071_v0  ;;  %1086 = vmatpush.bf16.msra.mxu3 %v1071_v0  ;;  %v1056_v4 = vld [vmem:[%s1312_s1 + $0x20] sm:$0xff]  ;;  %v1055_v7 = vld [vmem:[%s1312_s1 + $0x18] sm:$0xff]  ;;  %s1104_s11 = smul.u32 80, %s1315_s10  ;;  %s1043_s25 = sshll.u32 %s1315_s10, 6 }
   0xd   : > { %455 = vmatpush.bf16.msra.mxu1 %v1057_v1  ;;  %634 = vmatpush.bf16.msra.mxu2 %v1153_v2  ;;  %v1084_v5 = vld [vmem:[%s1312_s1 + $0x80] sm:$0xff]  ;;  %v1069_v6 = vld [vmem:[%s1312_s1 + $0x48] sm:$0xff]  ;;  %v1083_v8 = vld [vmem:[%s1312_s1 + $0x78] sm:$0xff]  ;;  %s1264_s28 = scalar_lea.vmem %s1313_s2, %s1043_s25 }
   0xe   : > { %v1068_v9 = vld [vmem:[%s1312_s1 + $0x40] sm:$0xff]  ;;  %v1054_v10 = vld [vmem:[%s1312_s1 + $0x10] sm:$0xff]  ;;  %v1067_v12 = vld [vmem:[%s1312_s1 + $0x38] sm:$0xff]  ;;  %s1201_s20 = scalar_lea.vmem %s1311_s0, %s1104_s11 }
   0xf   : > { %v1082_v11 = vld [vmem:[%s1312_s1 + $0x70] sm:$0xff]  ;;  %v1053_v13 = vld [vmem:[%s1312_s1 + $0x8] sm:$0xff]  ;;  %v1052_v16 = vld [vmem:[%s1312_s1] sm:$0xff] }
  0x10   : > { %307 = vmatpush.bf16.msra.mxu0 %v1070_v3  ;;  %1087 = vmatpush.bf16.msra.mxu3 %v1070_v3  ;;  %v1081_v14 = vld [vmem:[%s1312_s1 + $0x68] sm:$0xff]  ;;  %v1066_v15 = vld [vmem:[%s1312_s1 + $0x30] sm:$0xff]  ;;  %v1080_v17 = vld [vmem:[%s1312_s1 + $0x60] sm:$0xff] }
  0x11   : > { %456 = vmatpush.bf16.msra.mxu1 %v1056_v4  ;;  %635 = vmatpush.bf16.msra.mxu2 %v1084_v5  ;;  %v1058_v18 = vld [vmem:[%s1201_s20 + $0x8] sm:$0xff]  ;;  %v1064_v19 = vld [vmem:[%s1201_s20 + $0x38] sm:$0xff]  ;;  %v1044_v20 = vld [vmem:[%s1201_s20] sm:$0xff] }
  0x12   : > { %v1072_v21 = vld [vmem:[%s1201_s20 + $0x10] sm:$0xff]  ;;  %v1065_v23 = vld [vmem:[%s1201_s20 + $0x40] sm:$0xff]  ;;  %v1045_v24 = vld [vmem:[%s1201_s20 + $0x8] sm:$0xff] }
  0x13   : > { %v1059_v22 = vld [vmem:[%s1201_s20 + $0x10] sm:$0xff]  ;;  %v1073_v25 = vld [vmem:[%s1201_s20 + $0x18] sm:$0xff]  ;;  %v1074_v29 = vld [vmem:[%s1201_s20 + $0x20] sm:$0xff] }
  0x14   : > { %308 = vmatpush.bf16.msra.mxu0 %v1069_v6  ;;  %1088 = vmatpush.bf16.msra.mxu3 %v1069_v6  ;;  %v1060_v26 = vld [vmem:[%s1201_s20 + $0x18] sm:$0xff]  ;;  %v1050_v27 = vld [vmem:[%s1201_s20 + $0x30] sm:$0xff]  ;;  %v1061_v30 = vld [vmem:[%s1201_s20 + $0x20] sm:$0xff] }
  0x15   : > { %457 = vmatpush.bf16.msra.mxu1 %v1055_v7  ;;  %636 = vmatpush.bf16.msra.mxu2 %v1083_v8  ;;  %v1046_v28 = vld [vmem:[%s1201_s20 + $0x10] sm:$0xff]  ;;  %v1051_v31 = vld [vmem:[%s1201_s20 + $0x38] sm:$0xff]  ;;  %v1075_v33 = vld [vmem:[%s1201_s20 + $0x28] sm:$0xff] }
  0x16   : > { %v1047_v32 = vld [vmem:[%s1201_s20 + $0x18] sm:$0xff]  ;;  %v1062_v34 = vld [vmem:[%s1201_s20 + $0x28] sm:$0xff]  ;;  %v1078_v35 = vld [vmem:[%s1201_s20 + $0x40] sm:$0xff] }
  0x17   : > { %v1048_v36 = vld [vmem:[%s1201_s20 + $0x20] sm:$0xff]  ;;  %v1076_v37 = vld [vmem:[%s1201_s20 + $0x30] sm:$0xff]  ;;  %v1079_v39 = vld [vmem:[%s1201_s20 + $0x48] sm:$0xff] }
  0x18   : > { %309 = vmatpush.bf16.msra.mxu0 %v1068_v9  ;;  %1089 = vmatpush.bf16.msra.mxu3 %v1068_v9  ;;  %v1063_v38 = vld [vmem:[%s1201_s20 + $0x30] sm:$0xff]  ;;  %v1049_v40 = vld [vmem:[%s1201_s20 + $0x28] sm:$0xff]  ;;  %v1077_v41 = vld [vmem:[%s1201_s20 + $0x38] sm:$0xff] }
  0x19   : > { %458 = vmatpush.bf16.msra.mxu1 %v1054_v10  ;;  %637 = vmatpush.bf16.msra.mxu2 %v1082_v11 }
  0x1c   : > { %310 = vmatpush.bf16.msra.mxu0 %v1067_v12  ;;  %1090 = vmatpush.bf16.msra.mxu3 %v1067_v12 }
  0x1d   : > { %459 = vmatpush.bf16.msra.mxu1 %v1053_v13  ;;  %638 = vmatpush.bf16.msra.mxu2 %v1081_v14 }
  0x20   : > { %311 = vmatpush.bf16.msra.mxu0 %v1066_v15  ;;  %1091 = vmatpush.bf16.msra.mxu3 %v1066_v15 }
  0x21   : > { %460 = vmatpush.bf16.msra.mxu1 %v1052_v16  ;;  %639 = vmatpush.bf16.msra.mxu2 %v1080_v17 }
  0x23   : > { %877 = vmatmul.msk.bf16.vlgmr.msra.gmra.mxu0 %vm279_vm0, %v1058_v18  ;;  %883 = vmatmul.msk.bf16.vlgmr.msra.gmra.mxu3 %vm279_vm0, %v1064_v19 }
  0x24   : > { %1092 = vmatpush.bf16.msrb.mxu3 %v1057_v1  ;;  %941 = vmatmul.msk.bf16.vlgmr.msra.gmra.mxu1 %vm279_vm0, %v1044_v20 }
  0x25   : > { %1033 = vmatmul.msk.bf16.vlgmr.msra.gmra.mxu2 %vm279_vm0, %v1072_v21 }
  0x28   : > { %1093 = vmatpush.bf16.msrb.mxu3 %v1056_v4 }
  0x2c   : > { %1094 = vmatpush.bf16.msrb.mxu3 %v1055_v7 }
  0x30   : > { %1095 = vmatpush.bf16.msrb.mxu3 %v1054_v10 }
  0x33   : > { %878 = vmatmul.msk.bf16.gmra.mxu0 %vm279_vm0, %v1059_v22  ;;  %884 = vmatmul.msk.bf16.gmra.mxu3 %vm279_vm0, %v1065_v23 }
  0x34   : > { %1096 = vmatpush.bf16.msrb.mxu3 %v1053_v13  ;;  %942 = vmatmul.msk.bf16.gmra.mxu1 %vm279_vm0, %v1045_v24 }
  0x35   : > { %1034 = vmatmul.msk.bf16.gmra.mxu2 %vm279_vm0, %v1073_v25 }
  0x38   : > { %1097 = vmatpush.bf16.msrb.mxu3 %v1052_v16 }
  0x3c   : > { %1098 = vmatpush.bf16.msra.mxu3 %v1153_v2 }
  0x40   : > { %1099 = vmatpush.bf16.msra.mxu3 %v1084_v5 }
  0x43   : > { %879 = vmatmul.msk.bf16.gmra.mxu0 %vm279_vm0, %v1060_v26  ;;  %947 = vmatmul.msk.bf16.vlgmr.msrb.gmra.mxu3 %vm279_vm0, %v1050_v27 }
  0x44   : > { %1100 = vmatpush.bf16.msra.mxu3 %v1083_v8  ;;  %943 = vmatmul.msk.bf16.gmra.mxu1 %vm279_vm0, %v1046_v28 }
  0x45   : > { %1035 = vmatmul.msk.bf16.gmra.mxu2 %vm279_vm0, %v1074_v29 }
  0x48   : > { %1101 = vmatpush.bf16.msra.mxu3 %v1082_v11 }
  0x4c   : > { %1102 = vmatpush.bf16.msra.mxu3 %v1081_v14 }
  0x50   : > { %1103 = vmatpush.bf16.msra.mxu3 %v1080_v17 }
  0x53   : > { %880 = vmatmul.msk.bf16.gmra.mxu0 %vm279_vm0, %v1061_v30  ;;  %948 = vmatmul.msk.bf16.gmra.mxu3 %vm279_vm0, %v1051_v31 }
  0x54   : > { %944 = vmatmul.msk.bf16.gmra.mxu1 %vm279_vm0, %v1047_v32 }
  0x55   : > { %1036 = vmatmul.msk.bf16.gmra.mxu2 %vm279_vm0, %v1075_v33 }
  0x63   : > { %881 = vmatmul.msk.bf16.gmra.mxu0 %vm279_vm0, %v1062_v34  ;;  %1039 = vmatmul.msk.bf16.vlgmr.msra.gmra.mxu3 %vm279_vm0, %v1078_v35 }
  0x64   : > { %945 = vmatmul.msk.bf16.gmra.mxu1 %vm279_vm0, %v1048_v36 }
  0x65   : > { %1037 = vmatmul.msk.bf16.gmra.mxu2 %vm279_vm0, %v1076_v37 }
  0x73   : > { %882 = vmatmul.msk.bf16.gmra.mxu0 %vm279_vm0, %v1063_v38  ;;  %1040 = vmatmul.msk.bf16.gmra.mxu3 %vm279_vm0, %v1079_v39 }
  0x74   : > { %946 = vmatmul.msk.bf16.gmra.mxu1 %vm279_vm0, %v1049_v40 }
  0x75   : > { %1038 = vmatmul.msk.bf16.gmra.mxu2 %vm279_vm0, %v1077_v41 }
  0xa0   : > { %v313_v42 = vpop.f32.mrf.mxu0 }
  0xa1   : > { %v462_v43 = vpop.f32.mrf.mxu1 }
  0xa2   : > { %v463_v44 = vadd.f32 %v462_v43, %v313_v42 }
  0xa6   : > { %v1258_v45 = vpop.f32.mrf.mxu3 }
  0xa8   : > { %v641_v46 = vpop.f32.mrf.mxu2  ;;  %v315_v48 = vpop.f32.mrf.mxu0 }
  0xa9   : > { %v681_v47 = vadd.f32 %v641_v46, %v463_v44  ;;  %v464_v49 = vpop.f32.mrf.mxu1 }
  0xaa   : > { %v465_v51 = vadd.f32 %v464_v49, %v315_v48 }
  0xab   : > { %v697_v50 = vpack.c.bf16 %v681_v47, %v681_v47 }
  0xad   : > { %714 = vst.msk [vmem:[%s1264_s28] sm:$0xf] %vm713_vm1, %v697_v50 }
  0xae   : > { %v1268_v52 = vpop.f32.mrf.mxu3 }
  0xb0   : > { %v643_v53 = vpop.f32.mrf.mxu2  ;;  %v318_v55 = vpop.f32.mrf.mxu0 }
  0xb1   : > { %v682_v54 = vadd.f32 %v643_v53, %v465_v51  ;;  %v467_v56 = vpop.f32.mrf.mxu1 }
  0xb2   : > { %v468_v58 = vadd.f32 %v467_v56, %v318_v55 }
  0xb3   : > { %v698_v57 = vpack.c.bf16 %v682_v54, %v682_v54 }
  0xb5   : > { %715 = vst.msk [vmem:[%s1264_s28 + $0x4] sm:$0xf] %vm713_vm1, %v698_v57 }
  0xb6   : > { %v1272_v59 = vpop.f32.mrf.mxu3 }
  0xb8   : > { %v646_v60 = vpop.f32.mrf.mxu2  ;;  %v320_v62 = vpop.f32.mrf.mxu0 }
  0xb9   : > { %v683_v61 = vadd.f32 %v646_v60, %v468_v58  ;;  %v469_v63 = vpop.f32.mrf.mxu1 }
  0xba   : > { %v470_v1 = vadd.f32 %v469_v63, %v320_v62 }
  0xbb   : > { %v699_v0 = vpack.c.bf16 %v683_v61, %v683_v61 }
  0xbd   : > { %716 = vst.msk [vmem:[%s1264_s28 + $0x8] sm:$0xf] %vm713_vm1, %v699_v0 }
  0xbe   : > { %v1276_v2 = vpop.f32.mrf.mxu3 }
  0xc0   : > { %v648_v3 = vpop.f32.mrf.mxu2  ;;  %v323_v5 = vpop.f32.mrf.mxu0 }
  0xc1   : > { %v684_v4 = vadd.f32 %v648_v3, %v470_v1  ;;  %v472_v6 = vpop.f32.mrf.mxu1 }
  0xc2   : > { %v473_v8 = vadd.f32 %v472_v6, %v323_v5 }
  0xc3   : > { %v700_v7 = vpack.c.bf16 %v684_v4, %v684_v4 }
  0xc5   : > { %717 = vst.msk [vmem:[%s1264_s28 + $0xc] sm:$0xf] %vm713_vm1, %v700_v7 }
  0xc6   : > { %v492_v9 = vpop.f32.mrf.mxu3 }
  0xc7   : > { %v493_v37 = vadd.f32 %v492_v9, %v1258_v45 }
  0xc8   : > { %v651_v10 = vpop.f32.mrf.mxu2  ;;  %v325_v12 = vpop.f32.mrf.mxu0 }
  0xc9   : > { %v685_v11 = vadd.f32 %v651_v10, %v473_v8  ;;  %v474_v13 = vpop.f32.mrf.mxu1 }
  0xca   : > { %v475_v15 = vadd.f32 %v474_v13, %v325_v12 }
  0xcb   : > { %v701_v14 = vpack.c.bf16 %v685_v11, %v685_v11 }
  0xcd   : > { %718 = vst.msk [vmem:[%s1264_s28 + $0x10] sm:$0xf] %vm713_vm1, %v701_v14 }
  0xce   : > { %v494_v16 = vpop.f32.mrf.mxu3 }
  0xcf   : > { %v495_v47 = vadd.f32 %v494_v16, %v1268_v52 }
  0xd0   : > { %v653_v17 = vpop.f32.mrf.mxu2  ;;  %v328_v19 = vpop.f32.mrf.mxu0 }
  0xd1   : > { %v686_v18 = vadd.f32 %v653_v17, %v475_v15  ;;  %v477_v20 = vpop.f32.mrf.mxu1 }
  0xd2   : > { %v478_v22 = vadd.f32 %v477_v20, %v328_v19 }
  0xd3   : > { %v702_v21 = vpack.c.bf16 %v686_v18, %v686_v18 }
  0xd5   : > { %719 = vst.msk [vmem:[%s1264_s28 + $0x14] sm:$0xf] %vm713_vm1, %v702_v21 }
  0xd6   : > { %v497_v23 = vpop.f32.mrf.mxu3 }
  0xd7   : > { %v498_v58 = vadd.f32 %v497_v23, %v1272_v59 }
  0xd8   : > { %v656_v24 = vpop.f32.mrf.mxu2  ;;  %v330_v26 = vpop.f32.mrf.mxu0 }
  0xd9   : > { %v687_v25 = vadd.f32 %v656_v24, %v478_v22  ;;  %v479_v27 = vpop.f32.mrf.mxu1 }
  0xda   : > { %v480_v29 = vadd.f32 %v479_v27, %v330_v26 }
  0xdb   : > { %v703_v28 = vpack.c.bf16 %v687_v25, %v687_v25 }
  0xdd   : > { %720 = vst.msk [vmem:[%s1264_s28 + $0x18] sm:$0xf] %vm713_vm1, %v703_v28 }
  0xde   : > { %v499_v30 = vpop.f32.mrf.mxu3 }
  0xdf   : > { %v500_v4 = vadd.f32 %v499_v30, %v1276_v2 }
  0xe0   : > { %v658_v31 = vpop.f32.mrf.mxu2  ;;  %v333_v33 = vpop.f32.mrf.mxu0 }
  0xe1   : > { %v688_v32 = vadd.f32 %v658_v31, %v480_v29  ;;  %v482_v34 = vpop.f32.mrf.mxu1 }
  0xe2   : > { %v483_v36 = vadd.f32 %v482_v34, %v333_v33 }
  0xe3   : > { %v704_v35 = vpack.c.bf16 %v688_v32, %v688_v32 }
  0xe5   : > { %721 = vst.msk [vmem:[%s1264_s28 + $0x1c] sm:$0xf] %vm713_vm1, %v704_v35 }
  0xe6   : > { %v671_v38 = vpop.f32.mrf.mxu3 }
  0xe7   : > { %v693_v40 = vadd.f32 %v671_v38, %v493_v37 }
  0xe8   : > { %v661_v39 = vpop.f32.mrf.mxu2  ;;  %v335_v42 = vpop.f32.mrf.mxu0 }
  0xe9   : > { %v689_v41 = vadd.f32 %v661_v39, %v483_v36  ;;  %v709_v43 = vpack.c.bf16 %v693_v40, %v693_v40  ;;  %v484_v44 = vpop.f32.mrf.mxu1 }
  0xea   : > { %v485_v48 = vadd.f32 %v484_v44, %v335_v42 }
  0xeb   : > { %v705_v46 = vpack.c.bf16 %v689_v41, %v689_v41  ;;  %726 = vst.msk [vmem:[%s1264_s28 + $0x30] sm:$0xf] %vm713_vm1, %v709_v43 }
  0xed   : > { %722 = vst.msk [vmem:[%s1264_s28 + $0x20] sm:$0xf] %vm713_vm1, %v705_v46 }
  0xee   : > { %v673_v49 = vpop.f32.mrf.mxu3 }
  0xef   : > { %v694_v45 = vadd.f32 %v673_v49, %v495_v47 }
  0xf0   : > { %v663_v50 = vpop.f32.mrf.mxu2  ;;  %v338_v54 = vpop.f32.mrf.mxu0 }
  0xf1   : > { %v690_v51 = vadd.f32 %v663_v50, %v485_v48  ;;  %v710_v53 = vpack.c.bf16 %v694_v45, %v694_v45  ;;  %v487_v55 = vpop.f32.mrf.mxu1 }
  0xf2   : > { %v488_v57 = vadd.f32 %v487_v55, %v338_v54 }
  0xf3   : > { %v706_v56 = vpack.c.bf16 %v690_v51, %v690_v51  ;;  %727 = vst.msk [vmem:[%s1264_s28 + $0x34] sm:$0xf] %vm713_vm1, %v710_v53 }
  0xf5   : > { %723 = vst.msk [vmem:[%s1264_s28 + $0x24] sm:$0xf] %vm713_vm1, %v706_v56 }
  0xf6   : > { %v676_v60 = vpop.f32.mrf.mxu3 }
  0xf7   : > { %v695_v61 = vadd.f32 %v676_v60, %v498_v58 }
  0xf8   : > { %v666_v52 = vpop.f32.mrf.mxu2  ;;  %v340_v1 = vpop.f32.mrf.mxu0 }
  0xf9   : > { %v691_v62 = vadd.f32 %v666_v52, %v488_v57  ;;  %v711_v63 = vpack.c.bf16 %v695_v61, %v695_v61  ;;  %v489_v3 = vpop.f32.mrf.mxu1 }
  0xfa   : > { %v490_v5 = vadd.f32 %v489_v3, %v340_v1 }
  0xfb   : > { %v707_v0 = vpack.c.bf16 %v691_v62, %v691_v62  ;;  %728 = vst.msk [vmem:[%s1264_s28 + $0x38] sm:$0xf] %vm713_vm1, %v711_v63 }
  0xfd   : > { %724 = vst.msk [vmem:[%s1264_s28 + $0x28] sm:$0xf] %vm713_vm1, %v707_v0 }
  0xfe   : > { %v678_v6 = vpop.f32.mrf.mxu3 }
  0xff   : > { %v696_v59 = vadd.f32 %v678_v6, %v500_v4 }
 0x100   : > { %v668_v7 = vpop.f32.mrf.mxu2 }
 0x101   : > { %v692_v8 = vadd.f32 %v668_v7, %v490_v5  ;;  %v712_v9 = vpack.c.bf16 %v696_v59, %v696_v59 }
 0x103   : > { %v708_v10 = vpack.c.bf16 %v692_v8, %v692_v8  ;;  %729 = vst.msk [vmem:[%s1264_s28 + $0x3c] sm:$0xf] %vm713_vm1, %v712_v9 }
 0x105   : > { %725 = vst.msk [vmem:[%s1264_s28 + $0x2c] sm:$0xf] %vm713_vm1, %v708_v10 }
 0x106 PF: > { %s12_s9 = sadd.s32 1, %s1119_s9  }
 0x107   : > { %p9_p4 = scmp.ge.s32.totalorder %s12_s9, 4  }
 0x109   :  { %11 = sbr.rel (!%p9_p4) target bundleno = 1 (0x1), region = 62 }

// kernel: densenet_forward.17
= control target key start
LH: loop header
LB: loop body
LE: loop exit
PB: predicated region body
PF: predicated region fallthrough
CT: control target
= control target key end

     0   :  { %s802_s30 = smov 0   ;;  %s916_s0 = inlined_call_operand.vmem [shape: bf16[128,16], index: 0, kind: input, shape index: {}]   ;;  %s917_s1 = inlined_call_operand.vmem [shape: bf16[128,8], index: 1, kind: input, shape index: {}]   ;;  %s918_s2 = inlined_call_operand.vmem [shape: bf16[16,32], index: 2, kind: input, shape index: {}]   ;;  %s919_s3 = inlined_call_operand.vmem [shape: bf16[8,32], index: 3, kind: input, shape index: {}]   ;;  %s920_s4 = inlined_call_operand.vmem [shape: f32[1,16], index: 4, kind: input, shape index: {}]   ;;  %s921_s5 = inlined_call_operand.vmem [shape: f32[1,8], index: 5, kind: input, shape index: {}]   ;;  %s922_s6 = inlined_call_operand.vmem [shape: f32[1,16], index: 6, kind: input, shape index: {}]   ;;  %s923_s7 = inlined_call_operand.vmem [shape: f32[1,8], index: 7, kind: input, shape index: {}]   ;;  %s924_s8 = inlined_call_operand.vmem [shape: f32[1,32], index: 8, kind: input, shape index: {}]   ;;  %s925_s9 = inlined_call_operand.vmem [shape: bf16[128,32], index: 9, kind: output, shape index: {}]  }
   0x1 LB: > { %s665_s10 = sadd.s32 4294967295, %s750_s30   ;;  %p669_p0 = scmp.ge.s32.totalorder %s750_s30, 1  ;;  %s750_s30 = sphi %s802_s30, %s19_s30  }
   0x2   : > { %p299_p1 = scmp.lt.s32.totalorder %s750_s30, 3 }
   0x4   : > { %p300_p2 = pnand %p669_p0, %p299_p1 }
   0x5   : > { %s670_s15 = sshll.u32 (!%p300_p2), %s665_s10, 3 }
   0x6   : > { %303 = sbr.rel (%p300_p2) target bundleno = 191 (0xbf), region = 56  ;;  %p341_p3 = scmp.lt.s32.totalorder (!%p300_p2), %s670_s15, 15 }
   0xb   : > { %v465_v0 = vld [vmem:[%s919_s3] sm:$0xf]  ;;  %vm479_vm0 = vcmask 1043456   ;;  %s927_s15 = smov (!%p341_p3, %s670_s15), 15  ;;  %vm466_vm1 = vcmask 64512   ;;  %vm518_vm2 = vcmask 130048  }
   0xc   : > { %v690_v1 = vld [vmem:[%s918_s2] sm:$0xff]  ;;  %v481_v2 = vsel %vm479_vm0, %v465_v0, 0  ;;  %s816_s16 = sshll.u32 %s927_s15, 2  ;;  %vm588_vm3 = vcmask 257024  }
   0xd   : > { %490 = vmatpush.bf16.msra.mxu0 %v481_v2  ;;  %729 = vmatpush.bf16.msra.mxu2 %v481_v2  ;;  %s822_s19 = scalar_lea.vmem %s917_s1, %s816_s16  ;;  %v827_v3 = vld [vmem:[%s921_s5] ss:$0 sm:$0xff]  ;;  %s835_s24 = scalar_lea.vmem %s916_s0, %s816_s16 }
   0xe   : > { %538 = vmatpush.bf16.msra.mxu1 %v690_v1  ;;  %730 = vmatpush.bf16.msra.mxu3 %v690_v1  ;;  %v708_v4 = vld [vmem:[%s822_s19] sm:$0xff]   ;;  %v727_v5 = vld [vmem:[%s822_s19 + $0x10] sm:$0xff]   ;;  %v726_v35 = vld [vmem:[%s822_s19 + $0x8] sm:$0xff]   ;;  %s895_s15 = scalar_lea.vmem %s925_s9, %s816_s16 }
   0xf   : > { %v840_v6 = vld [vmem:[%s920_s4] ss:$0 sm:$0xff]  ;;  %v709_v7 = vunpack.c.l.bf16 %v708_v4  ;;  %v710_v8 = vunpack.c.h.bf16 %v708_v4  ;;  %v717_v10 = vunpack.c.l.bf16 %v727_v5  ;;  %v718_v11 = vunpack.c.h.bf16 %v727_v5  ;;  %v724_v13 = vld [vmem:[%s835_s24 + $0x10] sm:$0xff]   ;;  %v728_v40 = vld [vmem:[%s822_s19 + $0x18] sm:$0xff]  }
  0x10   : > { %v845_v9 = vld [vmem:[%s923_s7] ss:$0 sm:$0xff]  ;;  %v701_v17 = vunpack.c.l.bf16 %v724_v13  ;;  %v702_v18 = vunpack.c.h.bf16 %v724_v13  ;;  %v723_v45 = vld [vmem:[%s835_s24 + $0x8] sm:$0xff]   ;;  %v713_v48 = vunpack.c.l.bf16 %v726_v35  ;;  %v714_v49 = vunpack.c.h.bf16 %v726_v35  ;;  %v725_v50 = vld [vmem:[%s835_s24 + $0x18] sm:$0xff]  }
  0x11   : > { %v692_v12 = vld [vmem:[%s835_s24] sm:$0xff]   ;;  %v433_v19 = vmul.f32 %v827_v3, %v709_v7  ;;  %v434_v20 = vmul.f32 %v827_v3, %v710_v8  ;;  %v437_v21 = vmul.f32 %v827_v3, %v717_v10  ;;  %v438_v22 = vmul.f32 %v827_v3, %v718_v11 }
  0x12   : > { %v693_v14 = vunpack.c.l.bf16 %v692_v12  ;;  %v694_v15 = vunpack.c.h.bf16 %v692_v12  ;;  %v742_v16 = vld [vmem:[%s922_s6] ss:$0 sm:$0xff]  ;;  %v383_v25 = vmul.f32 %v840_v6, %v701_v17  ;;  %v384_v26 = vmul.f32 %v840_v6, %v702_v18 }
  0x13   : > { %v445_v27 = vadd.f32 %v845_v9, %v433_v19  ;;  %v446_v28 = vadd.f32 %v845_v9, %v434_v20  ;;  %v449_v29 = vadd.f32 %v845_v9, %v437_v21  ;;  %v450_v30 = vadd.f32 %v845_v9, %v438_v22 }
  0x14   : > { %v379_v23 = vmul.f32 %v840_v6, %v693_v14  ;;  %v380_v24 = vmul.f32 %v840_v6, %v694_v15  ;;  %v395_v33 = vadd.f32 %v742_v16, %v383_v25  ;;  %v396_v34 = vadd.f32 %v742_v16, %v384_v26 }
  0x15   : > { %v453_v36 = vmax.f32 %v445_v27, 0.0  ;;  %v454_v37 = vmax.f32 %v446_v28, 0.0  ;;  %v457_v38 = vmax.f32 %v449_v29, 0.0  ;;  %v458_v39 = vmax.f32 %v450_v30, 0.0 }
  0x16   : > { %v391_v31 = vadd.f32 %v742_v16, %v379_v23  ;;  %v392_v32 = vadd.f32 %v742_v16, %v380_v24  ;;  %v403_v43 = vmax.f32 %v395_v33, 0.0  ;;  %v404_v44 = vmax.f32 %v396_v34, 0.0 }
  0x17   : > { %v461_v46 = vpack.c.bf16 %v454_v37, %v453_v36  ;;  %v463_v47 = vpack.c.bf16 %v458_v39, %v457_v38  ;;  %v721_v53 = vunpack.c.l.bf16 %v728_v40  ;;  %v722_v54 = vunpack.c.h.bf16 %v728_v40 }
  0x18   : > { %v399_v41 = vmax.f32 %v391_v31, 0.0  ;;  %v400_v42 = vmax.f32 %v392_v32, 0.0  ;;  %v409_v52 = vpack.c.bf16 %v404_v44, %v403_v43  ;;  %v435_v55 = vmul.f32 %v827_v3, %v713_v48 }
  0x19   : > { %676 = vmatmul.msk.bf16.vlgmr.msra.gmra.mxu0 %vm466_vm1, %v461_v46  ;;  %678 = vmatmul.msk.bf16.vlgmr.msra.gmra.mxu2 %vm466_vm1, %v463_v47  ;;  %v436_v56 = vmul.f32 %v827_v3, %v714_v49  ;;  %v697_v57 = vunpack.c.l.bf16 %v723_v45  ;;  %v698_v58 = vunpack.c.h.bf16 %v723_v45  ;;  %v439_v59 = vmul.f32 %v827_v3, %v721_v53 }
  0x1a   : > { %v407_v51 = vpack.c.bf16 %v400_v42, %v399_v41  ;;  %686 = vmatmul.msk.bf16.vlgmr.msra.gmra.mxu3 %vm518_vm2, %v409_v52  ;;  %v440_v60 = vmul.f32 %v827_v3, %v722_v54  ;;  %v705_v61 = vunpack.c.l.bf16 %v725_v50  ;;  %v706_v62 = vunpack.c.h.bf16 %v725_v50 }
  0x1b   : > { %v381_v63 = vmul.f32 %v840_v6, %v697_v57  ;;  %v382_v0 = vmul.f32 %v840_v6, %v698_v58  ;;  %v447_v4 = vadd.f32 %v845_v9, %v435_v55  ;;  %v448_v5 = vadd.f32 %v845_v9, %v436_v56 }
  0x1c   : > { %684 = vmatmul.msk.bf16.vlgmr.msra.gmra.mxu1 %vm518_vm2, %v407_v51  ;;  %v385_v1 = vmul.f32 %v840_v6, %v705_v61  ;;  %v386_v2 = vmul.f32 %v840_v6, %v706_v62  ;;  %v451_v7 = vadd.f32 %v845_v9, %v439_v59  ;;  %v452_v8 = vadd.f32 %v845_v9, %v440_v60 }
  0x1d   : > { %v393_v10 = vadd.f32 %v742_v16, %v381_v63  ;;  %v394_v3 = vadd.f32 %v742_v16, %v382_v0  ;;  %v455_v13 = vmax.f32 %v447_v4, 0.0  ;;  %v456_v14 = vmax.f32 %v448_v5, 0.0 }
  0x1e   : > { %v397_v11 = vadd.f32 %v742_v16, %v385_v1  ;;  %v398_v12 = vadd.f32 %v742_v16, %v386_v2  ;;  %v459_v15 = vmax.f32 %v451_v7, 0.0  ;;  %v460_v17 = vmax.f32 %v452_v8, 0.0  ;;  %v743_v16 = vld [vmem:[%s924_s8] ss:$0 sm:$0xff] }
  0x1f   : > { %v401_v18 = vmax.f32 %v393_v10, 0.0  ;;  %v402_v19 = vmax.f32 %v394_v3, 0.0  ;;  %v462_v21 = vpack.c.bf16 %v456_v14, %v455_v13 }
  0x20   : > { %v405_v20 = vmax.f32 %v397_v11, 0.0  ;;  %v406_v6 = vmax.f32 %v398_v12, 0.0  ;;  %v464_v22 = vpack.c.bf16 %v460_v17, %v459_v15 }
  0x21   : > { %v408_v23 = vpack.c.bf16 %v402_v19, %v401_v18 }
  0x22   : > { %v410_v24 = vpack.c.bf16 %v406_v6, %v405_v20 }
  0x29   : > { %677 = vmatmul.msk.bf16.gmra.mxu0 %vm466_vm1, %v462_v21  ;;  %679 = vmatmul.msk.bf16.gmra.mxu2 %vm466_vm1, %v464_v22 }
  0x2a   : > { %687 = vmatmul.msk.bf16.gmra.mxu3 %vm518_vm2, %v410_v24 }
  0x2c   : > { %685 = vmatmul.msk.bf16.gmra.mxu1 %vm518_vm2, %v408_v23 }
  0x96   : > { %v492_v9 = vpop.f32.mrf.mxu0 }
  0x99   : > { %v540_v25 = vpop.f32.mrf.mxu1 }
  0x9a   : > { %v541_v26 = vadd.f32 %v540_v25, %v492_v9 }
  0x9c   : > { %v564_v27 = vadd.f32 %v743_v16, %v541_v26  ;;  %v502_v29 = vpop.f32.mrf.mxu2 }
  0x9d   : > { %v550_v30 = vpop.f32.mrf.mxu3 }
  0x9e   : > { %v572_v28 = vmax.f32 %v564_v27, 0.0  ;;  %v551_v32 = vadd.f32 %v550_v30, %v502_v29  ;;  %v494_v33 = vpop.f32.mrf.mxu0 }
  0xa0   : > { %v580_v31 = vpack.c.bf16 %v572_v28, %v572_v28  ;;  %v568_v35 = vadd.f32 %v743_v16, %v551_v32 }
  0xa1   : > { %v542_v34 = vpop.f32.mrf.mxu1 }
  0xa2   : > { %589 = vst.msk [vmem:[%s895_s15] sm:$0xf] %vm588_vm3, %v580_v31  ;;  %v543_v36 = vadd.f32 %v542_v34, %v494_v33  ;;  %v576_v37 = vmax.f32 %v568_v35, 0.0 }
  0xa4   : > { %v565_v38 = vadd.f32 %v743_v16, %v543_v36  ;;  %v584_v39 = vpack.c.bf16 %v576_v37, %v576_v37  ;;  %v504_v41 = vpop.f32.mrf.mxu2 }
  0xa5   : > { %v552_v42 = vpop.f32.mrf.mxu3 }
  0xa6   : > { %v573_v40 = vmax.f32 %v565_v38, 0.0  ;;  %593 = vst.msk [vmem:[%s895_s15 + $0x10] sm:$0xf] %vm588_vm3, %v584_v39  ;;  %v553_v44 = vadd.f32 %v552_v42, %v504_v41  ;;  %v497_v45 = vpop.f32.mrf.mxu0 }
  0xa8   : > { %v581_v43 = vpack.c.bf16 %v573_v40, %v573_v40  ;;  %v569_v47 = vadd.f32 %v743_v16, %v553_v44 }
  0xa9   : > { %v545_v46 = vpop.f32.mrf.mxu1 }
  0xaa   : > { %590 = vst.msk [vmem:[%s895_s15 + $0x4] sm:$0xf] %vm588_vm3, %v581_v43  ;;  %v546_v48 = vadd.f32 %v545_v46, %v497_v45  ;;  %v577_v49 = vmax.f32 %v569_v47, 0.0 }
  0xac   : > { %v566_v50 = vadd.f32 %v743_v16, %v546_v48  ;;  %v585_v51 = vpack.c.bf16 %v577_v49, %v577_v49  ;;  %v507_v53 = vpop.f32.mrf.mxu2 }
  0xad   : > { %v555_v54 = vpop.f32.mrf.mxu3 }
  0xae   : > { %v574_v52 = vmax.f32 %v566_v50, 0.0  ;;  %594 = vst.msk [vmem:[%s895_s15 + $0x14] sm:$0xf] %vm588_vm3, %v585_v51  ;;  %v556_v56 = vadd.f32 %v555_v54, %v507_v53  ;;  %v499_v57 = vpop.f32.mrf.mxu0 }
  0xb0   : > { %v582_v55 = vpack.c.bf16 %v574_v52, %v574_v52  ;;  %v570_v59 = vadd.f32 %v743_v16, %v556_v56 }
  0xb1   : > { %v547_v58 = vpop.f32.mrf.mxu1 }
  0xb2   : > { %591 = vst.msk [vmem:[%s895_s15 + $0x8] sm:$0xf] %vm588_vm3, %v582_v55  ;;  %v548_v60 = vadd.f32 %v547_v58, %v499_v57  ;;  %v578_v61 = vmax.f32 %v570_v59, 0.0 }
  0xb4   : > { %v567_v62 = vadd.f32 %v743_v16, %v548_v60  ;;  %v586_v63 = vpack.c.bf16 %v578_v61, %v578_v61  ;;  %v509_v1 = vpop.f32.mrf.mxu2 }
  0xb5   : > { %v557_v2 = vpop.f32.mrf.mxu3 }
  0xb6   : > { %v575_v0 = vmax.f32 %v567_v62, 0.0  ;;  %595 = vst.msk [vmem:[%s895_s15 + $0x18] sm:$0xf] %vm588_vm3, %v586_v63  ;;  %v558_v5 = vadd.f32 %v557_v2, %v509_v1 }
  0xb8   : > { %v583_v4 = vpack.c.bf16 %v575_v0, %v575_v0  ;;  %v571_v7 = vadd.f32 %v743_v16, %v558_v5 }
  0xba   : > { %592 = vst.msk [vmem:[%s895_s15 + $0xc] sm:$0xf] %vm588_vm3, %v583_v4  ;;  %v579_v8 = vmax.f32 %v571_v7, 0.0 }
  0xbc   : > { %v587_v10 = vpack.c.bf16 %v579_v8, %v579_v8 }
  0xbe   : > { %596 = vst.msk [vmem:[%s895_s15 + $0x1c] sm:$0xf] %vm588_vm3, %v587_v10 }
  0xbf PF: > { %s19_s30 = sadd.s32 1, %s750_s30  }
  0xc0   : > { %p16_p4 = scmp.ge.s32.totalorder %s19_s30, 4  }
  0xc2   :  { %18 = sbr.rel (!%p16_p4) target bundleno = 1 (0x1), region = 89 }

// kernel: densenet_forward.20
= control target key start
LH: loop header
LB: loop body
LE: loop exit
PB: predicated region body
PF: predicated region fallthrough
CT: control target
= control target key end

     0   :  { %s266_s6 = smov 0   ;;  %s287_s0 = inlined_call_operand.vmem [shape: bf16[2,4,2,4,16], index: 0, kind: input, shape index: {}]   ;;  %s288_s1 = inlined_call_operand.vmem [shape: bf16[2,4,4,8], index: 1, kind: output, shape index: {}]  }
   0x1 LB: > { %s225_s7 = sadd.s32 4294967295, %s253_s6   ;;  %p229_p0 = scmp.ge.s32.totalorder %s253_s6, 1  ;;  %s253_s6 = sphi %s266_s6, %s11_s6  }
   0x2   : > { %p87_p1 = scmp.lt.s32.totalorder %s253_s6, 3 }
   0x4   : > { %p88_p2 = pnand %p229_p0, %p87_p1 }
   0x5   : > { %p107_p3 = scmp.lt.s32.totalorder (!%p88_p2), %s225_s7, 1  ;;  %s255_s12 = smov (!%p88_p2), 120  }
   0x6   : > { %91 = sbr.rel (%p88_p2) target bundleno = 150 (0x96), region = 24 }
   0xb   : > { %s290_s7 = smov (!%p107_p3, %s225_s7), 1  ;;  %vm165_vm0 = vcmask 58368  }
   0xc   : > { %s236_s8 = sshll.u32 %s290_s7, 4  ;;  %s237_s13 = sshll.u32 %s290_s7, 3 }
   0xd   : > { %s111_s11 = scalar_lea.vmem %s287_s0, %s236_s8  ;;  %s116_s16 = scalar_lea.vmem %s288_s1, %s237_s13 }
   0xe   : > { %v121_v0 = vld [vmem:[%s111_s11 + $0x8] sm:$0x3]  ;;  %v122_v1 = vld [vmem:[%s111_s11 + $0xa] sm:$0x3]  ;;  %v117_v2 = vld [vmem:[%s111_s11] sm:$0x3] }
   0xf   : > { %v129_v3 = vunpack.c.l.bf16 %v121_v0  ;;  %v130_v4 = vunpack.c.l.bf16 %v122_v1  ;;  %v118_v5 = vld [vmem:[%s111_s11 + $0x2] sm:$0x3]  ;;  %v125_v6 = vunpack.c.l.bf16 %v117_v2  ;;  %v123_v8 = vld [vmem:[%s111_s11 + $0xc] sm:$0x3]  ;;  %v124_v9 = vld [vmem:[%s111_s11 + $0xe] sm:$0x3] }
  0x10   : > { %v126_v7 = vunpack.c.l.bf16 %v118_v5  ;;  %v119_v11 = vld [vmem:[%s111_s11 + $0x4] sm:$0x3]  ;;  %v120_v12 = vld [vmem:[%s111_s11 + $0x6] sm:$0x3]  ;;  %v131_v14 = vunpack.c.l.bf16 %v123_v8  ;;  %v132_v15 = vunpack.c.l.bf16 %v124_v9 }
  0x11   : > { %v135_v10 = vadd.f32 %v130_v4, %v129_v3  ;;  %v127_v16 = vunpack.c.l.bf16 %v119_v11  ;;  %v128_v17 = vunpack.c.l.bf16 %v120_v12 }
  0x12   : > { %v133_v13 = vadd.f32 %v126_v7, %v125_v6  ;;  %v136_v18 = vadd.f32 %v132_v15, %v131_v14 }
  0x13   : > { %145 = vrot.lane.b32.xlu1 %v135_v10, %s255_s12  ;;  %v134_v19 = vadd.f32 %v128_v17, %v127_v16 }
  0x14   : > { %141 = vrot.lane.b32.xlu0 %v133_v13, %s255_s12 }
  0x1b   : > { %147 = vrot.lane.b32.xlu1 %v136_v18, %s255_s12 }
  0x1c   : > { %143 = vrot.lane.b32.xlu0 %v134_v19, %s255_s12 }
  0x85   : > { %v146_v20 = vpop.permute.xlu1 %145 }
  0x86   : > { %v155_v21 = vadd.f32 %v146_v20, %v135_v10  ;;  %v142_v22 = vpop.permute.xlu0 %141 }
  0x87   : > { %v153_v23 = vadd.f32 %v142_v22, %v133_v13 }
  0x88   : > { %v159_v24 = vmul.f32 0.25, %v155_v21 }
  0x89   : > { %v157_v25 = vmul.f32 0.25, %v153_v23 }
  0x8a   : > { %v163_v26 = vpack.c.bf16 %v159_v24, %v159_v24 }
  0x8b   : > { %v161_v27 = vpack.c.bf16 %v157_v25, %v157_v25 }
  0x8c   : > { %168 = vst.msk [vmem:[%s116_s16 + $0x4] sm:$0x3] %vm165_vm0, %v163_v26 }
  0x8d   : > { %166 = vst.msk [vmem:[%s116_s16] sm:$0x3] %vm165_vm0, %v161_v27  ;;  %v148_v28 = vpop.permute.xlu1 %147 }
  0x8e   : > { %v156_v29 = vadd.f32 %v148_v28, %v136_v18  ;;  %v144_v30 = vpop.permute.xlu0 %143 }
  0x8f   : > { %v154_v31 = vadd.f32 %v144_v30, %v134_v19 }
  0x90   : > { %v160_v32 = vmul.f32 0.25, %v156_v29 }
  0x91   : > { %v158_v33 = vmul.f32 0.25, %v154_v31 }
  0x92   : > { %v164_v34 = vpack.c.bf16 %v160_v32, %v160_v32 }
  0x93   : > { %v162_v35 = vpack.c.bf16 %v158_v33, %v158_v33 }
  0x94   : > { %169 = vst.msk [vmem:[%s116_s16 + $0x6] sm:$0x3] %vm165_vm0, %v164_v34 }
  0x95   : > { %167 = vst.msk [vmem:[%s116_s16 + $0x2] sm:$0x3] %vm165_vm0, %v162_v35 }
  0x96 PF: > { %s11_s6 = sadd.s32 1, %s253_s6  }
  0x97   : > { %p8_p4 = scmp.ge.s32.totalorder %s11_s6, 4  }
  0x99   :  { %10 = sbr.rel (!%p8_p4) target bundleno = 1 (0x1), region = 54 }

// kernel: densenet_forward.19
= control target key start
LH: loop header
LB: loop body
LE: loop exit
PB: predicated region body
PF: predicated region fallthrough
CT: control target
= control target key end

     0   :  { %s1044_s21 = smov 0   ;;  %s1212_s0 = inlined_call_operand.vmem [shape: bf16[128,16], index: 0, kind: input, shape index: {}]   ;;  %s1213_s1 = inlined_call_operand.vmem [shape: bf16[128,8], index: 1, kind: input, shape index: {}]   ;;  %s1214_s2 = inlined_call_operand.vmem [shape: bf16[128,8], index: 2, kind: input, shape index: {}]   ;;  %s1215_s3 = inlined_call_operand.vmem [shape: bf16[16,8], index: 3, kind: input, shape index: {}]   ;;  %s1216_s4 = inlined_call_operand.vmem [shape: bf16[8,8], index: 4, kind: input, shape index: {}]   ;;  %s1217_s5 = inlined_call_operand.vmem [shape: bf16[8,8], index: 5, kind: input, shape index: {}]   ;;  %s1218_s6 = inlined_call_operand.vmem [shape: f32[1,16], index: 6, kind: input, shape index: {}]   ;;  %s1219_s7 = inlined_call_operand.vmem [shape: f32[1,8], index: 7, kind: input, shape index: {}]   ;;  %s1220_s8 = inlined_call_operand.vmem [shape: f32[1,8], index: 8, kind: input, shape index: {}]   ;;  %s1221_s9 = inlined_call_operand.vmem [shape: f32[1,16], index: 9, kind: input, shape index: {}]   ;;  %s1222_s10 = inlined_call_operand.vmem [shape: f32[1,8], index: 10, kind: input, shape index: {}]   ;;  %s1223_s11 = inlined_call_operand.vmem [shape: f32[1,8], index: 11, kind: input, shape index: {}]   ;;  %s1224_s12 = inlined_call_operand.vmem [shape: bf16[128,8], index: 12, kind: output, shape index: {}]  }
   0x1 LB: > { %s865_s22 = sadd.s32 4294967295, %s977_s21   ;;  %p869_p0 = scmp.ge.s32.totalorder %s977_s21, 1  ;;  %s977_s21 = sphi %s1044_s21, %s22_s21  }
   0x2   : > { %p385_p1 = scmp.lt.s32.totalorder %s977_s21, 3 }
   0x4   : > { %p386_p2 = pnand %p869_p0, %p385_p1 }
   0x5   : > { %s870_s29 = sshll.u32 (!%p386_p2), %s865_s22, 3 }
   0x6   : > { %389 = sbr.rel (%p386_p2) target bundleno = 204 (0xcc), region = 68  ;;  %p438_p3 = scmp.lt.s32.totalorder (!%p386_p2), %s870_s29, 15 }
   0xb   : > { %v568_v0 = vld [vmem:[%s1216_s4] sm:$0xf]  ;;  %vm582_vm0 = vcmask 1043456   ;;  %s1226_s29 = smov (!%p438_p3, %s870_s29), 15  ;;  %vm569_vm1 = vcmask 64512   ;;  %vm621_vm2 = vcmask 130048  }
   0xc   : > { %v896_v1 = vld [vmem:[%s1215_s3] sm:$0xff]  ;;  %v584_v3 = vsel %vm582_vm0, %v568_v0, 0  ;;  %s1064_s30 = sshll.u32 %s1226_s29, 2  ;;  %vm776_vm3 = vcmask 60416  }
   0xd   : > { %v715_v2 = vld [vmem:[%s1217_s5] sm:$0xf]  ;;  %593 = vmatpush.bf16.msra.mxu0 %v584_v3  ;;  %954 = vmatpush.bf16.msra.mxu3 %v584_v3  ;;  %s1070_s15 = scalar_lea.vmem %s1213_s1, %s1064_s30  ;;  %s1081_s20 = scalar_lea.vmem %s1212_s0, %s1064_s30 }
   0xe   : > { %v1061_v4 = vsel %vm582_vm0, %v715_v2, 0  ;;  %955 = vmatpush.bf16.msra.mxu1 %v896_v1  ;;  %v1075_v5 = vld [vmem:[%s1219_s7] ss:$0 sm:$0xff]  ;;  %v948_v9 = vld [vmem:[%s1070_s15 + $0x8] sm:$0xff]   ;;  %s1100_s28 = scalar_lea.vmem %s1214_s2, %s1064_s30  ;;  %v949_v39 = vld [vmem:[%s1070_s15 + $0x10] sm:$0xff]  }
   0xf   : > { %956 = vmatpush.bf16.msra.mxu2 %v1061_v4  ;;  %v1086_v6 = vld [vmem:[%s1218_s6] ss:$0 sm:$0xff]  ;;  %v945_v10 = vld [vmem:[%s1081_s20 + $0x8] sm:$0xff]   ;;  %v919_v14 = vunpack.c.l.bf16 %v948_v9  ;;  %v920_v15 = vunpack.c.h.bf16 %v948_v9  ;;  %v946_v49 = vld [vmem:[%s1081_s20 + $0x10] sm:$0xff]   ;;  %v923_v52 = vunpack.c.l.bf16 %v949_v39  ;;  %v924_v53 = vunpack.c.h.bf16 %v949_v39 }
  0x10   : > { %v1091_v7 = vld [vmem:[%s1220_s8] ss:$0 sm:$0xff]  ;;  %v951_v16 = vld [vmem:[%s1100_s28 + $0x8] sm:$0xff]   ;;  %v903_v17 = vunpack.c.l.bf16 %v945_v10  ;;  %v904_v18 = vunpack.c.h.bf16 %v945_v10  ;;  %v952_v54 = vld [vmem:[%s1100_s28 + $0x10] sm:$0xff]   ;;  %v907_v61 = vunpack.c.l.bf16 %v946_v49  ;;  %v908_v62 = vunpack.c.h.bf16 %v946_v49 }
  0x11   : > { %641 = vmatpush.bf16.msrb.mxu0 %v896_v1  ;;  %v914_v8 = vld [vmem:[%s1070_s15] sm:$0xff]   ;;  %v935_v20 = vunpack.c.l.bf16 %v951_v16  ;;  %v936_v21 = vunpack.c.h.bf16 %v951_v16  ;;  %v538_v25 = vmul.f32 %v1075_v5, %v919_v14  ;;  %v539_v26 = vmul.f32 %v1075_v5, %v920_v15 }
  0x12   : > { %v915_v11 = vunpack.c.l.bf16 %v914_v8  ;;  %v916_v12 = vunpack.c.h.bf16 %v914_v8  ;;  %v1105_v13 = vld [vmem:[%s1222_s10] ss:$0 sm:$0xff]  ;;  %v484_v27 = vmul.f32 %v1086_v6, %v903_v17  ;;  %v485_v28 = vmul.f32 %v1086_v6, %v904_v18 }
  0x13   : > { %v1111_v19 = vld [vmem:[%s1221_s9] ss:$0 sm:$0xff]  ;;  %v685_v29 = vmul.f32 %v1091_v7, %v935_v20  ;;  %v686_v30 = vmul.f32 %v1091_v7, %v936_v21  ;;  %v550_v33 = vadd.f32 %v1105_v13, %v538_v25  ;;  %v551_v34 = vadd.f32 %v1105_v13, %v539_v26 }
  0x14   : > { %v1116_v22 = vld [vmem:[%s1223_s11] ss:$0 sm:$0xff]  ;;  %v536_v23 = vmul.f32 %v1075_v5, %v915_v11  ;;  %v537_v24 = vmul.f32 %v1075_v5, %v916_v12  ;;  %v496_v35 = vadd.f32 %v1111_v19, %v484_v27  ;;  %v497_v36 = vadd.f32 %v1111_v19, %v485_v28  ;;  %v950_v27 = vld [vmem:[%s1070_s15 + $0x18] sm:$0xff]  }
  0x15   : > { %v697_v37 = vadd.f32 %v1116_v22, %v685_v29  ;;  %v698_v38 = vadd.f32 %v1116_v22, %v686_v30  ;;  %v558_v42 = vmax.f32 %v550_v33, 0.0  ;;  %v559_v43 = vmax.f32 %v551_v34, 0.0  ;;  %v898_v44 = vld [vmem:[%s1081_s20] sm:$0xff]   ;;  %v947_v30 = vld [vmem:[%s1081_s20 + $0x18] sm:$0xff]   ;;  %s1191_s20 = scalar_lea.vmem %s1224_s12, %s1064_s30 }
  0x16   : > { %v548_v31 = vadd.f32 %v1105_v13, %v536_v23  ;;  %v549_v32 = vadd.f32 %v1105_v13, %v537_v24  ;;  %v504_v45 = vmax.f32 %v496_v35, 0.0  ;;  %v505_v46 = vmax.f32 %v497_v36, 0.0 }
  0x17   : > { %v705_v47 = vmax.f32 %v697_v37, 0.0  ;;  %v706_v48 = vmax.f32 %v698_v38, 0.0  ;;  %v565_v51 = vpack.c.bf16 %v559_v43, %v558_v42  ;;  %v899_v57 = vunpack.c.l.bf16 %v898_v44 }
  0x18   : > { %v556_v40 = vmax.f32 %v548_v31, 0.0  ;;  %v557_v41 = vmax.f32 %v549_v32, 0.0  ;;  %v511_v55 = vpack.c.bf16 %v505_v46, %v504_v45  ;;  %v900_v58 = vunpack.c.h.bf16 %v898_v44  ;;  %v930_v31 = vld [vmem:[%s1100_s28] sm:$0xff]   ;;  %v953_v32 = vld [vmem:[%s1100_s28 + $0x18] sm:$0xff]  }
  0x19   : > { %v712_v56 = vpack.c.bf16 %v706_v48, %v705_v47  ;;  %879 = vmatmul.msk.bf16.vlgmr.msra.gmra.mxu3 %vm569_vm1, %v565_v51  ;;  %v540_v59 = vmul.f32 %v1075_v5, %v923_v52  ;;  %v541_v60 = vmul.f32 %v1075_v5, %v924_v53  ;;  %v482_v63 = vmul.f32 %v1086_v6, %v899_v57 }
  0x1a   : > { %v564_v50 = vpack.c.bf16 %v557_v41, %v556_v40  ;;  %887 = vmatmul.msk.bf16.vlgmr.msra.gmra.mxu1 %vm621_vm2, %v511_v55  ;;  %v483_v0 = vmul.f32 %v1086_v6, %v900_v58  ;;  %v939_v1 = vunpack.c.l.bf16 %v952_v54  ;;  %v940_v2 = vunpack.c.h.bf16 %v952_v54 }
  0x1b   : > { %891 = vmatmul.msk.bf16.vlgmr.msra.gmra.mxu2 %vm569_vm1, %v712_v56  ;;  %v552_v3 = vadd.f32 %v1105_v13, %v540_v59  ;;  %v553_v8 = vadd.f32 %v1105_v13, %v541_v60  ;;  %v486_v9 = vmul.f32 %v1086_v6, %v907_v61  ;;  %v487_v10 = vmul.f32 %v1086_v6, %v908_v62 }
  0x1c   : > { %878 = vmatmul.msk.bf16.vlgmr.msra.gmra.mxu0 %vm569_vm1, %v564_v50  ;;  %v494_v11 = vadd.f32 %v1111_v19, %v482_v63  ;;  %v495_v12 = vadd.f32 %v1111_v19, %v483_v0  ;;  %v687_v14 = vmul.f32 %v1091_v7, %v939_v1  ;;  %v688_v15 = vmul.f32 %v1091_v7, %v940_v2 }
  0x1d   : > { %738 = vmatpush.bf16.msra.mxu0 %v1061_v4  ;;  %v498_v16 = vadd.f32 %v1111_v19, %v486_v9  ;;  %v499_v17 = vadd.f32 %v1111_v19, %v487_v10  ;;  %v560_v4 = vmax.f32 %v552_v3, 0.0  ;;  %v561_v21 = vmax.f32 %v553_v8, 0.0 }
  0x1e   : > { %v699_v18 = vadd.f32 %v1116_v22, %v687_v14  ;;  %v700_v20 = vadd.f32 %v1116_v22, %v688_v15  ;;  %v502_v23 = vmax.f32 %v494_v11, 0.0  ;;  %v503_v24 = vmax.f32 %v495_v12, 0.0 }
  0x1f   : > { %v506_v25 = vmax.f32 %v498_v16, 0.0  ;;  %v507_v26 = vmax.f32 %v499_v17, 0.0  ;;  %v566_v33 = vpack.c.bf16 %v561_v21, %v560_v4  ;;  %v927_v35 = vunpack.c.l.bf16 %v950_v27 }
  0x20   : > { %v707_v28 = vmax.f32 %v699_v18, 0.0  ;;  %v708_v29 = vmax.f32 %v700_v20, 0.0  ;;  %v510_v34 = vpack.c.bf16 %v503_v24, %v502_v23  ;;  %v928_v36 = vunpack.c.h.bf16 %v950_v27 }
  0x21   : > { %v512_v37 = vpack.c.bf16 %v507_v26, %v506_v25  ;;  %v911_v38 = vunpack.c.l.bf16 %v947_v30  ;;  %v931_v39 = vunpack.c.l.bf16 %v930_v31  ;;  %v932_v40 = vunpack.c.h.bf16 %v930_v31 }
  0x22   : > { %v713_v41 = vpack.c.bf16 %v708_v29, %v707_v28  ;;  %v912_v42 = vunpack.c.h.bf16 %v947_v30  ;;  %v943_v43 = vunpack.c.l.bf16 %v953_v32  ;;  %v944_v44 = vunpack.c.h.bf16 %v953_v32 }
  0x23   : > { %v542_v45 = vmul.f32 %v1075_v5, %v927_v35  ;;  %v543_v46 = vmul.f32 %v1075_v5, %v928_v36  ;;  %v488_v47 = vmul.f32 %v1086_v6, %v911_v38  ;;  %v683_v48 = vmul.f32 %v1091_v7, %v931_v39 }
  0x24   : > { %v684_v49 = vmul.f32 %v1091_v7, %v932_v40  ;;  %v489_v50 = vmul.f32 %v1086_v6, %v912_v42  ;;  %v689_v51 = vmul.f32 %v1091_v7, %v943_v43  ;;  %v690_v5 = vmul.f32 %v1091_v7, %v944_v44 }
  0x25   : > { %v554_v52 = vadd.f32 %v1105_v13, %v542_v45  ;;  %v555_v53 = vadd.f32 %v1105_v13, %v543_v46  ;;  %v695_v54 = vadd.f32 %v1116_v22, %v683_v48  ;;  %v500_v56 = vadd.f32 %v1111_v19, %v488_v47 }
  0x26   : > { %v696_v55 = vadd.f32 %v1116_v22, %v684_v49  ;;  %v501_v57 = vadd.f32 %v1111_v19, %v489_v50  ;;  %v701_v58 = vadd.f32 %v1116_v22, %v689_v51  ;;  %v702_v6 = vadd.f32 %v1116_v22, %v690_v5 }
  0x27   : > { %v562_v59 = vmax.f32 %v554_v52, 0.0  ;;  %v563_v60 = vmax.f32 %v555_v53, 0.0  ;;  %v703_v61 = vmax.f32 %v695_v54, 0.0  ;;  %v508_v62 = vmax.f32 %v500_v56, 0.0 }
  0x28   : > { %v704_v7 = vmax.f32 %v696_v55, 0.0  ;;  %v509_v63 = vmax.f32 %v501_v57, 0.0  ;;  %v709_v0 = vmax.f32 %v701_v58, 0.0  ;;  %v710_v13 = vmax.f32 %v702_v6, 0.0 }
  0x29   : > { %880 = vmatmul.msk.bf16.gmra.mxu3 %vm569_vm1, %v566_v33  ;;  %v567_v1 = vpack.c.bf16 %v563_v60, %v562_v59 }
  0x2a   : > { %888 = vmatmul.msk.bf16.gmra.mxu1 %vm621_vm2, %v512_v37  ;;  %v711_v2 = vpack.c.bf16 %v704_v7, %v703_v61  ;;  %v513_v3 = vpack.c.bf16 %v509_v63, %v508_v62  ;;  %v714_v8 = vpack.c.bf16 %v710_v13, %v709_v0 }
  0x2b   : > { %892 = vmatmul.msk.bf16.gmra.mxu2 %vm569_vm1, %v713_v41 }
  0x2c   : > { %886 = vmatmul.msk.bf16.vlgmr.msrb.gmra.mxu0 %vm621_vm2, %v510_v34 }
  0x39   : > { %881 = vmatmul.msk.bf16.gmra.mxu3 %vm569_vm1, %v567_v1 }
  0x3a   : > { %889 = vmatmul.msk.bf16.gmra.mxu1 %vm621_vm2, %v513_v3 }
  0x3b   : > { %893 = vmatmul.msk.bf16.gmra.mxu2 %vm569_vm1, %v714_v8 }
  0x3c   : > { %890 = vmatmul.msk.bf16.vlgmr.msra.gmra.mxu0 %vm569_vm1, %v711_v2 }
  0x97   : > { %v648_v22 = vpop.f32.mrf.mxu1 }
  0x99   : > { %v595_v19 = vpop.f32.mrf.mxu0 }
  0x9c   : > { %v600_v9 = vpop.f32.mrf.mxu3 }
  0x9d   : > { %v649_v10 = vadd.f32 %v648_v22, %v600_v9 }
  0x9e   : > { %v745_v11 = vpop.f32.mrf.mxu2 }
  0x9f   : > { %v762_v14 = vadd.f32 %v745_v11, %v649_v10  ;;  %v650_v15 = vpop.f32.mrf.mxu1 }
  0xa1   : > { %v597_v12 = vpop.f32.mrf.mxu0  ;;  %v770_v16 = vpack.c.bf16 %v762_v14, %v762_v14 }
  0xa3   : > { %779 = vst.msk [vmem:[%s1191_s20 + $0x8] sm:$0xf] %vm776_vm3, %v770_v16 }
  0xa4   : > { %v602_v17 = vpop.f32.mrf.mxu3 }
  0xa5   : > { %v651_v18 = vadd.f32 %v650_v15, %v602_v17 }
  0xa6   : > { %v747_v20 = vpop.f32.mrf.mxu2 }
  0xa7   : > { %v763_v21 = vadd.f32 %v747_v20, %v651_v18  ;;  %v653_v23 = vpop.f32.mrf.mxu1 }
  0xa9   : > { %v643_v4 = vpop.f32.mrf.mxu0  ;;  %v771_v24 = vpack.c.bf16 %v763_v21, %v763_v21 }
  0xaa   : > { %v644_v33 = vadd.f32 %v643_v4, %v595_v19 }
  0xab   : > { %780 = vst.msk [vmem:[%s1191_s20 + $0xc] sm:$0xf] %vm776_vm3, %v771_v24 }
  0xac   : > { %v605_v25 = vpop.f32.mrf.mxu3 }
  0xad   : > { %v654_v26 = vadd.f32 %v653_v23, %v605_v25 }
  0xae   : > { %v750_v27 = vpop.f32.mrf.mxu2 }
  0xaf   : > { %v764_v29 = vadd.f32 %v750_v27, %v654_v26  ;;  %v655_v30 = vpop.f32.mrf.mxu1 }
  0xb1   : > { %v645_v28 = vpop.f32.mrf.mxu0  ;;  %v772_v31 = vpack.c.bf16 %v764_v29, %v764_v29 }
  0xb2   : > { %v646_v43 = vadd.f32 %v645_v28, %v597_v12 }
  0xb3   : > { %781 = vst.msk [vmem:[%s1191_s20 + $0x10] sm:$0xf] %vm776_vm3, %v772_v31 }
  0xb4   : > { %v607_v32 = vpop.f32.mrf.mxu3 }
  0xb5   : > { %v656_v34 = vadd.f32 %v655_v30, %v607_v32 }
  0xb6   : > { %v752_v35 = vpop.f32.mrf.mxu2 }
  0xb7   : > { %v765_v37 = vadd.f32 %v752_v35, %v656_v34  ;;  %v658_v41 = vpop.f32.mrf.mxu1 }
  0xb9   : > { %v740_v36 = vpop.f32.mrf.mxu0  ;;  %v773_v39 = vpack.c.bf16 %v765_v37, %v765_v37 }
  0xba   : > { %v760_v38 = vadd.f32 %v740_v36, %v644_v33 }
  0xbb   : > { %782 = vst.msk [vmem:[%s1191_s20 + $0x14] sm:$0xf] %vm776_vm3, %v773_v39 }
  0xbc   : > { %v768_v40 = vpack.c.bf16 %v760_v38, %v760_v38  ;;  %v610_v42 = vpop.f32.mrf.mxu3 }
  0xbd   : > { %v659_v44 = vadd.f32 %v658_v41, %v610_v42 }
  0xbe   : > { %777 = vst.msk [vmem:[%s1191_s20] sm:$0xf] %vm776_vm3, %v768_v40  ;;  %v755_v45 = vpop.f32.mrf.mxu2 }
  0xbf   : > { %v766_v47 = vadd.f32 %v755_v45, %v659_v44  ;;  %v660_v51 = vpop.f32.mrf.mxu1 }
  0xc1   : > { %v742_v46 = vpop.f32.mrf.mxu0  ;;  %v774_v49 = vpack.c.bf16 %v766_v47, %v766_v47 }
  0xc2   : > { %v761_v48 = vadd.f32 %v742_v46, %v646_v43 }
  0xc3   : > { %783 = vst.msk [vmem:[%s1191_s20 + $0x18] sm:$0xf] %vm776_vm3, %v774_v49 }
  0xc4   : > { %v769_v50 = vpack.c.bf16 %v761_v48, %v761_v48  ;;  %v612_v5 = vpop.f32.mrf.mxu3 }
  0xc5   : > { %v661_v52 = vadd.f32 %v660_v51, %v612_v5 }
  0xc6   : > { %778 = vst.msk [vmem:[%s1191_s20 + $0x4] sm:$0xf] %vm776_vm3, %v769_v50  ;;  %v757_v53 = vpop.f32.mrf.mxu2 }
  0xc7   : > { %v767_v54 = vadd.f32 %v757_v53, %v661_v52 }
  0xc9   : > { %v775_v55 = vpack.c.bf16 %v767_v54, %v767_v54 }
  0xcb   : > { %784 = vst.msk [vmem:[%s1191_s20 + $0x1c] sm:$0xf] %vm776_vm3, %v775_v55 }
  0xcc PF: > { %s22_s21 = sadd.s32 1, %s977_s21  }
  0xcd   : > { %p19_p4 = scmp.ge.s32.totalorder %s22_s21, 4  }
  0xcf   :  { %21 = sbr.rel (!%p19_p4) target bundleno = 1 (0x1), region = 104 }

// kernel: densenet_forward.21
= control target key start
LH: loop header
LB: loop body
LE: loop exit
PB: predicated region body
PF: predicated region fallthrough
CT: control target
= control target key end

     0   :  { %vm63_vm0 = vcmask 1043456   ;;  %vm56_vm1 = vcmask 64512   ;;  %vm94_vm2 = vcmask 257024   ;;  %s178_s1 = inlined_call_operand.vmem [shape: bf16[8,32], index: 1, kind: input, shape index: {}]   ;;  %s179_s0 = inlined_call_operand.vmem [shape: bf16[32,8], index: 0, kind: input, shape index: {}]   ;;  %s180_s2 = inlined_call_operand.vmem [shape: f32[1,8], index: 2, kind: input, shape index: {}]   ;;  %s181_s3 = inlined_call_operand.vmem [shape: f32[1,8], index: 3, kind: input, shape index: {}]   ;;  %s182_s4 = inlined_call_operand.vmem [shape: f32[1,32], index: 4, kind: input, shape index: {}]   ;;  %s183_s5 = inlined_call_operand.vmem [shape: bf16[32,32], index: 5, kind: output, shape index: {}]  }
   0x1   :  { %v51_v0 = vld [vmem:[%s178_s1] sm:$0xf]  ;;  %v113_v6 = vld [vmem:[%s179_s0 + $0x8] sm:$0xff]  }
   0x2   :  { %v106_v1 = vld [vmem:[%s179_s0] sm:$0xff]   ;;  %v65_v2 = vsel %vm63_vm0, %v51_v0, 0  ;;  %v111_v8 = vunpack.c.l.bf16 %v113_v6  ;;  %v112_v9 = vunpack.c.h.bf16 %v113_v6 }
   0x3   :  { %v107_v3 = vunpack.c.l.bf16 %v106_v1  ;;  %v108_v4 = vunpack.c.h.bf16 %v106_v1  ;;  %v115_v5 = vld [vmem:[%s180_s2] ss:$0 sm:$0xff]  ;;  %74 = vmatpush.bf16.msra.mxu0 %v65_v2  ;;  %114 = vmatpush.bf16.msra.mxu1 %v65_v2 }
   0x4   :  { %v116_v7 = vld [vmem:[%s181_s3] ss:$0 sm:$0xff]  ;;  %v35_v12 = vmul.f32 %v115_v5, %v111_v8  ;;  %v36_v13 = vmul.f32 %v115_v5, %v112_v9 }
   0x5   :  { %v33_v10 = vmul.f32 %v115_v5, %v107_v3  ;;  %v34_v11 = vmul.f32 %v115_v5, %v108_v4  ;;  %v117_v24 = vld [vmem:[%s182_s4] ss:$0 sm:$0xff] }
   0x6   :  { %v43_v16 = vadd.f32 %v116_v7, %v35_v12  ;;  %v44_v17 = vadd.f32 %v116_v7, %v36_v13 }
   0x7   :  { %v41_v14 = vadd.f32 %v116_v7, %v33_v10  ;;  %v42_v15 = vadd.f32 %v116_v7, %v34_v11 }
   0x8   :  { %v47_v20 = vmax.f32 %v43_v16, 0.0  ;;  %v48_v21 = vmax.f32 %v44_v17, 0.0 }
   0x9   :  { %v45_v18 = vmax.f32 %v41_v14, 0.0  ;;  %v46_v19 = vmax.f32 %v42_v15, 0.0 }
   0xa   :  { %v50_v23 = vpack.c.bf16 %v48_v21, %v47_v20 }
   0xb   :  { %v49_v22 = vpack.c.bf16 %v46_v19, %v45_v18 }
   0xc   :  { %104 = vmatmul.msk.bf16.vlgmr.msra.gmra.mxu1 %vm56_vm1, %v50_v23 }
   0xd   :  { %103 = vmatmul.msk.bf16.vlgmr.msra.gmra.mxu0 %vm56_vm1, %v49_v22 }
  0x89   :  { %v81_v27 = vpop.f32.mrf.mxu1 }
  0x8a   :  { %v76_v25 = vpop.f32.mrf.mxu0  ;;  %v82_v28 = vadd.f32 %v117_v24, %v81_v27 }
  0x8b   :  { %v77_v26 = vadd.f32 %v117_v24, %v76_v25 }
  0x8c   :  { %v88_v30 = vmax.f32 %v82_v28, 0.0 }
  0x8d   :  { %v86_v29 = vmax.f32 %v77_v26, 0.0 }
  0x8e   :  { %v92_v32 = vpack.c.bf16 %v88_v30, %v88_v30 }
  0x8f   :  { %v90_v31 = vpack.c.bf16 %v86_v29, %v86_v29 }
  0x90   :  { %97 = vst.msk [vmem:[%s183_s5 + $0x8] sm:$0xf] %vm94_vm2, %v92_v32 }
  0x91   :  { %95 = vst.msk [vmem:[%s183_s5] sm:$0xf] %vm94_vm2, %v90_v31  ;;  %v83_v35 = vpop.f32.mrf.mxu1 }
  0x92   :  { %v78_v33 = vpop.f32.mrf.mxu0  ;;  %v84_v36 = vadd.f32 %v117_v24, %v83_v35 }
  0x93   :  { %v79_v34 = vadd.f32 %v117_v24, %v78_v33 }
  0x94   :  { %v89_v38 = vmax.f32 %v84_v36, 0.0 }
  0x95   :  { %v87_v37 = vmax.f32 %v79_v34, 0.0 }
  0x96   :  { %v93_v40 = vpack.c.bf16 %v89_v38, %v89_v38 }
  0x97   :  { %v91_v39 = vpack.c.bf16 %v87_v37, %v87_v37 }
  0x98   :  { %98 = vst.msk [vmem:[%s183_s5 + $0xc] sm:$0xf] %vm94_vm2, %v93_v40 }
  0x99   :  { %96 = vst.msk [vmem:[%s183_s5 + $0x4] sm:$0xf] %vm94_vm2, %v91_v39 }

// kernel: densenet_forward.22
= control target key start
LH: loop header
LB: loop body
LE: loop exit
PB: predicated region body
PF: predicated region fallthrough
CT: control target
= control target key end

     0   :  { %s832_s9 = smov 0   ;;  %s937_s0 = inlined_call_operand.vmem [shape: bf16[2,6,16,96], index: 0, kind: input, shape index: {}]   ;;  %s938_s1 = inlined_call_operand.vmem [shape: bf16[3,96,8], index: 1, kind: input, shape index: {}]   ;;  %s939_s2 = inlined_call_operand.vmem [shape: bf16[2,64,8], index: 2, kind: output, shape index: {}]  }
   0x1 LB: > { %s581_s10 = sadd.s32 4294967295, %s815_s9   ;;  %p585_p0 = scmp.ge.s32.totalorder %s815_s9, 1  ;;  %s815_s9 = sphi %s832_s9, %s12_s9  }
   0x2   : > { %p112_p1 = scmp.lt.s32.totalorder %s815_s9, 3 }
   0x4   : > { %p113_p2 = pnand %p585_p0, %p112_p1 }
   0x5   : > { %p134_p3 = scmp.lt.s32.totalorder (!%p113_p2), %s581_s10, 1 }
   0x6   : > { %116 = sbr.rel (%p113_p2) target bundleno = 229 (0xe5), region = 28 }
   0xb   : > { %v783_v0 = vld [vmem:[%s938_s1 + $0x58] sm:$0xff]  ;;  %v773_v1 = vld [vmem:[%s938_s1 + $0x28] sm:$0xff]  ;;  %v782_v3 = vld [vmem:[%s938_s1 + $0x50] sm:$0xff]  ;;  %s941_s10 = smov (!%p134_p3, %s581_s10), 1  ;;  %vm243_vm0 = vcmask 785408   ;;  %vm517_vm1 = vcmask 60416  }
   0xc   : > { %v793_v2 = vld [vmem:[%s938_s1 + $0x88] sm:$0xff]  ;;  %258 = vmatpush.bf16.msra.mxu0 %v783_v0  ;;  %355 = vmatpush.bf16.msra.mxu1 %v773_v1  ;;  %v772_v4 = vld [vmem:[%s938_s1 + $0x20] sm:$0xff]  ;;  %v771_v7 = vld [vmem:[%s938_s1 + $0x18] sm:$0xff]  ;;  %s800_s13 = smul.u32 48, %s941_s10  ;;  %s763_s25 = sshll.u32 %s941_s10, 5 }
   0xd   : > { %474 = vmatpush.bf16.msra.mxu2 %v793_v2  ;;  %v792_v5 = vld [vmem:[%s938_s1 + $0x80] sm:$0xff]  ;;  %794 = vmatpush.bf16.msra.mxu3 %v783_v0  ;;  %v781_v6 = vld [vmem:[%s938_s1 + $0x48] sm:$0xff]  ;;  %v791_v8 = vld [vmem:[%s938_s1 + $0x78] sm:$0xff]  ;;  %s916_s28 = scalar_lea.vmem %s939_s2, %s763_s25 }
   0xe   : > { %v780_v9 = vld [vmem:[%s938_s1 + $0x40] sm:$0xff]  ;;  %v770_v10 = vld [vmem:[%s938_s1 + $0x10] sm:$0xff]  ;;  %v779_v12 = vld [vmem:[%s938_s1 + $0x38] sm:$0xff]  ;;  %s138_s22 = scalar_lea.vmem %s937_s0, %s800_s13 }
   0xf   : > { %v790_v11 = vld [vmem:[%s938_s1 + $0x70] sm:$0xff]  ;;  %v769_v13 = vld [vmem:[%s938_s1 + $0x8] sm:$0xff]  ;;  %v768_v16 = vld [vmem:[%s938_s1] sm:$0xff] }
  0x10   : > { %259 = vmatpush.bf16.msra.mxu0 %v782_v3  ;;  %356 = vmatpush.bf16.msra.mxu1 %v772_v4  ;;  %v789_v14 = vld [vmem:[%s938_s1 + $0x68] sm:$0xff]  ;;  %v778_v15 = vld [vmem:[%s938_s1 + $0x30] sm:$0xff]  ;;  %v788_v17 = vld [vmem:[%s938_s1 + $0x60] sm:$0xff] }
  0x11   : > { %475 = vmatpush.bf16.msra.mxu2 %v792_v5  ;;  %795 = vmatpush.bf16.msra.mxu3 %v782_v3  ;;  %v774_v18 = vld [vmem:[%s138_s22 + $0x8] sm:$0xff]  ;;  %v764_v19 = vld [vmem:[%s138_s22] sm:$0xff]  ;;  %v784_v20 = vld [vmem:[%s138_s22 + $0x10] sm:$0xff] }
  0x12   : > { %v775_v21 = vld [vmem:[%s138_s22 + $0x10] sm:$0xff]  ;;  %v765_v22 = vld [vmem:[%s138_s22 + $0x8] sm:$0xff]  ;;  %v785_v23 = vld [vmem:[%s138_s22 + $0x18] sm:$0xff] }
  0x13   : > { %v776_v24 = vld [vmem:[%s138_s22 + $0x18] sm:$0xff]  ;;  %v766_v25 = vld [vmem:[%s138_s22 + $0x10] sm:$0xff]  ;;  %v786_v26 = vld [vmem:[%s138_s22 + $0x20] sm:$0xff] }
  0x14   : > { %260 = vmatpush.bf16.msra.mxu0 %v781_v6  ;;  %357 = vmatpush.bf16.msra.mxu1 %v771_v7  ;;  %v777_v27 = vld [vmem:[%s138_s22 + $0x20] sm:$0xff]  ;;  %v767_v28 = vld [vmem:[%s138_s22 + $0x18] sm:$0xff]  ;;  %v787_v29 = vld [vmem:[%s138_s22 + $0x28] sm:$0xff] }
  0x15   : > { %476 = vmatpush.bf16.msra.mxu2 %v791_v8  ;;  %796 = vmatpush.bf16.msra.mxu3 %v781_v6 }
  0x18   : > { %261 = vmatpush.bf16.msra.mxu0 %v780_v9  ;;  %358 = vmatpush.bf16.msra.mxu1 %v770_v10 }
  0x19   : > { %477 = vmatpush.bf16.msra.mxu2 %v790_v11  ;;  %797 = vmatpush.bf16.msra.mxu3 %v780_v9 }
  0x1c   : > { %262 = vmatpush.bf16.msra.mxu0 %v779_v12  ;;  %359 = vmatpush.bf16.msra.mxu1 %v769_v13 }
  0x1d   : > { %478 = vmatpush.bf16.msra.mxu2 %v789_v14  ;;  %798 = vmatpush.bf16.msra.mxu3 %v779_v12 }
  0x20   : > { %263 = vmatpush.bf16.msra.mxu0 %v778_v15  ;;  %360 = vmatpush.bf16.msra.mxu1 %v768_v16 }
  0x21   : > { %479 = vmatpush.bf16.msra.mxu2 %v788_v17  ;;  %799 = vmatpush.bf16.msra.mxu3 %v778_v15 }
  0x23   : > { %649 = vmatmul.msk.bf16.vlgmr.msra.gmra.mxu0 %vm243_vm0, %v774_v18  ;;  %693 = vmatmul.msk.bf16.vlgmr.msra.gmra.mxu1 %vm243_vm0, %v764_v19 }
  0x24   : > { %757 = vmatmul.msk.bf16.vlgmr.msra.gmra.mxu2 %vm243_vm0, %v784_v20  ;;  %650 = vmatmul.msk.bf16.vlgmr.msra.gmra.mxu3 %vm243_vm0, %v775_v21 }
  0x33   : > { %694 = vmatmul.msk.bf16.gmra.mxu1 %vm243_vm0, %v765_v22 }
  0x34   : > { %758 = vmatmul.msk.bf16.gmra.mxu2 %vm243_vm0, %v785_v23  ;;  %651 = vmatmul.msk.bf16.gmra.mxu3 %vm243_vm0, %v776_v24 }
  0x43   : > { %695 = vmatmul.msk.bf16.gmra.mxu1 %vm243_vm0, %v766_v25 }
  0x44   : > { %759 = vmatmul.msk.bf16.gmra.mxu2 %vm243_vm0, %v786_v26  ;;  %652 = vmatmul.msk.bf16.gmra.mxu3 %vm243_vm0, %v777_v27 }
  0x53   : > { %696 = vmatmul.msk.bf16.gmra.mxu1 %vm243_vm0, %v767_v28 }
  0x54   : > { %760 = vmatmul.msk.bf16.gmra.mxu2 %vm243_vm0, %v787_v29 }
  0xa0   : > { %v362_v30 = vpop.f32.mrf.mxu1  ;;  %v265_v31 = vpop.f32.mrf.mxu0 }
  0xa1   : > { %v363_v32 = vadd.f32 %v362_v30, %v265_v31 }
  0xa7   : > { %v481_v33 = vpop.f32.mrf.mxu2  ;;  %v270_v38 = vpop.f32.mrf.mxu3 }
  0xa8   : > { %v501_v34 = vadd.f32 %v481_v33, %v363_v32  ;;  %v364_v35 = vpop.f32.mrf.mxu1  ;;  %v267_v37 = vpop.f32.mrf.mxu0 }
  0xa9   : > { %v365_v39 = vadd.f32 %v364_v35, %v267_v37 }
  0xaa   : > { %v509_v36 = vpack.c.bf16 %v501_v34, %v501_v34 }
  0xac   : > { %518 = vst.msk [vmem:[%s916_s28] sm:$0xf] %vm517_vm1, %v509_v36 }
  0xaf   : > { %v483_v40 = vpop.f32.mrf.mxu2  ;;  %v272_v45 = vpop.f32.mrf.mxu3 }
  0xb0   : > { %v502_v41 = vadd.f32 %v483_v40, %v365_v39  ;;  %v367_v42 = vpop.f32.mrf.mxu1 }
  0xb1   : > { %v368_v44 = vadd.f32 %v367_v42, %v270_v38 }
  0xb2   : > { %v510_v43 = vpack.c.bf16 %v502_v41, %v502_v41 }
  0xb4   : > { %519 = vst.msk [vmem:[%s916_s28 + $0x4] sm:$0xf] %vm517_vm1, %v510_v43 }
  0xb7   : > { %v486_v46 = vpop.f32.mrf.mxu2  ;;  %v275_v51 = vpop.f32.mrf.mxu3 }
  0xb8   : > { %v503_v47 = vadd.f32 %v486_v46, %v368_v44  ;;  %v369_v48 = vpop.f32.mrf.mxu1 }
  0xb9   : > { %v370_v50 = vadd.f32 %v369_v48, %v272_v45 }
  0xba   : > { %v511_v49 = vpack.c.bf16 %v503_v47, %v503_v47 }
  0xbc   : > { %520 = vst.msk [vmem:[%s916_s28 + $0x8] sm:$0xf] %vm517_vm1, %v511_v49 }
  0xbf   : > { %v488_v52 = vpop.f32.mrf.mxu2  ;;  %v277_v60 = vpop.f32.mrf.mxu3 }
  0xc0   : > { %v504_v53 = vadd.f32 %v488_v52, %v370_v50  ;;  %v372_v54 = vpop.f32.mrf.mxu1 }
  0xc1   : > { %v373_v56 = vadd.f32 %v372_v54, %v275_v51 }
  0xc2   : > { %v512_v55 = vpack.c.bf16 %v504_v53, %v504_v53 }
  0xc4   : > { %521 = vst.msk [vmem:[%s916_s28 + $0xc] sm:$0xf] %vm517_vm1, %v512_v55 }
  0xc7   : > { %v491_v57 = vpop.f32.mrf.mxu2  ;;  %v280_v3 = vpop.f32.mrf.mxu3 }
  0xc8   : > { %v505_v58 = vadd.f32 %v491_v57, %v373_v56  ;;  %v374_v59 = vpop.f32.mrf.mxu1 }
  0xc9   : > { %v375_v62 = vadd.f32 %v374_v59, %v277_v60 }
  0xca   : > { %v513_v61 = vpack.c.bf16 %v505_v58, %v505_v58 }
  0xcc   : > { %522 = vst.msk [vmem:[%s916_s28 + $0x10] sm:$0xf] %vm517_vm1, %v513_v61 }
  0xcf   : > { %v493_v63 = vpop.f32.mrf.mxu2  ;;  %v282_v9 = vpop.f32.mrf.mxu3 }
  0xd0   : > { %v506_v0 = vadd.f32 %v493_v63, %v375_v62  ;;  %v377_v1 = vpop.f32.mrf.mxu1 }
  0xd1   : > { %v378_v4 = vadd.f32 %v377_v1, %v280_v3 }
  0xd2   : > { %v514_v2 = vpack.c.bf16 %v506_v0, %v506_v0 }
  0xd4   : > { %523 = vst.msk [vmem:[%s916_s28 + $0x14] sm:$0xf] %vm517_vm1, %v514_v2 }
  0xd7   : > { %v496_v5 = vpop.f32.mrf.mxu2 }
  0xd8   : > { %v507_v6 = vadd.f32 %v496_v5, %v378_v4  ;;  %v379_v8 = vpop.f32.mrf.mxu1 }
  0xd9   : > { %v380_v10 = vadd.f32 %v379_v8, %v282_v9 }
  0xda   : > { %v515_v7 = vpack.c.bf16 %v507_v6, %v507_v6 }
  0xdc   : > { %524 = vst.msk [vmem:[%s916_s28 + $0x18] sm:$0xf] %vm517_vm1, %v515_v7 }
  0xdf   : > { %v498_v11 = vpop.f32.mrf.mxu2 }
  0xe0   : > { %v508_v12 = vadd.f32 %v498_v11, %v380_v10 }
  0xe2   : > { %v516_v13 = vpack.c.bf16 %v508_v12, %v508_v12 }
  0xe4   : > { %525 = vst.msk [vmem:[%s916_s28 + $0x1c] sm:$0xf] %vm517_vm1, %v516_v13 }
  0xe5 PF: > { %s12_s9 = sadd.s32 1, %s815_s9  }
  0xe6   : > { %p9_p4 = scmp.ge.s32.totalorder %s12_s9, 4  }
  0xe8   :  { %11 = sbr.rel (!%p9_p4) target bundleno = 1 (0x1), region = 62 }

// kernel: densenet_forward.23
= control target key start
LH: loop header
LB: loop body
LE: loop exit
PB: predicated region body
PF: predicated region fallthrough
CT: control target
= control target key end

     0   :  { %vm102_vm0 = vcmask 1043456   ;;  %vm95_vm1 = vcmask 64512   ;;  %vm169_vm2 = vcmask 257024   ;;  %s310_s3 = inlined_call_operand.vmem [shape: bf16[8,32], index: 3, kind: input, shape index: {}]   ;;  %s311_s2 = inlined_call_operand.vmem [shape: bf16[8,32], index: 2, kind: input, shape index: {}]   ;;  %s312_s1 = inlined_call_operand.vmem [shape: bf16[32,8], index: 1, kind: input, shape index: {}]   ;;  %s313_s5 = inlined_call_operand.vmem [shape: f32[1,8], index: 5, kind: input, shape index: {}]   ;;  %s314_s7 = inlined_call_operand.vmem [shape: f32[1,8], index: 7, kind: input, shape index: {}]   ;;  %s315_s0 = inlined_call_operand.vmem [shape: bf16[32,8], index: 0, kind: input, shape index: {}]   ;;  %s316_s4 = inlined_call_operand.vmem [shape: f32[1,8], index: 4, kind: input, shape index: {}]   ;;  %s317_s6 = inlined_call_operand.vmem [shape: f32[1,8], index: 6, kind: input, shape index: {}]   ;;  %s318_s8 = inlined_call_operand.vmem [shape: f32[1,32], index: 8, kind: input, shape index: {}]   ;;  %s319_s9 = inlined_call_operand.vmem [shape: bf16[32,32], index: 9, kind: output, shape index: {}]  }
   0x1   :  { %v94_v0 = vld [vmem:[%s310_s3] sm:$0xf]  ;;  %v199_v9 = vld [vmem:[%s312_s1 + $0x8] sm:$0xff]  }
   0x2   :  { %v63_v1 = vld [vmem:[%s311_s2] sm:$0xf]  ;;  %v104_v3 = vsel %vm102_vm0, %v94_v0, 0  ;;  %v196_v12 = vunpack.c.l.bf16 %v199_v9  ;;  %v197_v13 = vunpack.c.h.bf16 %v199_v9  ;;  %v198_v19 = vld [vmem:[%s315_s0 + $0x8] sm:$0xff]  }
   0x3   :  { %v191_v2 = vld [vmem:[%s312_s1] sm:$0xff]   ;;  %v132_v4 = vsel %vm102_vm0, %v63_v1, 0  ;;  %113 = vmatpush.bf16.msra.mxu0 %v104_v3  ;;  %200 = vmatpush.bf16.msra.mxu2 %v104_v3  ;;  %v188_v26 = vunpack.c.l.bf16 %v198_v19  ;;  %v189_v27 = vunpack.c.h.bf16 %v198_v19 }
   0x4   :  { %v192_v5 = vunpack.c.l.bf16 %v191_v2  ;;  %v193_v6 = vunpack.c.h.bf16 %v191_v2  ;;  %v202_v7 = vld [vmem:[%s313_s5] ss:$0 sm:$0xff]  ;;  %141 = vmatpush.bf16.msra.mxu1 %v132_v4  ;;  %201 = vmatpush.bf16.msra.mxu3 %v132_v4 }
   0x5   :  { %v203_v8 = vld [vmem:[%s314_s7] ss:$0 sm:$0xff]  ;;  %v78_v22 = vmul.f32 %v202_v7, %v196_v12  ;;  %v79_v23 = vmul.f32 %v202_v7, %v197_v13 }
   0x6   :  { %v76_v10 = vmul.f32 %v202_v7, %v192_v5  ;;  %v77_v11 = vmul.f32 %v202_v7, %v193_v6  ;;  %v183_v14 = vld [vmem:[%s315_s0] sm:$0xff]  }
   0x7   :  { %v204_v15 = vld [vmem:[%s316_s4] ss:$0 sm:$0xff]  ;;  %v184_v16 = vunpack.c.l.bf16 %v183_v14  ;;  %v185_v17 = vunpack.c.h.bf16 %v183_v14  ;;  %v86_v30 = vadd.f32 %v203_v8, %v78_v22  ;;  %v87_v31 = vadd.f32 %v203_v8, %v79_v23 }
   0x8   :  { %v205_v18 = vld [vmem:[%s317_s6] ss:$0 sm:$0xff]  ;;  %v84_v20 = vadd.f32 %v203_v8, %v76_v10  ;;  %v85_v21 = vadd.f32 %v203_v8, %v77_v11  ;;  %v47_v34 = vmul.f32 %v204_v15, %v188_v26  ;;  %v48_v35 = vmul.f32 %v204_v15, %v189_v27 }
   0x9   :  { %v45_v24 = vmul.f32 %v204_v15, %v184_v16  ;;  %v46_v25 = vmul.f32 %v204_v15, %v185_v17  ;;  %v90_v37 = vmax.f32 %v86_v30, 0.0  ;;  %v91_v38 = vmax.f32 %v87_v31, 0.0  ;;  %v206_v49 = vld [vmem:[%s318_s8] ss:$0 sm:$0xff] }
   0xa   :  { %v88_v28 = vmax.f32 %v84_v20, 0.0  ;;  %v89_v29 = vmax.f32 %v85_v21, 0.0  ;;  %v55_v41 = vadd.f32 %v205_v18, %v47_v34  ;;  %v56_v42 = vadd.f32 %v205_v18, %v48_v35 }
   0xb   :  { %v53_v32 = vadd.f32 %v205_v18, %v45_v24  ;;  %v54_v33 = vadd.f32 %v205_v18, %v46_v25  ;;  %v93_v43 = vpack.c.bf16 %v91_v38, %v90_v37 }
   0xc   :  { %v92_v36 = vpack.c.bf16 %v89_v29, %v88_v28  ;;  %v59_v45 = vmax.f32 %v55_v41, 0.0  ;;  %v60_v46 = vmax.f32 %v56_v42, 0.0 }
   0xd   :  { %v57_v39 = vmax.f32 %v53_v32, 0.0  ;;  %v58_v40 = vmax.f32 %v54_v33, 0.0  ;;  %179 = vmatmul.msk.bf16.vlgmr.msra.gmra.mxu2 %vm95_vm1, %v93_v43 }
   0xe   :  { %178 = vmatmul.msk.bf16.vlgmr.msra.gmra.mxu0 %vm95_vm1, %v92_v36  ;;  %v62_v47 = vpack.c.bf16 %v60_v46, %v59_v45 }
   0xf   :  { %v61_v44 = vpack.c.bf16 %v58_v40, %v57_v39 }
  0x10   :  { %181 = vmatmul.msk.bf16.vlgmr.msra.gmra.mxu3 %vm95_vm1, %v62_v47 }
  0x11   :  { %180 = vmatmul.msk.bf16.vlgmr.msra.gmra.mxu1 %vm95_vm1, %v61_v44 }
  0x8b   :  { %v115_v48 = vpop.f32.mrf.mxu0 }
  0x8e   :  { %v143_v50 = vpop.f32.mrf.mxu1 }
  0x8f   :  { %v144_v51 = vadd.f32 %v143_v50, %v115_v48 }
  0x90   :  { %v120_v54 = vpop.f32.mrf.mxu2 }
  0x91   :  { %v157_v52 = vadd.f32 %v206_v49, %v144_v51 }
  0x93   :  { %v161_v53 = vmax.f32 %v157_v52, 0.0  ;;  %v117_v55 = vpop.f32.mrf.mxu0  ;;  %v148_v57 = vpop.f32.mrf.mxu3 }
  0x94   :  { %v149_v59 = vadd.f32 %v148_v57, %v120_v54 }
  0x95   :  { %v165_v56 = vpack.c.bf16 %v161_v53, %v161_v53 }
  0x96   :  { %v145_v58 = vpop.f32.mrf.mxu1  ;;  %v159_v61 = vadd.f32 %v206_v49, %v149_v59 }
  0x97   :  { %170 = vst.msk [vmem:[%s319_s9] sm:$0xf] %vm169_vm2, %v165_v56  ;;  %v146_v60 = vadd.f32 %v145_v58, %v117_v55 }
  0x98   :  { %v163_v63 = vmax.f32 %v159_v61, 0.0  ;;  %v122_v1 = vpop.f32.mrf.mxu2 }
  0x99   :  { %v158_v62 = vadd.f32 %v206_v49, %v146_v60 }
  0x9a   :  { %v167_v2 = vpack.c.bf16 %v163_v63, %v163_v63 }
  0x9b   :  { %v162_v0 = vmax.f32 %v158_v62, 0.0  ;;  %v150_v4 = vpop.f32.mrf.mxu3 }
  0x9c   :  { %172 = vst.msk [vmem:[%s319_s9 + $0x8] sm:$0xf] %vm169_vm2, %v167_v2  ;;  %v151_v5 = vadd.f32 %v150_v4, %v122_v1 }
  0x9d   :  { %v166_v3 = vpack.c.bf16 %v162_v0, %v162_v0 }
  0x9e   :  { %v160_v6 = vadd.f32 %v206_v49, %v151_v5 }
  0x9f   :  { %171 = vst.msk [vmem:[%s319_s9 + $0x4] sm:$0xf] %vm169_vm2, %v166_v3 }
  0xa0   :  { %v164_v7 = vmax.f32 %v160_v6, 0.0 }
  0xa2   :  { %v168_v8 = vpack.c.bf16 %v164_v7, %v164_v7 }
  0xa4   :  { %173 = vst.msk [vmem:[%s319_s9 + $0xc] sm:$0xf] %vm169_vm2, %v168_v8 }

// kernel: densenet_forward.25
= control target key start
LH: loop header
LB: loop body
LE: loop exit
PB: predicated region body
PF: predicated region fallthrough
CT: control target
= control target key end

     0   :  { %vm101_vm0 = vcmask 1043456   ;;  %vm36_vm1 = vcmask 64512   ;;  %s391_s0 = inlined_call_operand.vmem [shape: bf16[2,16,8], index: 0, kind: input, shape index: {}]   ;;  %s392_s1 = inlined_call_operand.vmem [shape: bf16[2,16,8], index: 1, kind: input, shape index: {}]   ;;  %s393_s2 = inlined_call_operand.vmem [shape: bf16[2,16,8], index: 2, kind: input, shape index: {}]   ;;  %s394_s3 = inlined_call_operand.vmem [shape: bf16[8,10], index: 3, kind: input, shape index: {}]   ;;  %s395_s4 = inlined_call_operand.vmem [shape: bf16[8,10], index: 4, kind: input, shape index: {}]   ;;  %s396_s5 = inlined_call_operand.vmem [shape: bf16[8,10], index: 5, kind: input, shape index: {}]   ;;  %s397_s6 = inlined_call_operand.vmem [shape: f32[1,10], index: 6, kind: input, shape index: {}]   ;;  %s398_s7 = inlined_call_operand.hbm [shape: f32[2,10], index: 7, kind: output, shape index: {}]  }
   0x1   :  { %v90_v0 = vld [vmem:[%s395_s4] sm:$0xf]  ;;  %v262_v6 = vld [vmem:[%s392_s1 + $0x8] sm:$0xff]  }
   0x2   :  { %v59_v1 = vld [vmem:[%s394_s3] sm:$0xf]  ;;  %v103_v2 = vsel %vm101_vm0, %v90_v0, 0  ;;  %v251_v10 = vunpack.c.l.bf16 %v262_v6  ;;  %v261_v12 = vld [vmem:[%s391_s0 + $0x8] sm:$0xff]   ;;  %v252_v13 = vunpack.c.h.bf16 %v262_v6 }
   0x3   :  { %v128_v3 = vsel %vm101_vm0, %v59_v1, 0  ;;  %v173_v4 = vld [vmem:[%s396_s5] sm:$0xf]  ;;  %112 = vmatpush.bf16.msra.mxu0 %v103_v2 }
   0x4   :  { %v246_v5 = vld [vmem:[%s392_s1] sm:$0xff]   ;;  %137 = vmatpush.bf16.msra.mxu1 %v128_v3  ;;  %v184_v7 = vsel %vm101_vm0, %v173_v4, 0 }
   0x5   :  { %v247_v8 = vunpack.c.l.bf16 %v246_v5  ;;  %v248_v9 = vunpack.c.h.bf16 %v246_v5  ;;  %v238_v11 = vld [vmem:[%s391_s0] sm:$0xff]   ;;  %193 = vmatpush.bf16.msra.mxu2 %v184_v7 }
   0x6   :  { %v239_v14 = vunpack.c.l.bf16 %v238_v11  ;;  %v240_v15 = vunpack.c.h.bf16 %v238_v11  ;;  %v254_v16 = vld [vmem:[%s393_s2] sm:$0xff]  }
   0x7   :  { %12 = vsyncpa [#allocation3], 0  ;;  %v68_v17 = vsel %vm36_vm1, %v247_v8, 0.0  ;;  %v69_v18 = vsel %vm36_vm1, %v248_v9, 0.0  ;;  %v77_v19 = vsel %vm36_vm1, %v251_v10, 0.0  ;;  %v243_v20 = vunpack.c.l.bf16 %v261_v12  ;;  %v263_v25 = vld [vmem:[%s393_s2 + $0x8] sm:$0xff]  }
   0x8   :  { %v70_v21 = vadd.f32 %v69_v18, %v68_v17  ;;  %v78_v22 = vsel %vm36_vm1, %v252_v13, 0.0  ;;  %v244_v23 = vunpack.c.h.bf16 %v261_v12  ;;  %v37_v24 = vsel %vm36_vm1, %v239_v14, 0.0  ;;  %s296_s15 = smov [#allocation2]   ;;  %s225_s18 = sshll.u32 %s398_s7, 4  ;;  %s226_s18 = int_to_ptr.hbm [resolvable:$true] %s225_s18 }
   0x9   :  { %v79_v26 = vadd.f32 %v78_v22, %v77_v19  ;;  %v38_v27 = vsel %vm36_vm1, %v240_v15, 0.0  ;;  %v46_v28 = vsel %vm36_vm1, %v243_v20, 0.0  ;;  %v255_v29 = vunpack.c.l.bf16 %v254_v16 }
   0xa   :  { %v71_v30 = vrot.slane %v70_v21, 4  ;;  %v39_v31 = vadd.f32 %v38_v27, %v37_v24  ;;  %v47_v32 = vsel %vm36_vm1, %v244_v23, 0.0  ;;  %v256_v33 = vunpack.c.h.bf16 %v254_v16 }
   0xb   :  { %v80_v34 = vrot.slane %v79_v26, 4  ;;  %v48_v35 = vadd.f32 %v47_v32, %v46_v28  ;;  %v259_v36 = vunpack.c.l.bf16 %v263_v25  ;;  %v260_v37 = vunpack.c.h.bf16 %v263_v25 }
   0xc   :  { %v72_v38 = vadd.f32 %v71_v30, %v70_v21  ;;  %v40_v39 = vrot.slane %v39_v31, 4  ;;  %v151_v40 = vsel %vm36_vm1, %v255_v29, 0.0  ;;  %v152_v41 = vsel %vm36_vm1, %v256_v33, 0.0 }
   0xd   :  { %v81_v42 = vadd.f32 %v80_v34, %v79_v26  ;;  %v49_v43 = vrot.slane %v48_v35, 4  ;;  %v153_v44 = vadd.f32 %v152_v41, %v151_v40  ;;  %v160_v45 = vsel %vm36_vm1, %v259_v36, 0.0 }
   0xe   :  { %v73_v46 = vrot.slane %v72_v38, 2  ;;  %v41_v47 = vadd.f32 %v40_v39, %v39_v31  ;;  %v161_v48 = vsel %vm36_vm1, %v260_v37, 0.0  ;;  %vm95_vm2 = vcmask 1041409  }
   0xf   :  { %v82_v49 = vrot.slane %v81_v42, 2  ;;  %v50_v50 = vadd.f32 %v49_v43, %v48_v35  ;;  %v154_v51 = vrot.slane %v153_v44, 4  ;;  %v162_v52 = vadd.f32 %v161_v48, %v160_v45  ;;  %v265_v43 = vld [vmem:[%s397_s6] ss:$0 sm:$0xff]  ;;  %s223_s6 = sshll.u32 %s296_s15, 4  ;;  %s224_s6 = int_to_ptr.vmem [resolvable:$true] %s223_s6 }
  0x10   :  { %v74_v53 = vadd.f32 %v73_v46, %v72_v38  ;;  %v42_v54 = vrot.slane %v41_v47, 2  ;;  %vm205_vm3 = vcmask 74752  }
  0x11   :  { %v83_v55 = vadd.f32 %v82_v49, %v81_v42  ;;  %v51_v56 = vrot.slane %v50_v50, 2  ;;  %v155_v57 = vadd.f32 %v154_v51, %v153_v44  ;;  %v163_v58 = vrot.slane %v162_v52, 4 }
  0x12   :  { %v75_v59 = vrot.slane %v74_v53, 1  ;;  %v43_v60 = vadd.f32 %v42_v54, %v41_v47 }
  0x13   :  { %v84_v61 = vrot.slane %v83_v55, 1  ;;  %v52_v62 = vadd.f32 %v51_v56, %v50_v50  ;;  %v156_v63 = vrot.slane %v155_v57, 2  ;;  %v164_v0 = vadd.f32 %v163_v58, %v162_v52 }
  0x14   :  { %v76_v1 = vadd.f32 %v75_v59, %v74_v53  ;;  %v44_v2 = vrot.slane %v43_v60, 1 }
  0x15   :  { %v85_v3 = vadd.f32 %v84_v61, %v83_v55  ;;  %v53_v4 = vrot.slane %v52_v62, 1  ;;  %v157_v5 = vadd.f32 %v156_v63, %v155_v57  ;;  %v165_v6 = vrot.slane %v164_v0, 2 }
  0x16   :  { %v86_v7 = vmul.f32 0.0625, %v76_v1  ;;  %v45_v8 = vadd.f32 %v44_v2, %v43_v60 }
  0x17   :  { %v87_v9 = vmul.f32 0.0625, %v85_v3  ;;  %v54_v10 = vadd.f32 %v53_v4, %v52_v62  ;;  %v158_v11 = vrot.slane %v157_v5, 1  ;;  %v166_v12 = vadd.f32 %v165_v6, %v164_v0 }
  0x18   :  { %v88_v13 = vpack.c.bf16 %v86_v7, %v86_v7  ;;  %v55_v14 = vmul.f32 0.0625, %v45_v8 }
  0x19   :  { %v89_v15 = vpack.c.bf16 %v87_v9, %v87_v9  ;;  %v56_v16 = vmul.f32 0.0625, %v54_v10  ;;  %v159_v17 = vadd.f32 %v158_v11, %v157_v5  ;;  %v167_v18 = vrot.slane %v166_v12, 1 }
  0x1a   :  { %v93_v19 = vunpack.c.l.b16 %v88_v13  ;;  %v57_v20 = vpack.c.bf16 %v55_v14, %v55_v14 }
  0x1b   :  { %v94_v21 = vunpack.c.l.b16 %v89_v15  ;;  %v58_v22 = vpack.c.bf16 %v56_v16, %v56_v16  ;;  %v168_v23 = vadd.f32 %v167_v18, %v166_v12  ;;  %v169_v24 = vmul.f32 0.0625, %v159_v17 }
  0x1c   :  { %v120_v25 = vunpack.c.l.b16 %v57_v20 }
  0x1d   :  { %v96_v26 = vsel %vm95_vm2, %v94_v21, %v93_v19  ;;  %v121_v27 = vunpack.c.l.b16 %v58_v22  ;;  %v170_v28 = vmul.f32 0.0625, %v168_v23  ;;  %v171_v29 = vpack.c.bf16 %v169_v24, %v169_v24 }
  0x1e   :  { %v97_v30 = vpack.c.b16 %v96_v26, %v96_v26 }
  0x1f   :  { %v122_v31 = vsel %vm95_vm2, %v121_v27, %v120_v25  ;;  %v172_v32 = vpack.c.bf16 %v170_v28, %v170_v28  ;;  %v176_v33 = vunpack.c.l.b16 %v171_v29 }
  0x20   :  { %234 = vmatmul.msk.bf16.vlgmr.msra.gmra.mxu0 %vm36_vm1, %v97_v30  ;;  %v123_v34 = vpack.c.b16 %v122_v31, %v122_v31 }
  0x21   :  { %v177_v35 = vunpack.c.l.b16 %v172_v32 }
  0x22   :  { %235 = vmatmul.msk.bf16.vlgmr.msra.gmra.mxu1 %vm36_vm1, %v123_v34 }
  0x23   :  { %v178_v36 = vsel %vm95_vm2, %v177_v35, %v176_v33 }
  0x24   :  { %v179_v37 = vpack.c.b16 %v178_v36, %v178_v36 }
  0x26   :  { %236 = vmatmul.msk.bf16.vlgmr.msra.gmra.mxu2 %vm36_vm1, %v179_v37 }
  0x9d   :  { %v114_v38 = vpop.f32.mrf.mxu0 }
  0x9f   :  { %v139_v39 = vpop.f32.mrf.mxu1 }
  0xa0   :  { %v140_v41 = vadd.f32 %v139_v39, %v114_v38 }
  0xa5   :  { %v116_v40 = vpop.f32.mrf.mxu0 }
  0xa7   :  { %v141_v42 = vpop.f32.mrf.mxu1 }
  0xa9   :  { %v195_v44 = vpop.f32.mrf.mxu2 }
  0xaa   :  { %v199_v45 = vadd.f32 %v195_v44, %v140_v41 }
  0xac   :  { %v204_v46 = vadd.f32 %v265_v43, %v199_v45 }
  0xae   :  { %v206_v47 = vsel %vm205_vm3, %v204_v46, -inf }
  0xaf   :  { %207 = vmax.xlane.f32.xlu0 %v206_v47 }
  0xb1   :  { %v197_v48 = vpop.f32.mrf.mxu2 }
 0x122   :  { %v208_v49 = vpop.xlane.xlu0 %207 }
 0x123   :  { %v209_v50 = vsub.f32 %v204_v46, %v208_v49 }
 0x125   :  { %v210_v51 = vmul.f32 1.442695, %v209_v50 }
 0x127   :  { %266 = vpow2.f32 %v210_v51 }
 0x12d   :  { %v267_v52 = vpop.eup %266 }
 0x12e   :  { %v212_v53 = vsel %vm205_vm3, %v267_v52, 0.0 }
 0x12f   :  { %213 = vadd.xlane.f32.xlu0 %v212_v53 }
 0x1a2   :  { %v214_v54 = vpop.xlane.xlu0 %213 }
 0x1a3   :  { %268 = vrcp.f32 %v214_v54 }
 0x1a9   :  { %v269_v55 = vpop.eup %268 }
 0x1aa   :  { %v216_v56 = vmul.f32 %v269_v55, %v267_v52 }
 0x1ac   :  { %217 = vst.msk [vmem:[#allocation2] sm:$0x3] %vm205_vm3, %v216_v56 }
 0x1ad   :  { %228 = dma.vmem_to_hbm [thread:$0]  %s224_s6, 32, %s226_s18, [#allocation3]  }
 0x1ae   :  { %294 = dma.done.wait [#allocation3], 32  }
 0x1af   :  { %295 = vsyncadd [#allocation3], 4294967264 }
 0x1b0   :  { %233 = vsyncpa [#allocation3], 1 }

</bundles_post_ra>
